<compile_context>
chip_gen: v7x
topology: tpu7x:2x2x1
jax: 0.10.0
libtpu: 0.0.40
codegen_flags: <defaults>
</compile_context>

<pallas_src>
import math
from functools import partial

import numpy as np
import jax
import jax.numpy as jnp
from jax import lax
from jax.experimental import pallas as pl
from jax.experimental.pallas import tpu as pltpu

# ----------------------------- configuration --------------------------------
IMG = 32
PATCH = 8
IN_CH = 1
EMBED = 32
DEPTH = 2
HEADS = 4
DEC_EMBED = 32
DEC_DEPTH = 2
DEC_HEADS = 4
MLP_RATIO = 4.0
MASK_RATIO = 0.75
NUM_PATCHES = (IMG // PATCH) ** 2

# The spec uses norm_layer=nn.LayerNorm (default eps=1e-5); keep that default.
LN_EPS = 1e-5
NORM_PIX_LOSS = False          # module default
MATMUL_DTYPE = jnp.bfloat16    # MXU operand dtype (f32 accumulation everywhere)


# ------------------------------ Pallas kernels -------------------------------
def _patch_embed_kernel(p_ref, w_ref, b_ref, pos_ref, o_ref):
    """patch_embed (Conv2d k=s=p expressed as matmul) + pos_embed add, one batch."""
    x = p_ref[0].astype(MATMUL_DTYPE)                                   # (L, p*p*C)
    y = jnp.dot(x, w_ref[...], preferred_element_type=jnp.float32)      # (L, E)
    o_ref[0] = (y + b_ref[...] + pos_ref[0].astype(jnp.float32)).astype(o_ref.dtype)


def _vit_block_kernel(x_ref, ln1g_ref, ln1b_ref, qkvw_ref, qkvb_ref,
                      projw_ref, projb_ref, ln2g_ref, ln2b_ref,
                      fc1w_ref, fc1b_ref, fc2w_ref, fc2b_ref,
                      o_ref, *, heads, eps):
    """Fully fused timm-style ViT Block for one batch element (VMEM-resident)."""
    S = x_ref.shape[1]
    D = x_ref.shape[2]
    dh = D // heads
    scale = dh ** -0.5

    x = x_ref[0].astype(jnp.float32)                                    # (S, D)

    # ---- LN1 (f32 stats) ----
    mu = jnp.mean(x, axis=-1, keepdims=True)
    var = jnp.mean((x - mu) ** 2, axis=-1, keepdims=True)
    h = (x - mu) * lax.rsqrt(var + eps) * ln1g_ref[...] + ln1b_ref[...]

    # ---- fused QKV projection (bf16 operands on MXU, f32 accumulate) ----
    qkv = jnp.dot(h.astype(MATMUL_DTYPE), qkvw_ref[...],
                  preferred_element_type=jnp.float32) + qkvb_ref[...]   # (S, 3D)
    q = qkv[:, 0:D] * scale
    k = qkv[:, D:2 * D]
    v = qkv[:, 2 * D:3 * D]

    # ---- per-head attention fused with the output projection:
    #      concat_h(softmax(q_h k_h^T) v_h) @ Wp == sum_h (softmax(..) v_h) @ Wp[h]
    # so the head-concat layout never needs to be re-assembled.
    attn_proj = jnp.zeros((S, D), jnp.float32)
    for hd in range(heads):
        c0 = hd * dh
        qh = q[:, c0:c0 + dh]
        kh = k[:, c0:c0 + dh]
        vh = v[:, c0:c0 + dh]
        s = jnp.dot(qh, kh.T, preferred_element_type=jnp.float32)       # (S, S)
        s = s - jnp.max(s, axis=-1, keepdims=True)
        p = jnp.exp(s)
        p = p * pl.reciprocal(jnp.sum(p, axis=-1, keepdims=True), approx=True)
        oh = jnp.dot(p, vh, preferred_element_type=jnp.float32)         # (S, dh)
        attn_proj = attn_proj + jnp.dot(
            oh.astype(MATMUL_DTYPE), projw_ref[c0:c0 + dh, :],
            preferred_element_type=jnp.float32)
    x = x + attn_proj + projb_ref[...]

    # ---- LN2 + MLP (exact erf-GELU), all in VMEM ----
    mu2 = jnp.mean(x, axis=-1, keepdims=True)
    var2 = jnp.mean((x - mu2) ** 2, axis=-1, keepdims=True)
    h2 = (x - mu2) * lax.rsqrt(var2 + eps) * ln2g_ref[...] + ln2b_ref[...]
    h2 = jnp.dot(h2.astype(MATMUL_DTYPE), fc1w_ref[...],
                 preferred_element_type=jnp.float32) + fc1b_ref[...]
    h2 = 0.5 * h2 * (1.0 + lax.erf(h2 * (1.0 / math.sqrt(2.0))))
    h2 = jnp.dot(h2.astype(MATMUL_DTYPE), fc2w_ref[...],
                 preferred_element_type=jnp.float32) + fc2b_ref[...]

    o_ref[0] = (x + h2).astype(o_ref.dtype)


def _norm_linear_kernel(x_ref, g_ref, b_ref, w_ref, wb_ref, o_ref, *, eps):
    """LayerNorm fused with a linear projection (encoder norm + decoder_embed)."""
    x = x_ref[0].astype(jnp.float32)
    mu = jnp.mean(x, axis=-1, keepdims=True)
    var = jnp.mean((x - mu) ** 2, axis=-1, keepdims=True)
    h = (x - mu) * lax.rsqrt(var + eps) * g_ref[...] + b_ref[...]
    y = jnp.dot(h.astype(MATMUL_DTYPE), w_ref[...],
                preferred_element_type=jnp.float32) + wb_ref[...]
    o_ref[0] = y.astype(o_ref.dtype)


def _decoder_head_kernel(x_ref, g_ref, b_ref, w_ref, wb_ref, t_ref, loss_ref,
                         *, eps, norm_pix):
    """decoder_norm + decoder_pred + per-patch MSE fused (cls already dropped)."""
    x = x_ref[0].astype(jnp.float32)                                    # (L, Dd)
    mu = jnp.mean(x, axis=-1, keepdims=True)
    var = jnp.mean((x - mu) ** 2, axis=-1, keepdims=True)
    h = (x - mu) * lax.rsqrt(var + eps) * g_ref[...] + b_ref[...]
    pred = jnp.dot(h.astype(MATMUL_DTYPE), w_ref[...],
                   preferred_element_type=jnp.float32) + wb_ref[...]    # (L, p*p*C)
    target = t_ref[0].astype(jnp.float32)
    if norm_pix:
        tmu = jnp.mean(target, axis=-1, keepdims=True)
        # torch.Tensor.var is unbiased by default
        tvar = jnp.sum((target - tmu) ** 2, axis=-1, keepdims=True) / (target.shape[-1] - 1)
        target = (target - tmu) * lax.rsqrt(tvar + 1e-6)
    d = pred - target
    loss_ref[0] = jnp.mean(d * d, axis=-1, keepdims=True).astype(loss_ref.dtype)


# ------------------------------ kernel wrappers ------------------------------
_PAR = pltpu.CompilerParams(dimension_semantics=("parallel",))


def patch_embed(patches, w, b, pos):
    N, L, P2 = patches.shape
    E = w.shape[1]
    return pl.pallas_call(
        _patch_embed_kernel,
        out_shape=jax.ShapeDtypeStruct((N, L, E), jnp.float32),
        grid=(N,),
        in_specs=[
            pl.BlockSpec((1, L, P2), lambda n: (n, 0, 0)),
            pl.BlockSpec((P2, E), lambda n: (0, 0)),
            pl.BlockSpec((1, E), lambda n: (0, 0)),
            pl.BlockSpec((1, L, E), lambda n: (0, 0, 0)),
        ],
        out_specs=pl.BlockSpec((1, L, E), lambda n: (n, 0, 0)),
        compiler_params=_PAR,
    )(patches, w, b, pos)


def vit_block(x, blk, heads):
    """One fused transformer block; grid over batch (parallel across TCs on v7x)."""
    N, S, D = x.shape
    hidden = blk["fc1_w"].shape[1]
    return pl.pallas_call(
        partial(_vit_block_kernel, heads=heads, eps=LN_EPS),
        out_shape=jax.ShapeDtypeStruct((N, S, D), x.dtype),
        grid=(N,),
        in_specs=[
            pl.BlockSpec((1, S, D), lambda n: (n, 0, 0)),       # x
            pl.BlockSpec((1, D), lambda n: (0, 0)),             # ln1_g
            pl.BlockSpec((1, D), lambda n: (0, 0)),             # ln1_b
            pl.BlockSpec((D, 3 * D), lambda n: (0, 0)),         # qkv_w
            pl.BlockSpec((1, 3 * D), lambda n: (0, 0)),         # qkv_b
            pl.BlockSpec((D, D), lambda n: (0, 0)),             # proj_w
            pl.BlockSpec((1, D), lambda n: (0, 0)),             # proj_b
            pl.BlockSpec((1, D), lambda n: (0, 0)),             # ln2_g
            pl.BlockSpec((1, D), lambda n: (0, 0)),             # ln2_b
            pl.BlockSpec((D, hidden), lambda n: (0, 0)),        # fc1_w
            pl.BlockSpec((1, hidden), lambda n: (0, 0)),        # fc1_b
            pl.BlockSpec((hidden, D), lambda n: (0, 0)),        # fc2_w
            pl.BlockSpec((1, D), lambda n: (0, 0)),             # fc2_b
        ],
        out_specs=pl.BlockSpec((1, S, D), lambda n: (n, 0, 0)),
        compiler_params=_PAR,
    )(x, blk["ln1_g"], blk["ln1_b"], blk["qkv_w"], blk["qkv_b"],
      blk["proj_w"], blk["proj_b"], blk["ln2_g"], blk["ln2_b"],
      blk["fc1_w"], blk["fc1_b"], blk["fc2_w"], blk["fc2_b"])


def norm_linear(x, g, b, w, wb):
    N, S, D = x.shape
    E = w.shape[1]
    return pl.pallas_call(
        partial(_norm_linear_kernel, eps=LN_EPS),
        out_shape=jax.ShapeDtypeStruct((N, S, E), jnp.float32),
        grid=(N,),
        in_specs=[
            pl.BlockSpec((1, S, D), lambda n: (n, 0, 0)),
            pl.BlockSpec((1, D), lambda n: (0, 0)),
            pl.BlockSpec((1, D), lambda n: (0, 0)),
            pl.BlockSpec((D, E), lambda n: (0, 0)),
            pl.BlockSpec((1, E), lambda n: (0, 0)),
        ],
        out_specs=pl.BlockSpec((1, S, E), lambda n: (n, 0, 0)),
        compiler_params=_PAR,
    )(x, g, b, w, wb)


def decoder_head(x_tok, g, b, w, wb, target):
    """decoder_norm + decoder_pred + per-patch MSE.  x_tok excludes the cls token
    (LayerNorm is per-token so LN(x)[1:] == LN(x[1:]))."""
    N, L, D = x_tok.shape
    P2 = w.shape[1]
    loss3 = pl.pallas_call(
        partial(_decoder_head_kernel, eps=LN_EPS, norm_pix=NORM_PIX_LOSS),
        out_shape=jax.ShapeDtypeStruct((N, L, 1), jnp.float32),
        grid=(N,),
        in_specs=[
            pl.BlockSpec((1, L, D), lambda n: (n, 0, 0)),
            pl.BlockSpec((1, D), lambda n: (0, 0)),
            pl.BlockSpec((1, D), lambda n: (0, 0)),
            pl.BlockSpec((D, P2), lambda n: (0, 0)),
            pl.BlockSpec((1, P2), lambda n: (0, 0)),
            pl.BlockSpec((1, L, P2), lambda n: (n, 0, 0)),
        ],
        out_specs=pl.BlockSpec((1, L, 1), lambda n: (n, 0, 0)),
        compiler_params=_PAR,
    )(x_tok, g, b, w, wb, target)
    return loss3[:, :, 0]


# ------------------------------ model pieces --------------------------------
def patchify(imgs, p):
    """imgs: (N, C, H, W) NCHW -> (N, L, p*p*C) (matches torch einsum nchpwq->nhwpqc)."""
    N, C, H, W = imgs.shape
    h, w = H // p, W // p
    x = imgs.reshape(N, C, h, p, w, p)
    x = jnp.einsum("nchpwq->nhwpqc", x)
    return x.reshape(N, h * w, p * p * C)


def get_1d_sincos_pos_embed_from_grid(embed_dim, pos):
    omega = np.arange(embed_dim // 2, dtype=np.float64)
    omega /= embed_dim / 2.0
    omega = 1.0 / 10000 ** omega
    pos = pos.reshape(-1)
    out = np.einsum("m,d->md", pos, omega)
    return np.concatenate([np.sin(out), np.cos(out)], axis=1)


def get_2d_sincos_pos_embed(embed_dim, grid_size, cls_token=False):
    grid_h = np.arange(grid_size, dtype=np.float32)
    grid_w = np.arange(grid_size, dtype=np.float32)
    grid = np.meshgrid(grid_w, grid_h)
    grid = np.stack(grid, axis=0).reshape([2, 1, grid_size, grid_size])
    emb_h = get_1d_sincos_pos_embed_from_grid(embed_dim // 2, grid[0])
    emb_w = get_1d_sincos_pos_embed_from_grid(embed_dim // 2, grid[1])
    pos = np.concatenate([emb_h, emb_w], axis=1)
    if cls_token:
        pos = np.concatenate([np.zeros([1, embed_dim]), pos], axis=0)
    return pos.astype(np.float32)


# ------------------------------ params init ---------------------------------
def _xavier(key, shape):
    fan_in, fan_out = shape
    limit = math.sqrt(6.0 / (fan_in + fan_out))
    return jax.random.uniform(key, shape, jnp.float32, -limit, limit)


def _block_params(key, dim, mlp_ratio):
    hidden = int(dim * mlp_ratio)
    ks = jax.random.split(key, 4)
    return {
        "ln1_g": jnp.ones((1, dim), jnp.float32),
        "ln1_b": jnp.zeros((1, dim), jnp.float32),
        "qkv_w": _xavier(ks[0], (dim, 3 * dim)).astype(MATMUL_DTYPE),
        "qkv_b": jnp.zeros((1, 3 * dim), jnp.float32),
        "proj_w": _xavier(ks[1], (dim, dim)).astype(MATMUL_DTYPE),
        "proj_b": jnp.zeros((1, dim), jnp.float32),
        "ln2_g": jnp.ones((1, dim), jnp.float32),
        "ln2_b": jnp.zeros((1, dim), jnp.float32),
        "fc1_w": _xavier(ks[2], (dim, hidden)).astype(MATMUL_DTYPE),
        "fc1_b": jnp.zeros((1, hidden), jnp.float32),
        "fc2_w": _xavier(ks[3], (hidden, dim)).astype(MATMUL_DTYPE),
        "fc2_b": jnp.zeros((1, dim), jnp.float32),
    }


def init_params(key):
    ks = jax.random.split(key, 5 + DEPTH + DEC_DEPTH)
    grid_size = int(NUM_PATCHES ** 0.5)
    p2 = PATCH * PATCH * IN_CH
    params = {
        # patch embed = Conv2d(kernel=stride=PATCH) expressed as patchify + matmul
        "patch_w": _xavier(ks[0], (p2, EMBED)).astype(MATMUL_DTYPE),
        "patch_b": jnp.zeros((1, EMBED), jnp.float32),
        "cls_token": 0.02 * jax.random.normal(ks[1], (1, 1, EMBED), jnp.float32),
        "pos_embed": jnp.asarray(
            get_2d_sincos_pos_embed(EMBED, grid_size, cls_token=True))[None],
        "norm_g": jnp.ones((1, EMBED), jnp.float32),
        "norm_b": jnp.zeros((1, EMBED), jnp.float32),
        "dec_embed_w": _xavier(ks[2], (EMBED, DEC_EMBED)).astype(MATMUL_DTYPE),
        "dec_embed_b": jnp.zeros((1, DEC_EMBED), jnp.float32),
        "mask_token": 0.02 * jax.random.normal(ks[3], (1, 1, DEC_EMBED), jnp.float32),
        "dec_pos_embed": jnp.asarray(
            get_2d_sincos_pos_embed(DEC_EMBED, grid_size, cls_token=True))[None],
        "dec_norm_g": jnp.ones((1, DEC_EMBED), jnp.float32),
        "dec_norm_b": jnp.zeros((1, DEC_EMBED), jnp.float32),
        "dec_pred_w": _xavier(ks[4], (DEC_EMBED, p2)).astype(MATMUL_DTYPE),
        "dec_pred_b": jnp.zeros((1, p2), jnp.float32),
    }
    params["enc_blocks"] = [
        _block_params(ks[5 + i], EMBED, MLP_RATIO) for i in range(DEPTH)
    ]
    params["dec_blocks"] = [
        _block_params(ks[5 + DEPTH + i], DEC_EMBED, MLP_RATIO)
        for i in range(DEC_DEPTH)
    ]
    return params


# ------------------------------ forward pass --------------------------------
def mae_forward(params, imgs, rng, mask_ratio):
    N = imgs.shape[0]
    # patchify is glue (pure layout); its result doubles as the loss target.
    target = patchify(imgs, PATCH)                                     # (N, L, p*p*C)

    # ---- encoder ----
    # patch projection + pos-embed add fused in one kernel
    x = patch_embed(target, params["patch_w"], params["patch_b"],
                    params["pos_embed"][:, 1:, :])                     # (N, L, E)

    # random_masking (mask_type != 1 path)
    # TODO(synk): random_masking_yiliao (mask_type==1) builds index lists with
    # data-dependent Python loops over tensor contents; only the standard
    # random-masking path is implemented.
    L = NUM_PATCHES
    len_keep = int(L * (1 - mask_ratio))
    noise = jax.random.uniform(rng, (N, L))
    ids_shuffle = jnp.argsort(noise, axis=1)
    ids_restore = jnp.argsort(ids_shuffle, axis=1)
    ids_keep = ids_shuffle[:, :len_keep]
    x_masked = jnp.take_along_axis(x, ids_keep[:, :, None], axis=1)
    mask = jnp.ones((N, L), jnp.float32).at[:, :len_keep].set(0.0)
    mask = jnp.take_along_axis(mask, ids_restore, axis=1)

    cls_tok = params["cls_token"] + params["pos_embed"][:, :1, :]
    x = jnp.concatenate([jnp.broadcast_to(cls_tok, (N, 1, EMBED)), x_masked], axis=1)
    for blk in params["enc_blocks"]:
        x = vit_block(x, blk, HEADS)

    # final encoder LayerNorm fused with decoder_embed
    xd = norm_linear(x, params["norm_g"], params["norm_b"],
                     params["dec_embed_w"], params["dec_embed_b"])     # (N, 1+keep, Dd)

    # ---- decoder ----
    mask_tokens = jnp.broadcast_to(
        params["mask_token"], (N, L + 1 - xd.shape[1], DEC_EMBED))
    x_ = jnp.concatenate([xd[:, 1:, :], mask_tokens], axis=1)
    x_ = jnp.take_along_axis(x_, ids_restore[:, :, None], axis=1)
    xd = jnp.concatenate([xd[:, :1, :], x_], axis=1)
    xd = xd + params["dec_pos_embed"]
    for blk in params["dec_blocks"]:
        xd = vit_block(xd, blk, DEC_HEADS)

    # decoder_norm + decoder_pred + per-patch MSE in one fused kernel
    # (the spec's forward_loss returns the per-patch (N, L) loss, no mask reduction;
    #  self.decoder_image is never used in forward())
    loss = decoder_head(xd[:, 1:, :], params["dec_norm_g"], params["dec_norm_b"],
                        params["dec_pred_w"], params["dec_pred_b"], target)   # (N, L)
    return loss, mask


# ---------------------------------- main -------------------------------------
if __name__ == "__main__":
    key = jax.random.PRNGKey(0)
    k_param, k_img, k_mask = jax.random.split(key, 3)
    params = init_params(k_param)

    imgs = jax.random.normal(k_img, (2, IN_CH, IMG, IMG), jnp.float32)  # NCHW

    fwd = jax.jit(lambda p, im, r: mae_forward(p, im, r, MASK_RATIO))
    loss, mask = fwd(params, imgs, k_mask)
    loss, mask = jax.block_until_ready((loss, mask))

    assert loss.shape == (2, NUM_PATCHES)
    assert mask.shape == (2, NUM_PATCHES)
    assert bool(jnp.all(jnp.isfinite(loss)))
    print("KERNEL_OK")
</pallas_src>

<mosaic_0001>
module attributes {stable_mosaic.version = 11 : i64} {
  func.func @_patch_embed_kernel(%arg0: i32, %arg1: memref<1x16x64xf32, #tpu.memory_space<vmem>>, %arg2: memref<64x32xbf16, #tpu.memory_space<vmem>>, %arg3: memref<1x32xf32, #tpu.memory_space<vmem>>, %arg4: memref<1x16x32xf32, #tpu.memory_space<vmem>>, %arg5: memref<1x16x32xf32, #tpu.memory_space<vmem>>) attributes {dimension_semantics = [#tpu.dimension_semantics<parallel>], iteration_bounds = array<i64: 2>, scalar_prefetch = 0 : i64, scratch_operands = 0 : i64, tpu.core_type = #tpu.core_type<tc>, window_params = [{transform_indices = @transform_0, window_bounds = array<i64: 1, 16, 64>}, {pipeline_mode = #tpu.pipeline_mode<synchronous>, transform_indices = @transform_1, window_bounds = array<i64: 64, 32>}, {pipeline_mode = #tpu.pipeline_mode<synchronous>, transform_indices = @transform_2, window_bounds = array<i64: 1, 32>}, {pipeline_mode = #tpu.pipeline_mode<synchronous>, transform_indices = @transform_3, window_bounds = array<i64: 1, 16, 32>}, {transform_indices = @transform_4, window_bounds = array<i64: 1, 16, 32>}]} {
    %c0 = arith.constant 0 : index
    %c0_0 = arith.constant 0 : index
    %c0_1 = arith.constant 0 : index
    %0 = vector.load %arg1[%c0, %c0_0, %c0_1] : memref<1x16x64xf32, #tpu.memory_space<vmem>>, vector<1x16x64xf32>
    %1 = vector.shape_cast %0 : vector<1x16x64xf32> to vector<16x64xf32>
    %2 = arith.truncf %1 : vector<16x64xf32> to vector<16x64xbf16>
    %c0_2 = arith.constant 0 : index
    %c0_3 = arith.constant 0 : index
    %3 = vector.load %arg2[%c0_2, %c0_3] : memref<64x32xbf16, #tpu.memory_space<vmem>>, vector<64x32xbf16>
    %cst = arith.constant dense<0.000000e+00> : vector<16x32xf32>
    %4 = tpu.matmul %2, %3, %cst {dimension_numbers = #tpu.dot_dimension_numbers<[1], [0], [0], [1], [0, 0, 1, 1], [], []>} : vector<16x64xbf16>, vector<64x32xbf16>, vector<16x32xf32> -> vector<16x32xf32>
    %c0_4 = arith.constant 0 : index
    %c0_5 = arith.constant 0 : index
    %5 = vector.load %arg3[%c0_4, %c0_5] : memref<1x32xf32, #tpu.memory_space<vmem>>, vector<1x32xf32>
    %6 = vector.broadcast %5 : vector<1x32xf32> to vector<16x32xf32>
    %7 = arith.addf %4, %6 : vector<16x32xf32>
    %c0_6 = arith.constant 0 : index
    %c0_7 = arith.constant 0 : index
    %c0_8 = arith.constant 0 : index
    %8 = vector.load %arg4[%c0_6, %c0_7, %c0_8] : memref<1x16x32xf32, #tpu.memory_space<vmem>>, vector<1x16x32xf32>
    %9 = vector.shape_cast %8 : vector<1x16x32xf32> to vector<16x32xf32>
    %10 = arith.addf %7, %9 : vector<16x32xf32>
    %c0_9 = arith.constant 0 : index
    %c0_10 = arith.constant 0 : index
    %c0_11 = arith.constant 0 : index
    %11 = vector.load %arg5[%c0_9, %c0_10, %c0_11] : memref<1x16x32xf32, #tpu.memory_space<vmem>>, vector<1x16x32xf32>
    %12 = vector.shape_cast %11 : vector<1x16x32xf32> to vector<16x32xf32>
    %13 = vector.shape_cast %10 : vector<16x32xf32> to vector<1x16x32xf32>
    tpu.vector_store %arg5[%c0_9, %c0_10, %c0_11], %13 {strides = array<i32>} : memref<1x16x32xf32, #tpu.memory_space<vmem>>, vector<1x16x32xf32>,
    return
  }
  func.func @transform_0(%arg0: i32) -> (i32, i32, i32) {
    %c0_i32 = arith.constant 0 : i32
    %c0_i32_0 = arith.constant 0 : i32
    %c0_i32_1 = arith.constant 0 : i32
    return %arg0, %c0_i32, %c0_i32_0 : i32, i32, i32
  }
  func.func @transform_1(%arg0: i32) -> (i32, i32) {
    %c0_i32 = arith.constant 0 : i32
    %c0_i32_0 = arith.constant 0 : i32
    %c0_i32_1 = arith.constant 0 : i32
    return %c0_i32, %c0_i32_0 : i32, i32
  }
  func.func @transform_2(%arg0: i32) -> (i32, i32) {
    %c0_i32 = arith.constant 0 : i32
    %c0_i32_0 = arith.constant 0 : i32
    %c0_i32_1 = arith.constant 0 : i32
    return %c0_i32, %c0_i32_0 : i32, i32
  }
  func.func @transform_3(%arg0: i32) -> (i32, i32, i32) {
    %c0_i32 = arith.constant 0 : i32
    %c0_i32_0 = arith.constant 0 : i32
    %c0_i32_1 = arith.constant 0 : i32
    %c0_i32_2 = arith.constant 0 : i32
    return %c0_i32, %c0_i32_0, %c0_i32_1 : i32, i32, i32
  }
  func.func @transform_4(%arg0: i32) -> (i32, i32, i32) {
    %c0_i32 = arith.constant 0 : i32
    %c0_i32_0 = arith.constant 0 : i32
    %c0_i32_1 = arith.constant 0 : i32
    return %arg0, %c0_i32, %c0_i32_0 : i32, i32, i32
  }
}

module attributes {stable_mosaic.version = 11 : i64} {
  func.func @_norm_linear_kernel(%arg0: i32, %arg1: memref<1x5x32xf32, #tpu.memory_space<vmem>>, %arg2: memref<1x32xf32, #tpu.memory_space<vmem>>, %arg3: memref<1x32xf32, #tpu.memory_space<vmem>>, %arg4: memref<32x32xbf16, #tpu.memory_space<vmem>>, %arg5: memref<1x32xf32, #tpu.memory_space<vmem>>, %arg6: memref<1x5x32xf32, #tpu.memory_space<vmem>>) attributes {dimension_semantics = [#tpu.dimension_semantics<parallel>], iteration_bounds = array<i64: 2>, scalar_prefetch = 0 : i64, scratch_operands = 0 : i64, tpu.core_type = #tpu.core_type<tc>, window_params = [{transform_indices = @transform_0, window_bounds = array<i64: 1, 5, 32>}, {pipeline_mode = #tpu.pipeline_mode<synchronous>, transform_indices = @transform_1, window_bounds = array<i64: 1, 32>}, {pipeline_mode = #tpu.pipeline_mode<synchronous>, transform_indices = @transform_2, window_bounds = array<i64: 1, 32>}, {pipeline_mode = #tpu.pipeline_mode<synchronous>, transform_indices = @transform_3, window_bounds = array<i64: 32, 32>}, {pipeline_mode = #tpu.pipeline_mode<synchronous>, transform_indices = @transform_4, window_bounds = array<i64: 1, 32>}, {transform_indices = @transform_5, window_bounds = array<i64: 1, 5, 32>}]} {
    %c0 = arith.constant 0 : index
    %c0_0 = arith.constant 0 : index
    %c0_1 = arith.constant 0 : index
    %0 = vector.load %arg1[%c0, %c0_0, %c0_1] : memref<1x5x32xf32, #tpu.memory_space<vmem>>, vector<1x5x32xf32>
    %1 = vector.shape_cast %0 : vector<1x5x32xf32> to vector<5x32xf32>
    %cst = arith.constant dense<0.000000e+00> : vector<5xf32>
    %2 = vector.multi_reduction <add>, %1, %cst [1] : vector<5x32xf32> to vector<5xf32>
    %3 = vector.shape_cast %2 : vector<5xf32> to vector<5x1xf32>
    %cst_2 = arith.constant 3.200000e+01 : f32
    %4 = vector.broadcast %cst_2 : f32 to vector<5x1xf32>
    %5 = arith.divf %3, %4 : vector<5x1xf32>
    %6 = vector.broadcast %5 : vector<5x1xf32> to vector<5x32xf32>
    %7 = arith.subf %1, %6 : vector<5x32xf32>
    %8 = arith.mulf %7, %7 : vector<5x32xf32>
    %cst_3 = arith.constant dense<0.000000e+00> : vector<5xf32>
    %9 = vector.multi_reduction <add>, %8, %cst_3 [1] : vector<5x32xf32> to vector<5xf32>
    %10 = vector.shape_cast %9 : vector<5xf32> to vector<5x1xf32>
    %cst_4 = arith.constant 3.200000e+01 : f32
    %11 = vector.broadcast %cst_4 : f32 to vector<5x1xf32>
    %12 = arith.divf %10, %11 : vector<5x1xf32>
    %13 = vector.broadcast %5 : vector<5x1xf32> to vector<5x32xf32>
    %14 = arith.subf %1, %13 : vector<5x32xf32>
    %cst_5 = arith.constant 9.99999974E-6 : f32
    %15 = vector.broadcast %cst_5 : f32 to vector<5x1xf32>
    %16 = arith.addf %12, %15 : vector<5x1xf32>
    %17 = math.rsqrt %16 : vector<5x1xf32>
    %18 = vector.broadcast %17 : vector<5x1xf32> to vector<5x32xf32>
    %19 = arith.mulf %14, %18 : vector<5x32xf32>
    %c0_6 = arith.constant 0 : index
    %c0_7 = arith.constant 0 : index
    %20 = vector.load %arg2[%c0_6, %c0_7] : memref<1x32xf32, #tpu.memory_space<vmem>>, vector<1x32xf32>
    %21 = vector.broadcast %20 : vector<1x32xf32> to vector<5x32xf32>
    %22 = arith.mulf %19, %21 : vector<5x32xf32>
    %c0_8 = arith.constant 0 : index
    %c0_9 = arith.constant 0 : index
    %23 = vector.load %arg3[%c0_8, %c0_9] : memref<1x32xf32, #tpu.memory_space<vmem>>, vector<1x32xf32>
    %24 = vector.broadcast %23 : vector<1x32xf32> to vector<5x32xf32>
    %25 = arith.addf %22, %24 : vector<5x32xf32>
    %26 = arith.truncf %25 : vector<5x32xf32> to vector<5x32xbf16>
    %c0_10 = arith.constant 0 : index
    %c0_11 = arith.constant 0 : index
    %27 = vector.load %arg4[%c0_10, %c0_11] : memref<32x32xbf16, #tpu.memory_space<vmem>>, vector<32x32xbf16>
    %cst_12 = arith.constant dense<0.000000e+00> : vector<5x32xf32>
    %28 = tpu.matmul %26, %27, %cst_12 {dimension_numbers = #tpu.dot_dimension_numbers<[1], [0], [0], [1], [0, 0, 1, 1], [], []>} : vector<5x32xbf16>, vector<32x32xbf16>, vector<5x32xf32> -> vector<5x32xf32>
    %c0_13 = arith.constant 0 : index
    %c0_14 = arith.constant 0 : index
    %29 = vector.load %arg5[%c0_13, %c0_14] : memref<1x32xf32, #tpu.memory_space<vmem>>, vector<1x32xf32>
    %30 = vector.broadcast %29 : vector<1x32xf32> to vector<5x32xf32>
    %31 = arith.addf %28, %30 : vector<5x32xf32>
    %c0_15 = arith.constant 0 : index
    %c0_16 = arith.constant 0 : index
    %c0_17 = arith.constant 0 : index
    %32 = vector.load %arg6[%c0_15, %c0_16, %c0_17] : memref<1x5x32xf32, #tpu.memory_space<vmem>>, vector<1x5x32xf32>
    %33 = vector.shape_cast %32 : vector<1x5x32xf32> to vector<5x32xf32>
    %34 = vector.shape_cast %31 : vector<5x32xf32> to vector<1x5x32xf32>
    tpu.vector_store %arg6[%c0_15, %c0_16, %c0_17], %34 {strides = array<i32>} : memref<1x5x32xf32, #tpu.memory_space<vmem>>, vector<1x5x32xf32>,
    return
  }
  func.func @transform_0(%arg0: i32) -> (i32, i32, i32) {
    %c0_i32 = arith.constant 0 : i32
    %c0_i32_0 = arith.constant 0 : i32
    %c0_i32_1 = arith.constant 0 : i32
    return %arg0, %c0_i32, %c0_i32_0 : i32, i32, i32
  }
  func.func @transform_1(%arg0: i32) -> (i32, i32) {
    %c0_i32 = arith.constant 0 : i32
    %c0_i32_0 = arith.constant 0 : i32
    %c0_i32_1 = arith.constant 0 : i32
    return %c0_i32, %c0_i32_0 : i32, i32
  }
  func.func @transform_2(%arg0: i32) -> (i32, i32) {
    %c0_i32 = arith.constant 0 : i32
    %c0_i32_0 = arith.constant 0 : i32
    %c0_i32_1 = arith.constant 0 : i32
    return %c0_i32, %c0_i32_0 : i32, i32
  }
  func.func @transform_3(%arg0: i32) -> (i32, i32) {
    %c0_i32 = arith.constant 0 : i32
    %c0_i32_0 = arith.constant 0 : i32
    %c0_i32_1 = arith.constant 0 : i32
    return %c0_i32, %c0_i32_0 : i32, i32
  }
  func.func @transform_4(%arg0: i32) -> (i32, i32) {
    %c0_i32 = arith.constant 0 : i32
    %c0_i32_0 = arith.constant 0 : i32
    %c0_i32_1 = arith.constant 0 : i32
    return %c0_i32, %c0_i32_0 : i32, i32
  }
  func.func @transform_5(%arg0: i32) -> (i32, i32, i32) {
    %c0_i32 = arith.constant 0 : i32
    %c0_i32_0 = arith.constant 0 : i32
    %c0_i32_1 = arith.constant 0 : i32
    return %arg0, %c0_i32, %c0_i32_0 : i32, i32, i32
  }
}

module attributes {stable_mosaic.version = 11 : i64} {
  func.func @_vit_block_kernel(%arg0: i32, %arg1: memref<1x5x32xf32, #tpu.memory_space<vmem>>, %arg2: memref<1x32xf32, #tpu.memory_space<vmem>>, %arg3: memref<1x32xf32, #tpu.memory_space<vmem>>, %arg4: memref<32x96xbf16, #tpu.memory_space<vmem>>, %arg5: memref<1x96xf32, #tpu.memory_space<vmem>>, %arg6: memref<32x32xbf16, #tpu.memory_space<vmem>>, %arg7: memref<1x32xf32, #tpu.memory_space<vmem>>, %arg8: memref<1x32xf32, #tpu.memory_space<vmem>>, %arg9: memref<1x32xf32, #tpu.memory_space<vmem>>, %arg10: memref<32x128xbf16, #tpu.memory_space<vmem>>, %arg11: memref<1x128xf32, #tpu.memory_space<vmem>>, %arg12: memref<128x32xbf16, #tpu.memory_space<vmem>>, %arg13: memref<1x32xf32, #tpu.memory_space<vmem>>, %arg14: memref<1x5x32xf32, #tpu.memory_space<vmem>>) attributes {dimension_semantics = [#tpu.dimension_semantics<parallel>], iteration_bounds = array<i64: 2>, scalar_prefetch = 0 : i64, scratch_operands = 0 : i64, tpu.core_type = #tpu.core_type<tc>, window_params = [{transform_indices = @transform_0, window_bounds = array<i64: 1, 5, 32>}, {pipeline_mode = #tpu.pipeline_mode<synchronous>, transform_indices = @transform_1, window_bounds = array<i64: 1, 32>}, {pipeline_mode = #tpu.pipeline_mode<synchronous>, transform_indices = @transform_2, window_bounds = array<i64: 1, 32>}, {pipeline_mode = #tpu.pipeline_mode<synchronous>, transform_indices = @transform_3, window_bounds = array<i64: 32, 96>}, {pipeline_mode = #tpu.pipeline_mode<synchronous>, transform_indices = @transform_4, window_bounds = array<i64: 1, 96>}, {pipeline_mode = #tpu.pipeline_mode<synchronous>, transform_indices = @transform_5, window_bounds = array<i64: 32, 32>}, {pipeline_mode = #tpu.pipeline_mode<synchronous>, transform_indices = @transform_6, window_bounds = array<i64: 1, 32>}, {pipeline_mode = #tpu.pipeline_mode<synchronous>, transform_indices = @transform_7, window_bounds = array<i64: 1, 32>}, {pipeline_mode = #tpu.pipeline_mode<synchronous>, transform_indices = @transform_8, window_bounds = array<i64: 1, 32>}, {pipeline_mode = #tpu.pipeline_mode<synchronous>, transform_indices = @transform_9, window_bounds = array<i64: 32, 128>}, {pipeline_mode = #tpu.pipeline_mode<synchronous>, transform_indices = @transform_10, window_bounds = array<i64: 1, 128>}, {pipeline_mode = #tpu.pipeline_mode<synchronous>, transform_indices = @transform_11, window_bounds = array<i64: 128, 32>}, {pipeline_mode = #tpu.pipeline_mode<synchronous>, transform_indices = @transform_12, window_bounds = array<i64: 1, 32>}, {transform_indices = @transform_13, window_bounds = array<i64: 1, 5, 32>}]} {
    %c0 = arith.constant 0 : index
    %c0_0 = arith.constant 0 : index
    %c0_1 = arith.constant 0 : index
    %0 = vector.load %arg1[%c0, %c0_0, %c0_1] : memref<1x5x32xf32, #tpu.memory_space<vmem>>, vector<1x5x32xf32>
    %1 = vector.shape_cast %0 : vector<1x5x32xf32> to vector<5x32xf32>
    %cst = arith.constant dense<0.000000e+00> : vector<5xf32>
    %2 = vector.multi_reduction <add>, %1, %cst [1] : vector<5x32xf32> to vector<5xf32>
    %3 = vector.shape_cast %2 : vector<5xf32> to vector<5x1xf32>
    %cst_2 = arith.constant 3.200000e+01 : f32
    %4 = vector.broadcast %cst_2 : f32 to vector<5x1xf32>
    %5 = arith.divf %3, %4 : vector<5x1xf32>
    %6 = vector.broadcast %5 : vector<5x1xf32> to vector<5x32xf32>
    %7 = arith.subf %1, %6 : vector<5x32xf32>
    %8 = arith.mulf %7, %7 : vector<5x32xf32>
    %cst_3 = arith.constant dense<0.000000e+00> : vector<5xf32>
    %9 = vector.multi_reduction <add>, %8, %cst_3 [1] : vector<5x32xf32> to vector<5xf32>
    %10 = vector.shape_cast %9 : vector<5xf32> to vector<5x1xf32>
    %cst_4 = arith.constant 3.200000e+01 : f32
    %11 = vector.broadcast %cst_4 : f32 to vector<5x1xf32>
    %12 = arith.divf %10, %11 : vector<5x1xf32>
    %13 = vector.broadcast %5 : vector<5x1xf32> to vector<5x32xf32>
    %14 = arith.subf %1, %13 : vector<5x32xf32>
    %cst_5 = arith.constant 9.99999974E-6 : f32
    %15 = vector.broadcast %cst_5 : f32 to vector<5x1xf32>
    %16 = arith.addf %12, %15 : vector<5x1xf32>
    %17 = math.rsqrt %16 : vector<5x1xf32>
    %18 = vector.broadcast %17 : vector<5x1xf32> to vector<5x32xf32>
    %19 = arith.mulf %14, %18 : vector<5x32xf32>
    %c0_6 = arith.constant 0 : index
    %c0_7 = arith.constant 0 : index
    %20 = vector.load %arg2[%c0_6, %c0_7] : memref<1x32xf32, #tpu.memory_space<vmem>>, vector<1x32xf32>
    %21 = vector.broadcast %20 : vector<1x32xf32> to vector<5x32xf32>
    %22 = arith.mulf %19, %21 : vector<5x32xf32>
    %c0_8 = arith.constant 0 : index
    %c0_9 = arith.constant 0 : index
    %23 = vector.load %arg3[%c0_8, %c0_9] : memref<1x32xf32, #tpu.memory_space<vmem>>, vector<1x32xf32>
    %24 = vector.broadcast %23 : vector<1x32xf32> to vector<5x32xf32>
    %25 = arith.addf %22, %24 : vector<5x32xf32>
    %26 = arith.truncf %25 : vector<5x32xf32> to vector<5x32xbf16>
    %c0_10 = arith.constant 0 : index
    %c0_11 = arith.constant 0 : index
    %27 = vector.load %arg4[%c0_10, %c0_11] : memref<32x96xbf16, #tpu.memory_space<vmem>>, vector<32x96xbf16>
    %cst_12 = arith.constant dense<0.000000e+00> : vector<5x96xf32>
    %28 = tpu.matmul %26, %27, %cst_12 {dimension_numbers = #tpu.dot_dimension_numbers<[1], [0], [0], [1], [0, 0, 1, 1], [], []>} : vector<5x32xbf16>, vector<32x96xbf16>, vector<5x96xf32> -> vector<5x96xf32>
    %c0_13 = arith.constant 0 : index
    %c0_14 = arith.constant 0 : index
    %29 = vector.load %arg5[%c0_13, %c0_14] : memref<1x96xf32, #tpu.memory_space<vmem>>, vector<1x96xf32>
    %30 = vector.broadcast %29 : vector<1x96xf32> to vector<5x96xf32>
    %31 = arith.addf %28, %30 : vector<5x96xf32>
    %32 = vector.extract_strided_slice %31 {offsets = [0, 0], sizes = [5, 32], strides = [1, 1]} : vector<5x96xf32> to vector<5x32xf32>
    %cst_15 = arith.constant 0.353553385 : f32
    %33 = vector.broadcast %cst_15 : f32 to vector<5x32xf32>
    %34 = arith.mulf %32, %33 : vector<5x32xf32>
    %35 = vector.extract_strided_slice %31 {offsets = [0, 32], sizes = [5, 32], strides = [1, 1]} : vector<5x96xf32> to vector<5x32xf32>
    %36 = vector.extract_strided_slice %31 {offsets = [0, 64], sizes = [5, 32], strides = [1, 1]} : vector<5x96xf32> to vector<5x32xf32>
    %cst_16 = arith.constant 0.000000e+00 : f32
    %37 = vector.broadcast %cst_16 : f32 to vector<5x32xf32>
    %38 = vector.extract_strided_slice %34 {offsets = [0, 0], sizes = [5, 8], strides = [1, 1]} : vector<5x32xf32> to vector<5x8xf32>
    %39 = vector.extract_strided_slice %35 {offsets = [0, 0], sizes = [5, 8], strides = [1, 1]} : vector<5x32xf32> to vector<5x8xf32>
    %40 = vector.extract_strided_slice %36 {offsets = [0, 0], sizes = [5, 8], strides = [1, 1]} : vector<5x32xf32> to vector<5x8xf32>
    %41 = tpu.transpose %39, [1, 0] : vector<5x8xf32> -> vector<8x5xf32>
    %cst_17 = arith.constant dense<0.000000e+00> : vector<5x5xf32>
    %42 = tpu.matmul %38, %41, %cst_17 {dimension_numbers = #tpu.dot_dimension_numbers<[1], [0], [0], [1], [0, 0, 1, 1], [], []>} : vector<5x8xf32>, vector<8x5xf32>, vector<5x5xf32> -> vector<5x5xf32>
    %cst_18 = arith.constant dense<0xFF800000> : vector<5xf32>
    %43 = vector.multi_reduction <maximumf>, %42, %cst_18 [1] : vector<5x5xf32> to vector<5xf32>
    %44 = vector.shape_cast %43 : vector<5xf32> to vector<5x1xf32>
    %45 = vector.broadcast %44 : vector<5x1xf32> to vector<5x5xf32>
    %46 = arith.subf %42, %45 : vector<5x5xf32>
    %47 = math.exp %46 : vector<5x5xf32>
    %cst_19 = arith.constant dense<0.000000e+00> : vector<5xf32>
    %48 = vector.multi_reduction <add>, %47, %cst_19 [1] : vector<5x5xf32> to vector<5xf32>
    %49 = vector.shape_cast %48 : vector<5xf32> to vector<5x1xf32>
    %50 = tpu.reciprocal %49 {approx = true} : vector<5x1xf32> -> vector<5x1xf32>
    %51 = vector.broadcast %50 : vector<5x1xf32> to vector<5x5xf32>
    %52 = arith.mulf %47, %51 : vector<5x5xf32>
    %cst_20 = arith.constant dense<0.000000e+00> : vector<5x8xf32>
    %53 = tpu.matmul %52, %40, %cst_20 {dimension_numbers = #tpu.dot_dimension_numbers<[1], [0], [0], [1], [0, 0, 1, 1], [], []>} : vector<5x5xf32>, vector<5x8xf32>, vector<5x8xf32> -> vector<5x8xf32>
    %54 = arith.truncf %53 : vector<5x8xf32> to vector<5x8xbf16>
    %c0_21 = arith.constant 0 : index
    %c0_22 = arith.constant 0 : index
    %55 = vector.load %arg6[%c0_21, %c0_22] : memref<32x32xbf16, #tpu.memory_space<vmem>>, vector<8x32xbf16>
    %cst_23 = arith.constant dense<0.000000e+00> : vector<5x32xf32>
    %56 = tpu.matmul %54, %55, %cst_23 {dimension_numbers = #tpu.dot_dimension_numbers<[1], [0], [0], [1], [0, 0, 1, 1], [], []>} : vector<5x8xbf16>, vector<8x32xbf16>, vector<5x32xf32> -> vector<5x32xf32>
    %57 = arith.addf %37, %56 : vector<5x32xf32>
    %58 = vector.extract_strided_slice %34 {offsets = [0, 8], sizes = [5, 8], strides = [1, 1]} : vector<5x32xf32> to vector<5x8xf32>
    %59 = vector.extract_strided_slice %35 {offsets = [0, 8], sizes = [5, 8], strides = [1, 1]} : vector<5x32xf32> to vector<5x8xf32>
    %60 = vector.extract_strided_slice %36 {offsets = [0, 8], sizes = [5, 8], strides = [1, 1]} : vector<5x32xf32> to vector<5x8xf32>
    %61 = tpu.transpose %59, [1, 0] : vector<5x8xf32> -> vector<8x5xf32>
    %cst_24 = arith.constant dense<0.000000e+00> : vector<5x5xf32>
    %62 = tpu.matmul %58, %61, %cst_24 {dimension_numbers = #tpu.dot_dimension_numbers<[1], [0], [0], [1], [0, 0, 1, 1], [], []>} : vector<5x8xf32>, vector<8x5xf32>, vector<5x5xf32> -> vector<5x5xf32>
    %cst_25 = arith.constant dense<0xFF800000> : vector<5xf32>
    %63 = vector.multi_reduction <maximumf>, %62, %cst_25 [1] : vector<5x5xf32> to vector<5xf32>
    %64 = vector.shape_cast %63 : vector<5xf32> to vector<5x1xf32>
    %65 = vector.broadcast %64 : vector<5x1xf32> to vector<5x5xf32>
    %66 = arith.subf %62, %65 : vector<5x5xf32>
    %67 = math.exp %66 : vector<5x5xf32>
    %cst_26 = arith.constant dense<0.000000e+00> : vector<5xf32>
    %68 = vector.multi_reduction <add>, %67, %cst_26 [1] : vector<5x5xf32> to vector<5xf32>
    %69 = vector.shape_cast %68 : vector<5xf32> to vector<5x1xf32>
    %70 = tpu.reciprocal %69 {approx = true} : vector<5x1xf32> -> vector<5x1xf32>
    %71 = vector.broadcast %70 : vector<5x1xf32> to vector<5x5xf32>
    %72 = arith.mulf %67, %71 : vector<5x5xf32>
    %cst_27 = arith.constant dense<0.000000e+00> : vector<5x8xf32>
    %73 = tpu.matmul %72, %60, %cst_27 {dimension_numbers = #tpu.dot_dimension_numbers<[1], [0], [0], [1], [0, 0, 1, 1], [], []>} : vector<5x5xf32>, vector<5x8xf32>, vector<5x8xf32> -> vector<5x8xf32>
    %74 = arith.truncf %73 : vector<5x8xf32> to vector<5x8xbf16>
    %c8 = arith.constant 8 : index
    %c0_28 = arith.constant 0 : index
    %75 = vector.load %arg6[%c8, %c0_28] : memref<32x32xbf16, #tpu.memory_space<vmem>>, vector<8x32xbf16>
    %cst_29 = arith.constant dense<0.000000e+00> : vector<5x32xf32>
    %76 = tpu.matmul %74, %75, %cst_29 {dimension_numbers = #tpu.dot_dimension_numbers<[1], [0], [0], [1], [0, 0, 1, 1], [], []>} : vector<5x8xbf16>, vector<8x32xbf16>, vector<5x32xf32> -> vector<5x32xf32>
    %77 = arith.addf %57, %76 : vector<5x32xf32>
    %78 = vector.extract_strided_slice %34 {offsets = [0, 16], sizes = [5, 8], strides = [1, 1]} : vector<5x32xf32> to vector<5x8xf32>
    %79 = vector.extract_strided_slice %35 {offsets = [0, 16], sizes = [5, 8], strides = [1, 1]} : vector<5x32xf32> to vector<5x8xf32>
    %80 = vector.extract_strided_slice %36 {offsets = [0, 16], sizes = [5, 8], strides = [1, 1]} : vector<5x32xf32> to vector<5x8xf32>
    %81 = tpu.transpose %79, [1, 0] : vector<5x8xf32> -> vector<8x5xf32>
    %cst_30 = arith.constant dense<0.000000e+00> : vector<5x5xf32>
    %82 = tpu.matmul %78, %81, %cst_30 {dimension_numbers = #tpu.dot_dimension_numbers<[1], [0], [0], [1], [0, 0, 1, 1], [], []>} : vector<5x8xf32>, vector<8x5xf32>, vector<5x5xf32> -> vector<5x5xf32>
    %cst_31 = arith.constant dense<0xFF800000> : vector<5xf32>
    %83 = vector.multi_reduction <maximumf>, %82, %cst_31 [1] : vector<5x5xf32> to vector<5xf32>
    %84 = vector.shape_cast %83 : vector<5xf32> to vector<5x1xf32>
    %85 = vector.broadcast %84 : vector<5x1xf32> to vector<5x5xf32>
    %86 = arith.subf %82, %85 : vector<5x5xf32>
    %87 = math.exp %86 : vector<5x5xf32>
    %cst_32 = arith.constant dense<0.000000e+00> : vector<5xf32>
    %88 = vector.multi_reduction <add>, %87, %cst_32 [1] : vector<5x5xf32> to vector<5xf32>
    %89 = vector.shape_cast %88 : vector<5xf32> to vector<5x1xf32>
    %90 = tpu.reciprocal %89 {approx = true} : vector<5x1xf32> -> vector<5x1xf32>
    %91 = vector.broadcast %90 : vector<5x1xf32> to vector<5x5xf32>
    %92 = arith.mulf %87, %91 : vector<5x5xf32>
    %cst_33 = arith.constant dense<0.000000e+00> : vector<5x8xf32>
    %93 = tpu.matmul %92, %80, %cst_33 {dimension_numbers = #tpu.dot_dimension_numbers<[1], [0], [0], [1], [0, 0, 1, 1], [], []>} : vector<5x5xf32>, vector<5x8xf32>, vector<5x8xf32> -> vector<5x8xf32>
    %94 = arith.truncf %93 : vector<5x8xf32> to vector<5x8xbf16>
    %c16 = arith.constant 16 : index
    %c0_34 = arith.constant 0 : index
    %95 = vector.load %arg6[%c16, %c0_34] : memref<32x32xbf16, #tpu.memory_space<vmem>>, vector<8x32xbf16>
    %cst_35 = arith.constant dense<0.000000e+00> : vector<5x32xf32>
    %96 = tpu.matmul %94, %95, %cst_35 {dimension_numbers = #tpu.dot_dimension_numbers<[1], [0], [0], [1], [0, 0, 1, 1], [], []>} : vector<5x8xbf16>, vector<8x32xbf16>, vector<5x32xf32> -> vector<5x32xf32>
    %97 = arith.addf %77, %96 : vector<5x32xf32>
    %98 = vector.extract_strided_slice %34 {offsets = [0, 24], sizes = [5, 8], strides = [1, 1]} : vector<5x32xf32> to vector<5x8xf32>
    %99 = vector.extract_strided_slice %35 {offsets = [0, 24], sizes = [5, 8], strides = [1, 1]} : vector<5x32xf32> to vector<5x8xf32>
    %100 = vector.extract_strided_slice %36 {offsets = [0, 24], sizes = [5, 8], strides = [1, 1]} : vector<5x32xf32> to vector<5x8xf32>
    %101 = tpu.transpose %99, [1, 0] : vector<5x8xf32> -> vector<8x5xf32>
    %cst_36 = arith.constant dense<0.000000e+00> : vector<5x5xf32>
    %102 = tpu.matmul %98, %101, %cst_36 {dimension_numbers = #tpu.dot_dimension_numbers<[1], [0], [0], [1], [0, 0, 1, 1], [], []>} : vector<5x8xf32>, vector<8x5xf32>, vector<5x5xf32> -> vector<5x5xf32>
    %cst_37 = arith.constant dense<0xFF800000> : vector<5xf32>
    %103 = vector.multi_reduction <maximumf>, %102, %cst_37 [1] : vector<5x5xf32> to vector<5xf32>
    %104 = vector.shape_cast %103 : vector<5xf32> to vector<5x1xf32>
    %105 = vector.broadcast %104 : vector<5x1xf32> to vector<5x5xf32>
    %106 = arith.subf %102, %105 : vector<5x5xf32>
    %107 = math.exp %106 : vector<5x5xf32>
    %cst_38 = arith.constant dense<0.000000e+00> : vector<5xf32>
    %108 = vector.multi_reduction <add>, %107, %cst_38 [1] : vector<5x5xf32> to vector<5xf32>
    %109 = vector.shape_cast %108 : vector<5xf32> to vector<5x1xf32>
    %110 = tpu.reciprocal %109 {approx = true} : vector<5x1xf32> -> vector<5x1xf32>
    %111 = vector.broadcast %110 : vector<5x1xf32> to vector<5x5xf32>
    %112 = arith.mulf %107, %111 : vector<5x5xf32>
    %cst_39 = arith.constant dense<0.000000e+00> : vector<5x8xf32>
    %113 = tpu.matmul %112, %100, %cst_39 {dimension_numbers = #tpu.dot_dimension_numbers<[1], [0], [0], [1], [0, 0, 1, 1], [], []>} : vector<5x5xf32>, vector<5x8xf32>, vector<5x8xf32> -> vector<5x8xf32>
    %114 = arith.truncf %113 : vector<5x8xf32> to vector<5x8xbf16>
    %c24 = arith.constant 24 : index
    %c0_40 = arith.constant 0 : index
    %115 = vector.load %arg6[%c24, %c0_40] : memref<32x32xbf16, #tpu.memory_space<vmem>>, vector<8x32xbf16>
    %cst_41 = arith.constant dense<0.000000e+00> : vector<5x32xf32>
    %116 = tpu.matmul %114, %115, %cst_41 {dimension_numbers = #tpu.dot_dimension_numbers<[1], [0], [0], [1], [0, 0, 1, 1], [], []>} : vector<5x8xbf16>, vector<8x32xbf16>, vector<5x32xf32> -> vector<5x32xf32>
    %117 = arith.addf %97, %116 : vector<5x32xf32>
    %118 = arith.addf %1, %117 : vector<5x32xf32>
    %c0_42 = arith.constant 0 : index
    %c0_43 = arith.constant 0 : index
    %119 = vector.load %arg7[%c0_42, %c0_43] : memref<1x32xf32, #tpu.memory_space<vmem>>, vector<1x32xf32>
    %120 = vector.broadcast %119 : vector<1x32xf32> to vector<5x32xf32>
    %121 = arith.addf %118, %120 : vector<5x32xf32>
    %cst_44 = arith.constant dense<0.000000e+00> : vector<5xf32>
    %122 = vector.multi_reduction <add>, %121, %cst_44 [1] : vector<5x32xf32> to vector<5xf32>
    %123 = vector.shape_cast %122 : vector<5xf32> to vector<5x1xf32>
    %cst_45 = arith.constant 3.200000e+01 : f32
    %124 = vector.broadcast %cst_45 : f32 to vector<5x1xf32>
    %125 = arith.divf %123, %124 : vector<5x1xf32>
    %126 = vector.broadcast %125 : vector<5x1xf32> to vector<5x32xf32>
    %127 = arith.subf %121, %126 : vector<5x32xf32>
    %128 = arith.mulf %127, %127 : vector<5x32xf32>
    %cst_46 = arith.constant dense<0.000000e+00> : vector<5xf32>
    %129 = vector.multi_reduction <add>, %128, %cst_46 [1] : vector<5x32xf32> to vector<5xf32>
    %130 = vector.shape_cast %129 : vector<5xf32> to vector<5x1xf32>
    %cst_47 = arith.constant 3.200000e+01 : f32
    %131 = vector.broadcast %cst_47 : f32 to vector<5x1xf32>
    %132 = arith.divf %130, %131 : vector<5x1xf32>
    %133 = vector.broadcast %125 : vector<5x1xf32> to vector<5x32xf32>
    %134 = arith.subf %121, %133 : vector<5x32xf32>
    %cst_48 = arith.constant 9.99999974E-6 : f32
    %135 = vector.broadcast %cst_48 : f32 to vector<5x1xf32>
    %136 = arith.addf %132, %135 : vector<5x1xf32>
    %137 = math.rsqrt %136 : vector<5x1xf32>
    %138 = vector.broadcast %137 : vector<5x1xf32> to vector<5x32xf32>
    %139 = arith.mulf %134, %138 : vector<5x32xf32>
    %c0_49 = arith.constant 0 : index
    %c0_50 = arith.constant 0 : index
    %140 = vector.load %arg8[%c0_49, %c0_50] : memref<1x32xf32, #tpu.memory_space<vmem>>, vector<1x32xf32>
    %141 = vector.broadcast %140 : vector<1x32xf32> to vector<5x32xf32>
    %142 = arith.mulf %139, %141 : vector<5x32xf32>
    %c0_51 = arith.constant 0 : index
    %c0_52 = arith.constant 0 : index
    %143 = vector.load %arg9[%c0_51, %c0_52] : memref<1x32xf32, #tpu.memory_space<vmem>>, vector<1x32xf32>
    %144 = vector.broadcast %143 : vector<1x32xf32> to vector<5x32xf32>
    %145 = arith.addf %142, %144 : vector<5x32xf32>
    %146 = arith.truncf %145 : vector<5x32xf32> to vector<5x32xbf16>
    %c0_53 = arith.constant 0 : index
    %c0_54 = arith.constant 0 : index
    %147 = vector.load %arg10[%c0_53, %c0_54] : memref<32x128xbf16, #tpu.memory_space<vmem>>, vector<32x128xbf16>
    %cst_55 = arith.constant dense<0.000000e+00> : vector<5x128xf32>
    %148 = tpu.matmul %146, %147, %cst_55 {dimension_numbers = #tpu.dot_dimension_numbers<[1], [0], [0], [1], [0, 0, 1, 1], [], []>} : vector<5x32xbf16>, vector<32x128xbf16>, vector<5x128xf32> -> vector<5x128xf32>
    %c0_56 = arith.constant 0 : index
    %c0_57 = arith.constant 0 : index
    %149 = vector.load %arg11[%c0_56, %c0_57] : memref<1x128xf32, #tpu.memory_space<vmem>>, vector<1x128xf32>
    %150 = vector.broadcast %149 : vector<1x128xf32> to vector<5x128xf32>
    %151 = arith.addf %148, %150 : vector<5x128xf32>
    %cst_58 = arith.constant 5.000000e-01 : f32
    %152 = vector.broadcast %cst_58 : f32 to vector<5x128xf32>
    %153 = arith.mulf %152, %151 : vector<5x128xf32>
    %cst_59 = arith.constant 0.707106769 : f32
    %154 = vector.broadcast %cst_59 : f32 to vector<5x128xf32>
    %155 = arith.mulf %151, %154 : vector<5x128xf32>
    %156 = math.erf %155 : vector<5x128xf32>
    %cst_60 = arith.constant 1.000000e+00 : f32
    %157 = vector.broadcast %cst_60 : f32 to vector<5x128xf32>
    %158 = arith.addf %157, %156 : vector<5x128xf32>
    %159 = arith.mulf %153, %158 : vector<5x128xf32>
    %160 = arith.truncf %159 : vector<5x128xf32> to vector<5x128xbf16>
    %c0_61 = arith.constant 0 : index
    %c0_62 = arith.constant 0 : index
    %161 = vector.load %arg12[%c0_61, %c0_62] : memref<128x32xbf16, #tpu.memory_space<vmem>>, vector<128x32xbf16>
    %cst_63 = arith.constant dense<0.000000e+00> : vector<5x32xf32>
    %162 = tpu.matmul %160, %161, %cst_63 {dimension_numbers = #tpu.dot_dimension_numbers<[1], [0], [0], [1], [0, 0, 1, 1], [], []>} : vector<5x128xbf16>, vector<128x32xbf16>, vector<5x32xf32> -> vector<5x32xf32>
    %c0_64 = arith.constant 0 : index
    %c0_65 = arith.constant 0 : index
    %163 = vector.load %arg13[%c0_64, %c0_65] : memref<1x32xf32, #tpu.memory_space<vmem>>, vector<1x32xf32>
    %164 = vector.broadcast %163 : vector<1x32xf32> to vector<5x32xf32>
    %165 = arith.addf %162, %164 : vector<5x32xf32>
    %166 = arith.addf %121, %165 : vector<5x32xf32>
    %c0_66 = arith.constant 0 : index
    %c0_67 = arith.constant 0 : index
    %c0_68 = arith.constant 0 : index
    %167 = vector.load %arg14[%c0_66, %c0_67, %c0_68] : memref<1x5x32xf32, #tpu.memory_space<vmem>>, vector<1x5x32xf32>
    %168 = vector.shape_cast %167 : vector<1x5x32xf32> to vector<5x32xf32>
    %169 = vector.shape_cast %166 : vector<5x32xf32> to vector<1x5x32xf32>
    tpu.vector_store %arg14[%c0_66, %c0_67, %c0_68], %169 {strides = array<i32>} : memref<1x5x32xf32, #tpu.memory_space<vmem>>, vector<1x5x32xf32>,
    return
  }
  func.func @transform_0(%arg0: i32) -> (i32, i32, i32) {
    %c0_i32 = arith.constant 0 : i32
    %c0_i32_0 = arith.constant 0 : i32
    %c0_i32_1 = arith.constant 0 : i32
    return %arg0, %c0_i32, %c0_i32_0 : i32, i32, i32
  }
  func.func @transform_1(%arg0: i32) -> (i32, i32) {
    %c0_i32 = arith.constant 0 : i32
    %c0_i32_0 = arith.constant 0 : i32
    %c0_i32_1 = arith.constant 0 : i32
    return %c0_i32, %c0_i32_0 : i32, i32
  }
  func.func @transform_2(%arg0: i32) -> (i32, i32) {
    %c0_i32 = arith.constant 0 : i32
    %c0_i32_0 = arith.constant 0 : i32
    %c0_i32_1 = arith.constant 0 : i32
    return %c0_i32, %c0_i32_0 : i32, i32
  }
  func.func @transform_3(%arg0: i32) -> (i32, i32) {
    %c0_i32 = arith.constant 0 : i32
    %c0_i32_0 = arith.constant 0 : i32
    %c0_i32_1 = arith.constant 0 : i32
    return %c0_i32, %c0_i32_0 : i32, i32
  }
  func.func @transform_4(%arg0: i32) -> (i32, i32) {
    %c0_i32 = arith.constant 0 : i32
    %c0_i32_0 = arith.constant 0 : i32
    %c0_i32_1 = arith.constant 0 : i32
    return %c0_i32, %c0_i32_0 : i32, i32
  }
  func.func @transform_5(%arg0: i32) -> (i32, i32) {
    %c0_i32 = arith.constant 0 : i32
    %c0_i32_0 = arith.constant 0 : i32
    %c0_i32_1 = arith.constant 0 : i32
    return %c0_i32, %c0_i32_0 : i32, i32
  }
  func.func @transform_6(%arg0: i32) -> (i32, i32) {
    %c0_i32 = arith.constant 0 : i32
    %c0_i32_0 = arith.constant 0 : i32
    %c0_i32_1 = arith.constant 0 : i32
    return %c0_i32, %c0_i32_0 : i32, i32
  }
  func.func @transform_7(%arg0: i32) -> (i32, i32) {
    %c0_i32 = arith.constant 0 : i32
    %c0_i32_0 = arith.constant 0 : i32
    %c0_i32_1 = arith.constant 0 : i32
    return %c0_i32, %c0_i32_0 : i32, i32
  }
  func.func @transform_8(%arg0: i32) -> (i32, i32) {
    %c0_i32 = arith.constant 0 : i32
    %c0_i32_0 = arith.constant 0 : i32
    %c0_i32_1 = arith.constant 0 : i32
    return %c0_i32, %c0_i32_0 : i32, i32
  }
  func.func @transform_9(%arg0: i32) -> (i32, i32) {
    %c0_i32 = arith.constant 0 : i32
    %c0_i32_0 = arith.constant 0 : i32
    %c0_i32_1 = arith.constant 0 : i32
    return %c0_i32, %c0_i32_0 : i32, i32
  }
  func.func @transform_10(%arg0: i32) -> (i32, i32) {
    %c0_i32 = arith.constant 0 : i32
    %c0_i32_0 = arith.constant 0 : i32
    %c0_i32_1 = arith.constant 0 : i32
    return %c0_i32, %c0_i32_0 : i32, i32
  }
  func.func @transform_11(%arg0: i32) -> (i32, i32) {
    %c0_i32 = arith.constant 0 : i32
    %c0_i32_0 = arith.constant 0 : i32
    %c0_i32_1 = arith.constant 0 : i32
    return %c0_i32, %c0_i32_0 : i32, i32
  }
  func.func @transform_12(%arg0: i32) -> (i32, i32) {
    %c0_i32 = arith.constant 0 : i32
    %c0_i32_0 = arith.constant 0 : i32
    %c0_i32_1 = arith.constant 0 : i32
    return %c0_i32, %c0_i32_0 : i32, i32
  }
  func.func @transform_13(%arg0: i32) -> (i32, i32, i32) {
    %c0_i32 = arith.constant 0 : i32
    %c0_i32_0 = arith.constant 0 : i32
    %c0_i32_1 = arith.constant 0 : i32
    return %arg0, %c0_i32, %c0_i32_0 : i32, i32, i32
  }
}

module attributes {stable_mosaic.version = 11 : i64} {
  func.func @_decoder_head_kernel(%arg0: i32, %arg1: memref<1x16x32xf32, #tpu.memory_space<vmem>>, %arg2: memref<1x32xf32, #tpu.memory_space<vmem>>, %arg3: memref<1x32xf32, #tpu.memory_space<vmem>>, %arg4: memref<32x64xbf16, #tpu.memory_space<vmem>>, %arg5: memref<1x64xf32, #tpu.memory_space<vmem>>, %arg6: memref<1x16x64xf32, #tpu.memory_space<vmem>>, %arg7: memref<1x16x1xf32, #tpu.memory_space<vmem>>) attributes {dimension_semantics = [#tpu.dimension_semantics<parallel>], iteration_bounds = array<i64: 2>, scalar_prefetch = 0 : i64, scratch_operands = 0 : i64, tpu.core_type = #tpu.core_type<tc>, window_params = [{transform_indices = @transform_0, window_bounds = array<i64: 1, 16, 32>}, {pipeline_mode = #tpu.pipeline_mode<synchronous>, transform_indices = @transform_1, window_bounds = array<i64: 1, 32>}, {pipeline_mode = #tpu.pipeline_mode<synchronous>, transform_indices = @transform_2, window_bounds = array<i64: 1, 32>}, {pipeline_mode = #tpu.pipeline_mode<synchronous>, transform_indices = @transform_3, window_bounds = array<i64: 32, 64>}, {pipeline_mode = #tpu.pipeline_mode<synchronous>, transform_indices = @transform_4, window_bounds = array<i64: 1, 64>}, {transform_indices = @transform_5, window_bounds = array<i64: 1, 16, 64>}, {transform_indices = @transform_6, window_bounds = array<i64: 1, 16, 1>}]} {
    %c0 = arith.constant 0 : index
    %c0_0 = arith.constant 0 : index
    %c0_1 = arith.constant 0 : index
    %0 = vector.load %arg1[%c0, %c0_0, %c0_1] : memref<1x16x32xf32, #tpu.memory_space<vmem>>, vector<1x16x32xf32>
    %1 = vector.shape_cast %0 : vector<1x16x32xf32> to vector<16x32xf32>
    %cst = arith.constant dense<0.000000e+00> : vector<16xf32>
    %2 = vector.multi_reduction <add>, %1, %cst [1] : vector<16x32xf32> to vector<16xf32>
    %3 = vector.shape_cast %2 : vector<16xf32> to vector<16x1xf32>
    %cst_2 = arith.constant 3.200000e+01 : f32
    %4 = vector.broadcast %cst_2 : f32 to vector<16x1xf32>
    %5 = arith.divf %3, %4 : vector<16x1xf32>
    %6 = vector.broadcast %5 : vector<16x1xf32> to vector<16x32xf32>
    %7 = arith.subf %1, %6 : vector<16x32xf32>
    %8 = arith.mulf %7, %7 : vector<16x32xf32>
    %cst_3 = arith.constant dense<0.000000e+00> : vector<16xf32>
    %9 = vector.multi_reduction <add>, %8, %cst_3 [1] : vector<16x32xf32> to vector<16xf32>
    %10 = vector.shape_cast %9 : vector<16xf32> to vector<16x1xf32>
    %cst_4 = arith.constant 3.200000e+01 : f32
    %11 = vector.broadcast %cst_4 : f32 to vector<16x1xf32>
    %12 = arith.divf %10, %11 : vector<16x1xf32>
    %13 = vector.broadcast %5 : vector<16x1xf32> to vector<16x32xf32>
    %14 = arith.subf %1, %13 : vector<16x32xf32>
    %cst_5 = arith.constant 9.99999974E-6 : f32
    %15 = vector.broadcast %cst_5 : f32 to vector<16x1xf32>
    %16 = arith.addf %12, %15 : vector<16x1xf32>
    %17 = math.rsqrt %16 : vector<16x1xf32>
    %18 = vector.broadcast %17 : vector<16x1xf32> to vector<16x32xf32>
    %19 = arith.mulf %14, %18 : vector<16x32xf32>
    %c0_6 = arith.constant 0 : index
    %c0_7 = arith.constant 0 : index
    %20 = vector.load %arg2[%c0_6, %c0_7] : memref<1x32xf32, #tpu.memory_space<vmem>>, vector<1x32xf32>
    %21 = vector.broadcast %20 : vector<1x32xf32> to vector<16x32xf32>
    %22 = arith.mulf %19, %21 : vector<16x32xf32>
    %c0_8 = arith.constant 0 : index
    %c0_9 = arith.constant 0 : index
    %23 = vector.load %arg3[%c0_8, %c0_9] : memref<1x32xf32, #tpu.memory_space<vmem>>, vector<1x32xf32>
    %24 = vector.broadcast %23 : vector<1x32xf32> to vector<16x32xf32>
    %25 = arith.addf %22, %24 : vector<16x32xf32>
    %26 = arith.truncf %25 : vector<16x32xf32> to vector<16x32xbf16>
    %c0_10 = arith.constant 0 : index
    %c0_11 = arith.constant 0 : index
    %27 = vector.load %arg4[%c0_10, %c0_11] : memref<32x64xbf16, #tpu.memory_space<vmem>>, vector<32x64xbf16>
    %cst_12 = arith.constant dense<0.000000e+00> : vector<16x64xf32>
    %28 = tpu.matmul %26, %27, %cst_12 {dimension_numbers = #tpu.dot_dimension_numbers<[1], [0], [0], [1], [0, 0, 1, 1], [], []>} : vector<16x32xbf16>, vector<32x64xbf16>, vector<16x64xf32> -> vector<16x64xf32>
    %c0_13 = arith.constant 0 : index
    %c0_14 = arith.constant 0 : index
    %29 = vector.load %arg5[%c0_13, %c0_14] : memref<1x64xf32, #tpu.memory_space<vmem>>, vector<1x64xf32>
    %30 = vector.broadcast %29 : vector<1x64xf32> to vector<16x64xf32>
    %31 = arith.addf %28, %30 : vector<16x64xf32>
    %c0_15 = arith.constant 0 : index
    %c0_16 = arith.constant 0 : index
    %c0_17 = arith.constant 0 : index
    %32 = vector.load %arg6[%c0_15, %c0_16, %c0_17] : memref<1x16x64xf32, #tpu.memory_space<vmem>>, vector<1x16x64xf32>
    %33 = vector.shape_cast %32 : vector<1x16x64xf32> to vector<16x64xf32>
    %34 = arith.subf %31, %33 : vector<16x64xf32>
    %35 = arith.mulf %34, %34 : vector<16x64xf32>
    %cst_18 = arith.constant dense<0.000000e+00> : vector<16xf32>
    %36 = vector.multi_reduction <add>, %35, %cst_18 [1] : vector<16x64xf32> to vector<16xf32>
    %37 = vector.shape_cast %36 : vector<16xf32> to vector<16x1xf32>
    %cst_19 = arith.constant 6.400000e+01 : f32
    %38 = vector.broadcast %cst_19 : f32 to vector<16x1xf32>
    %39 = arith.divf %37, %38 : vector<16x1xf32>
    %c0_20 = arith.constant 0 : index
    %c0_21 = arith.constant 0 : index
    %c0_22 = arith.constant 0 : index
    %40 = vector.load %arg7[%c0_20, %c0_21, %c0_22] : memref<1x16x1xf32, #tpu.memory_space<vmem>>, vector<1x16x1xf32>
    %41 = vector.shape_cast %40 : vector<1x16x1xf32> to vector<16x1xf32>
    %42 = vector.shape_cast %39 : vector<16x1xf32> to vector<1x16x1xf32>
    tpu.vector_store %arg7[%c0_20, %c0_21, %c0_22], %42 {strides = array<i32>} : memref<1x16x1xf32, #tpu.memory_space<vmem>>, vector<1x16x1xf32>,
    return
  }
  func.func @transform_0(%arg0: i32) -> (i32, i32, i32) {
    %c0_i32 = arith.constant 0 : i32
    %c0_i32_0 = arith.constant 0 : i32
    %c0_i32_1 = arith.constant 0 : i32
    return %arg0, %c0_i32, %c0_i32_0 : i32, i32, i32
  }
  func.func @transform_1(%arg0: i32) -> (i32, i32) {
    %c0_i32 = arith.constant 0 : i32
    %c0_i32_0 = arith.constant 0 : i32
    %c0_i32_1 = arith.constant 0 : i32
    return %c0_i32, %c0_i32_0 : i32, i32
  }
  func.func @transform_2(%arg0: i32) -> (i32, i32) {
    %c0_i32 = arith.constant 0 : i32
    %c0_i32_0 = arith.constant 0 : i32
    %c0_i32_1 = arith.constant 0 : i32
    return %c0_i32, %c0_i32_0 : i32, i32
  }
  func.func @transform_3(%arg0: i32) -> (i32, i32) {
    %c0_i32 = arith.constant 0 : i32
    %c0_i32_0 = arith.constant 0 : i32
    %c0_i32_1 = arith.constant 0 : i32
    return %c0_i32, %c0_i32_0 : i32, i32
  }
  func.func @transform_4(%arg0: i32) -> (i32, i32) {
    %c0_i32 = arith.constant 0 : i32
    %c0_i32_0 = arith.constant 0 : i32
    %c0_i32_1 = arith.constant 0 : i32
    return %c0_i32, %c0_i32_0 : i32, i32
  }
  func.func @transform_5(%arg0: i32) -> (i32, i32, i32) {
    %c0_i32 = arith.constant 0 : i32
    %c0_i32_0 = arith.constant 0 : i32
    %c0_i32_1 = arith.constant 0 : i32
    return %arg0, %c0_i32, %c0_i32_0 : i32, i32, i32
  }
  func.func @transform_6(%arg0: i32) -> (i32, i32, i32) {
    %c0_i32 = arith.constant 0 : i32
    %c0_i32_0 = arith.constant 0 : i32
    %c0_i32_1 = arith.constant 0 : i32
    return %arg0, %c0_i32, %c0_i32_0 : i32, i32, i32
  }
}

module attributes {stable_mosaic.version = 11 : i64} {
  func.func @_vit_block_kernel(%arg0: i32, %arg1: memref<1x17x32xf32, #tpu.memory_space<vmem>>, %arg2: memref<1x32xf32, #tpu.memory_space<vmem>>, %arg3: memref<1x32xf32, #tpu.memory_space<vmem>>, %arg4: memref<32x96xbf16, #tpu.memory_space<vmem>>, %arg5: memref<1x96xf32, #tpu.memory_space<vmem>>, %arg6: memref<32x32xbf16, #tpu.memory_space<vmem>>, %arg7: memref<1x32xf32, #tpu.memory_space<vmem>>, %arg8: memref<1x32xf32, #tpu.memory_space<vmem>>, %arg9: memref<1x32xf32, #tpu.memory_space<vmem>>, %arg10: memref<32x128xbf16, #tpu.memory_space<vmem>>, %arg11: memref<1x128xf32, #tpu.memory_space<vmem>>, %arg12: memref<128x32xbf16, #tpu.memory_space<vmem>>, %arg13: memref<1x32xf32, #tpu.memory_space<vmem>>, %arg14: memref<1x17x32xf32, #tpu.memory_space<vmem>>) attributes {dimension_semantics = [#tpu.dimension_semantics<parallel>], iteration_bounds = array<i64: 2>, scalar_prefetch = 0 : i64, scratch_operands = 0 : i64, tpu.core_type = #tpu.core_type<tc>, window_params = [{transform_indices = @transform_0, window_bounds = array<i64: 1, 17, 32>}, {pipeline_mode = #tpu.pipeline_mode<synchronous>, transform_indices = @transform_1, window_bounds = array<i64: 1, 32>}, {pipeline_mode = #tpu.pipeline_mode<synchronous>, transform_indices = @transform_2, window_bounds = array<i64: 1, 32>}, {pipeline_mode = #tpu.pipeline_mode<synchronous>, transform_indices = @transform_3, window_bounds = array<i64: 32, 96>}, {pipeline_mode = #tpu.pipeline_mode<synchronous>, transform_indices = @transform_4, window_bounds = array<i64: 1, 96>}, {pipeline_mode = #tpu.pipeline_mode<synchronous>, transform_indices = @transform_5, window_bounds = array<i64: 32, 32>}, {pipeline_mode = #tpu.pipeline_mode<synchronous>, transform_indices = @transform_6, window_bounds = array<i64: 1, 32>}, {pipeline_mode = #tpu.pipeline_mode<synchronous>, transform_indices = @transform_7, window_bounds = array<i64: 1, 32>}, {pipeline_mode = #tpu.pipeline_mode<synchronous>, transform_indices = @transform_8, window_bounds = array<i64: 1, 32>}, {pipeline_mode = #tpu.pipeline_mode<synchronous>, transform_indices = @transform_9, window_bounds = array<i64: 32, 128>}, {pipeline_mode = #tpu.pipeline_mode<synchronous>, transform_indices = @transform_10, window_bounds = array<i64: 1, 128>}, {pipeline_mode = #tpu.pipeline_mode<synchronous>, transform_indices = @transform_11, window_bounds = array<i64: 128, 32>}, {pipeline_mode = #tpu.pipeline_mode<synchronous>, transform_indices = @transform_12, window_bounds = array<i64: 1, 32>}, {transform_indices = @transform_13, window_bounds = array<i64: 1, 17, 32>}]} {
    %c0 = arith.constant 0 : index
    %c0_0 = arith.constant 0 : index
    %c0_1 = arith.constant 0 : index
    %0 = vector.load %arg1[%c0, %c0_0, %c0_1] : memref<1x17x32xf32, #tpu.memory_space<vmem>>, vector<1x17x32xf32>
    %1 = vector.shape_cast %0 : vector<1x17x32xf32> to vector<17x32xf32>
    %cst = arith.constant dense<0.000000e+00> : vector<17xf32>
    %2 = vector.multi_reduction <add>, %1, %cst [1] : vector<17x32xf32> to vector<17xf32>
    %3 = vector.shape_cast %2 : vector<17xf32> to vector<17x1xf32>
    %cst_2 = arith.constant 3.200000e+01 : f32
    %4 = vector.broadcast %cst_2 : f32 to vector<17x1xf32>
    %5 = arith.divf %3, %4 : vector<17x1xf32>
    %6 = vector.broadcast %5 : vector<17x1xf32> to vector<17x32xf32>
    %7 = arith.subf %1, %6 : vector<17x32xf32>
    %8 = arith.mulf %7, %7 : vector<17x32xf32>
    %cst_3 = arith.constant dense<0.000000e+00> : vector<17xf32>
    %9 = vector.multi_reduction <add>, %8, %cst_3 [1] : vector<17x32xf32> to vector<17xf32>
    %10 = vector.shape_cast %9 : vector<17xf32> to vector<17x1xf32>
    %cst_4 = arith.constant 3.200000e+01 : f32
    %11 = vector.broadcast %cst_4 : f32 to vector<17x1xf32>
    %12 = arith.divf %10, %11 : vector<17x1xf32>
    %13 = vector.broadcast %5 : vector<17x1xf32> to vector<17x32xf32>
    %14 = arith.subf %1, %13 : vector<17x32xf32>
    %cst_5 = arith.constant 9.99999974E-6 : f32
    %15 = vector.broadcast %cst_5 : f32 to vector<17x1xf32>
    %16 = arith.addf %12, %15 : vector<17x1xf32>
    %17 = math.rsqrt %16 : vector<17x1xf32>
    %18 = vector.broadcast %17 : vector<17x1xf32> to vector<17x32xf32>
    %19 = arith.mulf %14, %18 : vector<17x32xf32>
    %c0_6 = arith.constant 0 : index
    %c0_7 = arith.constant 0 : index
    %20 = vector.load %arg2[%c0_6, %c0_7] : memref<1x32xf32, #tpu.memory_space<vmem>>, vector<1x32xf32>
    %21 = vector.broadcast %20 : vector<1x32xf32> to vector<17x32xf32>
    %22 = arith.mulf %19, %21 : vector<17x32xf32>
    %c0_8 = arith.constant 0 : index
    %c0_9 = arith.constant 0 : index
    %23 = vector.load %arg3[%c0_8, %c0_9] : memref<1x32xf32, #tpu.memory_space<vmem>>, vector<1x32xf32>
    %24 = vector.broadcast %23 : vector<1x32xf32> to vector<17x32xf32>
    %25 = arith.addf %22, %24 : vector<17x32xf32>
    %26 = arith.truncf %25 : vector<17x32xf32> to vector<17x32xbf16>
    %c0_10 = arith.constant 0 : index
    %c0_11 = arith.constant 0 : index
    %27 = vector.load %arg4[%c0_10, %c0_11] : memref<32x96xbf16, #tpu.memory_space<vmem>>, vector<32x96xbf16>
    %cst_12 = arith.constant dense<0.000000e+00> : vector<17x96xf32>
    %28 = tpu.matmul %26, %27, %cst_12 {dimension_numbers = #tpu.dot_dimension_numbers<[1], [0], [0], [1], [0, 0, 1, 1], [], []>} : vector<17x32xbf16>, vector<32x96xbf16>, vector<17x96xf32> -> vector<17x96xf32>
    %c0_13 = arith.constant 0 : index
    %c0_14 = arith.constant 0 : index
    %29 = vector.load %arg5[%c0_13, %c0_14] : memref<1x96xf32, #tpu.memory_space<vmem>>, vector<1x96xf32>
    %30 = vector.broadcast %29 : vector<1x96xf32> to vector<17x96xf32>
    %31 = arith.addf %28, %30 : vector<17x96xf32>
    %32 = vector.extract_strided_slice %31 {offsets = [0, 0], sizes = [17, 32], strides = [1, 1]} : vector<17x96xf32> to vector<17x32xf32>
    %cst_15 = arith.constant 0.353553385 : f32
    %33 = vector.broadcast %cst_15 : f32 to vector<17x32xf32>
    %34 = arith.mulf %32, %33 : vector<17x32xf32>
    %35 = vector.extract_strided_slice %31 {offsets = [0, 32], sizes = [17, 32], strides = [1, 1]} : vector<17x96xf32> to vector<17x32xf32>
    %36 = vector.extract_strided_slice %31 {offsets = [0, 64], sizes = [17, 32], strides = [1, 1]} : vector<17x96xf32> to vector<17x32xf32>
    %cst_16 = arith.constant 0.000000e+00 : f32
    %37 = vector.broadcast %cst_16 : f32 to vector<17x32xf32>
    %38 = vector.extract_strided_slice %34 {offsets = [0, 0], sizes = [17, 8], strides = [1, 1]} : vector<17x32xf32> to vector<17x8xf32>
    %39 = vector.extract_strided_slice %35 {offsets = [0, 0], sizes = [17, 8], strides = [1, 1]} : vector<17x32xf32> to vector<17x8xf32>
    %40 = vector.extract_strided_slice %36 {offsets = [0, 0], sizes = [17, 8], strides = [1, 1]} : vector<17x32xf32> to vector<17x8xf32>
    %41 = tpu.transpose %39, [1, 0] : vector<17x8xf32> -> vector<8x17xf32>
    %cst_17 = arith.constant dense<0.000000e+00> : vector<17x17xf32>
    %42 = tpu.matmul %38, %41, %cst_17 {dimension_numbers = #tpu.dot_dimension_numbers<[1], [0], [0], [1], [0, 0, 1, 1], [], []>} : vector<17x8xf32>, vector<8x17xf32>, vector<17x17xf32> -> vector<17x17xf32>
    %cst_18 = arith.constant dense<0xFF800000> : vector<17xf32>
    %43 = vector.multi_reduction <maximumf>, %42, %cst_18 [1] : vector<17x17xf32> to vector<17xf32>
    %44 = vector.shape_cast %43 : vector<17xf32> to vector<17x1xf32>
    %45 = vector.broadcast %44 : vector<17x1xf32> to vector<17x17xf32>
    %46 = arith.subf %42, %45 : vector<17x17xf32>
    %47 = math.exp %46 : vector<17x17xf32>
    %cst_19 = arith.constant dense<0.000000e+00> : vector<17xf32>
    %48 = vector.multi_reduction <add>, %47, %cst_19 [1] : vector<17x17xf32> to vector<17xf32>
    %49 = vector.shape_cast %48 : vector<17xf32> to vector<17x1xf32>
    %50 = tpu.reciprocal %49 {approx = true} : vector<17x1xf32> -> vector<17x1xf32>
    %51 = vector.broadcast %50 : vector<17x1xf32> to vector<17x17xf32>
    %52 = arith.mulf %47, %51 : vector<17x17xf32>
    %cst_20 = arith.constant dense<0.000000e+00> : vector<17x8xf32>
    %53 = tpu.matmul %52, %40, %cst_20 {dimension_numbers = #tpu.dot_dimension_numbers<[1], [0], [0], [1], [0, 0, 1, 1], [], []>} : vector<17x17xf32>, vector<17x8xf32>, vector<17x8xf32> -> vector<17x8xf32>
    %54 = arith.truncf %53 : vector<17x8xf32> to vector<17x8xbf16>
    %c0_21 = arith.constant 0 : index
    %c0_22 = arith.constant 0 : index
    %55 = vector.load %arg6[%c0_21, %c0_22] : memref<32x32xbf16, #tpu.memory_space<vmem>>, vector<8x32xbf16>
    %cst_23 = arith.constant dense<0.000000e+00> : vector<17x32xf32>
    %56 = tpu.matmul %54, %55, %cst_23 {dimension_numbers = #tpu.dot_dimension_numbers<[1], [0], [0], [1], [0, 0, 1, 1], [], []>} : vector<17x8xbf16>, vector<8x32xbf16>, vector<17x32xf32> -> vector<17x32xf32>
    %57 = arith.addf %37, %56 : vector<17x32xf32>
    %58 = vector.extract_strided_slice %34 {offsets = [0, 8], sizes = [17, 8], strides = [1, 1]} : vector<17x32xf32> to vector<17x8xf32>
    %59 = vector.extract_strided_slice %35 {offsets = [0, 8], sizes = [17, 8], strides = [1, 1]} : vector<17x32xf32> to vector<17x8xf32>
    %60 = vector.extract_strided_slice %36 {offsets = [0, 8], sizes = [17, 8], strides = [1, 1]} : vector<17x32xf32> to vector<17x8xf32>
    %61 = tpu.transpose %59, [1, 0] : vector<17x8xf32> -> vector<8x17xf32>
    %cst_24 = arith.constant dense<0.000000e+00> : vector<17x17xf32>
    %62 = tpu.matmul %58, %61, %cst_24 {dimension_numbers = #tpu.dot_dimension_numbers<[1], [0], [0], [1], [0, 0, 1, 1], [], []>} : vector<17x8xf32>, vector<8x17xf32>, vector<17x17xf32> -> vector<17x17xf32>
    %cst_25 = arith.constant dense<0xFF800000> : vector<17xf32>
    %63 = vector.multi_reduction <maximumf>, %62, %cst_25 [1] : vector<17x17xf32> to vector<17xf32>
    %64 = vector.shape_cast %63 : vector<17xf32> to vector<17x1xf32>
    %65 = vector.broadcast %64 : vector<17x1xf32> to vector<17x17xf32>
    %66 = arith.subf %62, %65 : vector<17x17xf32>
    %67 = math.exp %66 : vector<17x17xf32>
    %cst_26 = arith.constant dense<0.000000e+00> : vector<17xf32>
    %68 = vector.multi_reduction <add>, %67, %cst_26 [1] : vector<17x17xf32> to vector<17xf32>
    %69 = vector.shape_cast %68 : vector<17xf32> to vector<17x1xf32>
    %70 = tpu.reciprocal %69 {approx = true} : vector<17x1xf32> -> vector<17x1xf32>
    %71 = vector.broadcast %70 : vector<17x1xf32> to vector<17x17xf32>
    %72 = arith.mulf %67, %71 : vector<17x17xf32>
    %cst_27 = arith.constant dense<0.000000e+00> : vector<17x8xf32>
    %73 = tpu.matmul %72, %60, %cst_27 {dimension_numbers = #tpu.dot_dimension_numbers<[1], [0], [0], [1], [0, 0, 1, 1], [], []>} : vector<17x17xf32>, vector<17x8xf32>, vector<17x8xf32> -> vector<17x8xf32>
    %74 = arith.truncf %73 : vector<17x8xf32> to vector<17x8xbf16>
    %c8 = arith.constant 8 : index
    %c0_28 = arith.constant 0 : index
    %75 = vector.load %arg6[%c8, %c0_28] : memref<32x32xbf16, #tpu.memory_space<vmem>>, vector<8x32xbf16>
    %cst_29 = arith.constant dense<0.000000e+00> : vector<17x32xf32>
    %76 = tpu.matmul %74, %75, %cst_29 {dimension_numbers = #tpu.dot_dimension_numbers<[1], [0], [0], [1], [0, 0, 1, 1], [], []>} : vector<17x8xbf16>, vector<8x32xbf16>, vector<17x32xf32> -> vector<17x32xf32>
    %77 = arith.addf %57, %76 : vector<17x32xf32>
    %78 = vector.extract_strided_slice %34 {offsets = [0, 16], sizes = [17, 8], strides = [1, 1]} : vector<17x32xf32> to vector<17x8xf32>
    %79 = vector.extract_strided_slice %35 {offsets = [0, 16], sizes = [17, 8], strides = [1, 1]} : vector<17x32xf32> to vector<17x8xf32>
    %80 = vector.extract_strided_slice %36 {offsets = [0, 16], sizes = [17, 8], strides = [1, 1]} : vector<17x32xf32> to vector<17x8xf32>
    %81 = tpu.transpose %79, [1, 0] : vector<17x8xf32> -> vector<8x17xf32>
    %cst_30 = arith.constant dense<0.000000e+00> : vector<17x17xf32>
    %82 = tpu.matmul %78, %81, %cst_30 {dimension_numbers = #tpu.dot_dimension_numbers<[1], [0], [0], [1], [0, 0, 1, 1], [], []>} : vector<17x8xf32>, vector<8x17xf32>, vector<17x17xf32> -> vector<17x17xf32>
    %cst_31 = arith.constant dense<0xFF800000> : vector<17xf32>
    %83 = vector.multi_reduction <maximumf>, %82, %cst_31 [1] : vector<17x17xf32> to vector<17xf32>
    %84 = vector.shape_cast %83 : vector<17xf32> to vector<17x1xf32>
    %85 = vector.broadcast %84 : vector<17x1xf32> to vector<17x17xf32>
    %86 = arith.subf %82, %85 : vector<17x17xf32>
    %87 = math.exp %86 : vector<17x17xf32>
    %cst_32 = arith.constant dense<0.000000e+00> : vector<17xf32>
    %88 = vector.multi_reduction <add>, %87, %cst_32 [1] : vector<17x17xf32> to vector<17xf32>
    %89 = vector.shape_cast %88 : vector<17xf32> to vector<17x1xf32>
    %90 = tpu.reciprocal %89 {approx = true} : vector<17x1xf32> -> vector<17x1xf32>
    %91 = vector.broadcast %90 : vector<17x1xf32> to vector<17x17xf32>
    %92 = arith.mulf %87, %91 : vector<17x17xf32>
    %cst_33 = arith.constant dense<0.000000e+00> : vector<17x8xf32>
    %93 = tpu.matmul %92, %80, %cst_33 {dimension_numbers = #tpu.dot_dimension_numbers<[1], [0], [0], [1], [0, 0, 1, 1], [], []>} : vector<17x17xf32>, vector<17x8xf32>, vector<17x8xf32> -> vector<17x8xf32>
    %94 = arith.truncf %93 : vector<17x8xf32> to vector<17x8xbf16>
    %c16 = arith.constant 16 : index
    %c0_34 = arith.constant 0 : index
    %95 = vector.load %arg6[%c16, %c0_34] : memref<32x32xbf16, #tpu.memory_space<vmem>>, vector<8x32xbf16>
    %cst_35 = arith.constant dense<0.000000e+00> : vector<17x32xf32>
    %96 = tpu.matmul %94, %95, %cst_35 {dimension_numbers = #tpu.dot_dimension_numbers<[1], [0], [0], [1], [0, 0, 1, 1], [], []>} : vector<17x8xbf16>, vector<8x32xbf16>, vector<17x32xf32> -> vector<17x32xf32>
    %97 = arith.addf %77, %96 : vector<17x32xf32>
    %98 = vector.extract_strided_slice %34 {offsets = [0, 24], sizes = [17, 8], strides = [1, 1]} : vector<17x32xf32> to vector<17x8xf32>
    %99 = vector.extract_strided_slice %35 {offsets = [0, 24], sizes = [17, 8], strides = [1, 1]} : vector<17x32xf32> to vector<17x8xf32>
    %100 = vector.extract_strided_slice %36 {offsets = [0, 24], sizes = [17, 8], strides = [1, 1]} : vector<17x32xf32> to vector<17x8xf32>
    %101 = tpu.transpose %99, [1, 0] : vector<17x8xf32> -> vector<8x17xf32>
    %cst_36 = arith.constant dense<0.000000e+00> : vector<17x17xf32>
    %102 = tpu.matmul %98, %101, %cst_36 {dimension_numbers = #tpu.dot_dimension_numbers<[1], [0], [0], [1], [0, 0, 1, 1], [], []>} : vector<17x8xf32>, vector<8x17xf32>, vector<17x17xf32> -> vector<17x17xf32>
    %cst_37 = arith.constant dense<0xFF800000> : vector<17xf32>
    %103 = vector.multi_reduction <maximumf>, %102, %cst_37 [1] : vector<17x17xf32> to vector<17xf32>
    %104 = vector.shape_cast %103 : vector<17xf32> to vector<17x1xf32>
    %105 = vector.broadcast %104 : vector<17x1xf32> to vector<17x17xf32>
    %106 = arith.subf %102, %105 : vector<17x17xf32>
    %107 = math.exp %106 : vector<17x17xf32>
    %cst_38 = arith.constant dense<0.000000e+00> : vector<17xf32>
    %108 = vector.multi_reduction <add>, %107, %cst_38 [1] : vector<17x17xf32> to vector<17xf32>
    %109 = vector.shape_cast %108 : vector<17xf32> to vector<17x1xf32>
    %110 = tpu.reciprocal %109 {approx = true} : vector<17x1xf32> -> vector<17x1xf32>
    %111 = vector.broadcast %110 : vector<17x1xf32> to vector<17x17xf32>
    %112 = arith.mulf %107, %111 : vector<17x17xf32>
    %cst_39 = arith.constant dense<0.000000e+00> : vector<17x8xf32>
    %113 = tpu.matmul %112, %100, %cst_39 {dimension_numbers = #tpu.dot_dimension_numbers<[1], [0], [0], [1], [0, 0, 1, 1], [], []>} : vector<17x17xf32>, vector<17x8xf32>, vector<17x8xf32> -> vector<17x8xf32>
    %114 = arith.truncf %113 : vector<17x8xf32> to vector<17x8xbf16>
    %c24 = arith.constant 24 : index
    %c0_40 = arith.constant 0 : index
    %115 = vector.load %arg6[%c24, %c0_40] : memref<32x32xbf16, #tpu.memory_space<vmem>>, vector<8x32xbf16>
    %cst_41 = arith.constant dense<0.000000e+00> : vector<17x32xf32>
    %116 = tpu.matmul %114, %115, %cst_41 {dimension_numbers = #tpu.dot_dimension_numbers<[1], [0], [0], [1], [0, 0, 1, 1], [], []>} : vector<17x8xbf16>, vector<8x32xbf16>, vector<17x32xf32> -> vector<17x32xf32>
    %117 = arith.addf %97, %116 : vector<17x32xf32>
    %118 = arith.addf %1, %117 : vector<17x32xf32>
    %c0_42 = arith.constant 0 : index
    %c0_43 = arith.constant 0 : index
    %119 = vector.load %arg7[%c0_42, %c0_43] : memref<1x32xf32, #tpu.memory_space<vmem>>, vector<1x32xf32>
    %120 = vector.broadcast %119 : vector<1x32xf32> to vector<17x32xf32>
    %121 = arith.addf %118, %120 : vector<17x32xf32>
    %cst_44 = arith.constant dense<0.000000e+00> : vector<17xf32>
    %122 = vector.multi_reduction <add>, %121, %cst_44 [1] : vector<17x32xf32> to vector<17xf32>
    %123 = vector.shape_cast %122 : vector<17xf32> to vector<17x1xf32>
    %cst_45 = arith.constant 3.200000e+01 : f32
    %124 = vector.broadcast %cst_45 : f32 to vector<17x1xf32>
    %125 = arith.divf %123, %124 : vector<17x1xf32>
    %126 = vector.broadcast %125 : vector<17x1xf32> to vector<17x32xf32>
    %127 = arith.subf %121, %126 : vector<17x32xf32>
    %128 = arith.mulf %127, %127 : vector<17x32xf32>
    %cst_46 = arith.constant dense<0.000000e+00> : vector<17xf32>
    %129 = vector.multi_reduction <add>, %128, %cst_46 [1] : vector<17x32xf32> to vector<17xf32>
    %130 = vector.shape_cast %129 : vector<17xf32> to vector<17x1xf32>
    %cst_47 = arith.constant 3.200000e+01 : f32
    %131 = vector.broadcast %cst_47 : f32 to vector<17x1xf32>
    %132 = arith.divf %130, %131 : vector<17x1xf32>
    %133 = vector.broadcast %125 : vector<17x1xf32> to vector<17x32xf32>
    %134 = arith.subf %121, %133 : vector<17x32xf32>
    %cst_48 = arith.constant 9.99999974E-6 : f32
    %135 = vector.broadcast %cst_48 : f32 to vector<17x1xf32>
    %136 = arith.addf %132, %135 : vector<17x1xf32>
    %137 = math.rsqrt %136 : vector<17x1xf32>
    %138 = vector.broadcast %137 : vector<17x1xf32> to vector<17x32xf32>
    %139 = arith.mulf %134, %138 : vector<17x32xf32>
    %c0_49 = arith.constant 0 : index
    %c0_50 = arith.constant 0 : index
    %140 = vector.load %arg8[%c0_49, %c0_50] : memref<1x32xf32, #tpu.memory_space<vmem>>, vector<1x32xf32>
    %141 = vector.broadcast %140 : vector<1x32xf32> to vector<17x32xf32>
    %142 = arith.mulf %139, %141 : vector<17x32xf32>
    %c0_51 = arith.constant 0 : index
    %c0_52 = arith.constant 0 : index
    %143 = vector.load %arg9[%c0_51, %c0_52] : memref<1x32xf32, #tpu.memory_space<vmem>>, vector<1x32xf32>
    %144 = vector.broadcast %143 : vector<1x32xf32> to vector<17x32xf32>
    %145 = arith.addf %142, %144 : vector<17x32xf32>
    %146 = arith.truncf %145 : vector<17x32xf32> to vector<17x32xbf16>
    %c0_53 = arith.constant 0 : index
    %c0_54 = arith.constant 0 : index
    %147 = vector.load %arg10[%c0_53, %c0_54] : memref<32x128xbf16, #tpu.memory_space<vmem>>, vector<32x128xbf16>
    %cst_55 = arith.constant dense<0.000000e+00> : vector<17x128xf32>
    %148 = tpu.matmul %146, %147, %cst_55 {dimension_numbers = #tpu.dot_dimension_numbers<[1], [0], [0], [1], [0, 0, 1, 1], [], []>} : vector<17x32xbf16>, vector<32x128xbf16>, vector<17x128xf32> -> vector<17x128xf32>
    %c0_56 = arith.constant 0 : index
    %c0_57 = arith.constant 0 : index
    %149 = vector.load %arg11[%c0_56, %c0_57] : memref<1x128xf32, #tpu.memory_space<vmem>>, vector<1x128xf32>
    %150 = vector.broadcast %149 : vector<1x128xf32> to vector<17x128xf32>
    %151 = arith.addf %148, %150 : vector<17x128xf32>
    %cst_58 = arith.constant 5.000000e-01 : f32
    %152 = vector.broadcast %cst_58 : f32 to vector<17x128xf32>
    %153 = arith.mulf %152, %151 : vector<17x128xf32>
    %cst_59 = arith.constant 0.707106769 : f32
    %154 = vector.broadcast %cst_59 : f32 to vector<17x128xf32>
    %155 = arith.mulf %151, %154 : vector<17x128xf32>
    %156 = math.erf %155 : vector<17x128xf32>
    %cst_60 = arith.constant 1.000000e+00 : f32
    %157 = vector.broadcast %cst_60 : f32 to vector<17x128xf32>
    %158 = arith.addf %157, %156 : vector<17x128xf32>
    %159 = arith.mulf %153, %158 : vector<17x128xf32>
    %160 = arith.truncf %159 : vector<17x128xf32> to vector<17x128xbf16>
    %c0_61 = arith.constant 0 : index
    %c0_62 = arith.constant 0 : index
    %161 = vector.load %arg12[%c0_61, %c0_62] : memref<128x32xbf16, #tpu.memory_space<vmem>>, vector<128x32xbf16>
    %cst_63 = arith.constant dense<0.000000e+00> : vector<17x32xf32>
    %162 = tpu.matmul %160, %161, %cst_63 {dimension_numbers = #tpu.dot_dimension_numbers<[1], [0], [0], [1], [0, 0, 1, 1], [], []>} : vector<17x128xbf16>, vector<128x32xbf16>, vector<17x32xf32> -> vector<17x32xf32>
    %c0_64 = arith.constant 0 : index
    %c0_65 = arith.constant 0 : index
    %163 = vector.load %arg13[%c0_64, %c0_65] : memref<1x32xf32, #tpu.memory_space<vmem>>, vector<1x32xf32>
    %164 = vector.broadcast %163 : vector<1x32xf32> to vector<17x32xf32>
    %165 = arith.addf %162, %164 : vector<17x32xf32>
    %166 = arith.addf %121, %165 : vector<17x32xf32>
    %c0_66 = arith.constant 0 : index
    %c0_67 = arith.constant 0 : index
    %c0_68 = arith.constant 0 : index
    %167 = vector.load %arg14[%c0_66, %c0_67, %c0_68] : memref<1x17x32xf32, #tpu.memory_space<vmem>>, vector<1x17x32xf32>
    %168 = vector.shape_cast %167 : vector<1x17x32xf32> to vector<17x32xf32>
    %169 = vector.shape_cast %166 : vector<17x32xf32> to vector<1x17x32xf32>
    tpu.vector_store %arg14[%c0_66, %c0_67, %c0_68], %169 {strides = array<i32>} : memref<1x17x32xf32, #tpu.memory_space<vmem>>, vector<1x17x32xf32>,
    return
  }
  func.func @transform_0(%arg0: i32) -> (i32, i32, i32) {
    %c0_i32 = arith.constant 0 : i32
    %c0_i32_0 = arith.constant 0 : i32
    %c0_i32_1 = arith.constant 0 : i32
    return %arg0, %c0_i32, %c0_i32_0 : i32, i32, i32
  }
  func.func @transform_1(%arg0: i32) -> (i32, i32) {
    %c0_i32 = arith.constant 0 : i32
    %c0_i32_0 = arith.constant 0 : i32
    %c0_i32_1 = arith.constant 0 : i32
    return %c0_i32, %c0_i32_0 : i32, i32
  }
  func.func @transform_2(%arg0: i32) -> (i32, i32) {
    %c0_i32 = arith.constant 0 : i32
    %c0_i32_0 = arith.constant 0 : i32
    %c0_i32_1 = arith.constant 0 : i32
    return %c0_i32, %c0_i32_0 : i32, i32
  }
  func.func @transform_3(%arg0: i32) -> (i32, i32) {
    %c0_i32 = arith.constant 0 : i32
    %c0_i32_0 = arith.constant 0 : i32
    %c0_i32_1 = arith.constant 0 : i32
    return %c0_i32, %c0_i32_0 : i32, i32
  }
  func.func @transform_4(%arg0: i32) -> (i32, i32) {
    %c0_i32 = arith.constant 0 : i32
    %c0_i32_0 = arith.constant 0 : i32
    %c0_i32_1 = arith.constant 0 : i32
    return %c0_i32, %c0_i32_0 : i32, i32
  }
  func.func @transform_5(%arg0: i32) -> (i32, i32) {
    %c0_i32 = arith.constant 0 : i32
    %c0_i32_0 = arith.constant 0 : i32
    %c0_i32_1 = arith.constant 0 : i32
    return %c0_i32, %c0_i32_0 : i32, i32
  }
  func.func @transform_6(%arg0: i32) -> (i32, i32) {
    %c0_i32 = arith.constant 0 : i32
    %c0_i32_0 = arith.constant 0 : i32
    %c0_i32_1 = arith.constant 0 : i32
    return %c0_i32, %c0_i32_0 : i32, i32
  }
  func.func @transform_7(%arg0: i32) -> (i32, i32) {
    %c0_i32 = arith.constant 0 : i32
    %c0_i32_0 = arith.constant 0 : i32
    %c0_i32_1 = arith.constant 0 : i32
    return %c0_i32, %c0_i32_0 : i32, i32
  }
  func.func @transform_8(%arg0: i32) -> (i32, i32) {
    %c0_i32 = arith.constant 0 : i32
    %c0_i32_0 = arith.constant 0 : i32
    %c0_i32_1 = arith.constant 0 : i32
    return %c0_i32, %c0_i32_0 : i32, i32
  }
  func.func @transform_9(%arg0: i32) -> (i32, i32) {
    %c0_i32 = arith.constant 0 : i32
    %c0_i32_0 = arith.constant 0 : i32
    %c0_i32_1 = arith.constant 0 : i32
    return %c0_i32, %c0_i32_0 : i32, i32
  }
  func.func @transform_10(%arg0: i32) -> (i32, i32) {
    %c0_i32 = arith.constant 0 : i32
    %c0_i32_0 = arith.constant 0 : i32
    %c0_i32_1 = arith.constant 0 : i32
    return %c0_i32, %c0_i32_0 : i32, i32
  }
  func.func @transform_11(%arg0: i32) -> (i32, i32) {
    %c0_i32 = arith.constant 0 : i32
    %c0_i32_0 = arith.constant 0 : i32
    %c0_i32_1 = arith.constant 0 : i32
    return %c0_i32, %c0_i32_0 : i32, i32
  }
  func.func @transform_12(%arg0: i32) -> (i32, i32) {
    %c0_i32 = arith.constant 0 : i32
    %c0_i32_0 = arith.constant 0 : i32
    %c0_i32_1 = arith.constant 0 : i32
    return %c0_i32, %c0_i32_0 : i32, i32
  }
  func.func @transform_13(%arg0: i32) -> (i32, i32, i32) {
    %c0_i32 = arith.constant 0 : i32
    %c0_i32_0 = arith.constant 0 : i32
    %c0_i32_1 = arith.constant 0 : i32
    return %arg0, %c0_i32, %c0_i32_0 : i32, i32, i32
  }
}

</mosaic_0001>

<bundles_post_ra>
// kernel: _lambda_.7
= control target key start
LH: loop header
LB: loop body
LE: loop exit
PB: predicated region body
PF: predicated region fallthrough
CT: control target
= control target key end

     0   :  { %s433_s15 = smov 0   ;;  %s471_s0 = inlined_call_operand.vmem [shape: f32[2,16,64], index: 0, kind: input, shape index: {}]   ;;  %s472_s1 = inlined_call_operand.vmem [shape: bf16[64,32], index: 1, kind: input, shape index: {}]   ;;  %s473_s2 = inlined_call_operand.vmem [shape: f32[1,32], index: 2, kind: input, shape index: {}]   ;;  %s474_s3 = inlined_call_operand.vmem [shape: f32[1,16,32], index: 3, kind: input, shape index: {}]   ;;  %s475_s4 = inlined_call_operand.vmem [shape: f32[2,16,32], index: 4, kind: output, shape index: {}]  }
   0x1 LB: > { %s348_s16 = sadd.s32 4294967295, %s404_s15   ;;  %p352_p0 = scmp.ge.s32.totalorder %s404_s15, 1  ;;  %s404_s15 = sphi %s433_s15, %s14_s15  }
   0x2   : > { %p162_p1 = scmp.lt.s32.totalorder %s404_s15, 3 }
   0x4   : > { %p163_p2 = pnand %p352_p0, %p162_p1 }
   0x5   : > { %v394_v0 = vld [vmem:[%s472_s1] sm:$0xff] (!%p163_p2)   ;;  %v406_v1 = vmov (!%p163_p2), 0.0   ;;  %v395_v2 = vld [vmem:[%s472_s1 + $0x8] sm:$0xff] (!%p163_p2)   ;;  %vm407_vm0 = vmmov (!%p163_p2), 0   ;;  %p188_p3 = scmp.lt.s32.totalorder (!%p163_p2), %s348_s16, 1  ;;  %v396_v3 = vld [vmem:[%s472_s1 + $0x10] sm:$0xff] (!%p163_p2)  }
   0x6   : > { %166 = sbr.rel (%p163_p2) target bundleno = 241 (0xf1), region = 36  ;;  %372 = vmatprep.subr.bf16.mxu0 (!%p163_p2), %v406_v1  ;;  %380 = vmatprep.mubr.msk.bf16.mxu0 (!%p163_p2), %vm407_vm0, %v406_v1  ;;  %v397_v4 = vld [vmem:[%s472_s1 + $0x18] sm:$0xff] (!%p163_p2)   ;;  %vm241_vm1 = vcmask (!%p163_p2), 523264   ;;  %v357_v8 = vld [vmem:[%s473_s2] ss:$0 sm:$0xff] (!%p163_p2)  ;;  %vm290_vm2 = vcmask (!%p163_p2), 261120  }
   0x7   : > { %373 = vmatpush3.bf16.msra.mxu0 (!%p163_p2), %v394_v0  ;;  %v286_v10 = vld [vmem:[%s474_s3] sm:$0xff] (!%p163_p2)  ;;  %v287_v14 = vld [vmem:[%s474_s3 + $0x8] sm:$0xff] (!%p163_p2) }
   0x8   : > { %374 = vmatprep.subr.bf16.mxu0 (!%p163_p2), %v406_v1 }
   0xb   : > { %375 = vmatpush3.bf16.msra.mxu0 (!%p163_p2), %v395_v2 }
   0xc   : > { %376 = vmatprep.subr.bf16.mxu0 (!%p163_p2), %v406_v1 }
   0xd   : > { %s477_s16 = smov (!%p188_p3, %s348_s16), 1 }
   0xe   : > { %s365_s23 = sshll.u32 %s477_s16, 4 }
   0xf   : > { %s192_s26 = scalar_lea.vmem %s471_s0, %s365_s23  ;;  %377 = vmatpush3.bf16.msra.mxu0 %v396_v3  ;;  %s197_s9 = scalar_lea.vmem %s475_s4, %s365_s23 }
  0x10   : > { %v199_v5 = vld [vmem:[%s192_s26] sm:$0xff]  ;;  %v200_v6 = vld [vmem:[%s192_s26 + $0x8] sm:$0xff]  ;;  %378 = vmatprep.subr.bf16.mxu0 %v406_v1 }
  0x11   : > { %v201_v7 = vpack.c.bf16 %v200_v6, %v199_v5 }
  0x13   : > { %379 = vmatpush3.bf16.msra.mxu0 %v397_v4 }
  0x16   : > { %381 = vmatmul.mubr.msk.bf16.vlgmr.msra.gmra.mrb[0].mxu0 %vm241_vm1, %v201_v7 }
  0xe9   : > { %v279_v9 = vpop.f32.mrb[0].mxu0 }
  0xea   : > { %v280_v11 = vadd.f32 %v357_v8, %v279_v9  ;;  %v382_v12 = vpop.f32.mrb[1].mxu0 }
  0xeb   : > { %v282_v13 = vpop.f32.mrb[2].mxu0 }
  0xec   : > { %v288_v15 = vadd.f32 %v286_v10, %v280_v11  ;;  %v283_v16 = vadd.f32 %v357_v8, %v282_v13  ;;  %v383_v17 = vpop.f32.mrb[3].mxu0 }
  0xee   : > { %291 = vst.msk [vmem:[%s197_s9] sm:$0xff] %vm290_vm2, %v288_v15  ;;  %v289_v18 = vadd.f32 %v287_v14, %v283_v16 }
  0xf0   : > { %292 = vst.msk [vmem:[%s197_s9 + $0x8] sm:$0xff] %vm290_vm2, %v289_v18 }
  0xf1 PF: > { %s14_s15 = sadd.s32 1, %s404_s15  }
  0xf2   : > { %p11_p4 = scmp.ge.s32.totalorder %s14_s15, 4  }
  0xf4   :  { %13 = sbr.rel (!%p11_p4) target bundleno = 1 (0x1), region = 66 }

// kernel: _lambda_.10
= control target key start
LH: loop header
LB: loop body
LE: loop exit
PB: predicated region body
PF: predicated region fallthrough
CT: control target
= control target key end

     0   :  { %s455_s18 = smov 0   ;;  %s497_s0 = inlined_call_operand.vmem [shape: f32[2,5,32], index: 0, kind: input, shape index: {}]   ;;  %s498_s1 = inlined_call_operand.vmem [shape: f32[1,32], index: 1, kind: input, shape index: {}]   ;;  %s499_s2 = inlined_call_operand.vmem [shape: f32[1,32], index: 2, kind: input, shape index: {}]   ;;  %s500_s3 = inlined_call_operand.vmem [shape: bf16[32,32], index: 3, kind: input, shape index: {}]   ;;  %s501_s4 = inlined_call_operand.vmem [shape: f32[1,32], index: 4, kind: input, shape index: {}]   ;;  %s502_s5 = inlined_call_operand.vmem [shape: f32[2,5,32], index: 5, kind: output, shape index: {}]  }
   0x1 LB: > { %s375_s19 = sadd.s32 4294967295, %s421_s18   ;;  %p379_p0 = scmp.ge.s32.totalorder %s421_s18, 1  ;;  %s421_s18 = sphi %s455_s18, %s15_s18  }
   0x2   : > { %p186_p1 = scmp.lt.s32.totalorder %s421_s18, 3 }
   0x4   : > { %p187_p2 = pnand %p379_p0, %p186_p1 }
   0x5   : > { %p212_p3 = scmp.lt.s32.totalorder (!%p187_p2), %s375_s19, 1  ;;  %vm222_vm0 = vcmask (!%p187_p2), 258048   ;;  %v411_v7 = vld [vmem:[%s500_s3] sm:$0xff] (!%p187_p2)   ;;  %v423_v8 = vmov (!%p187_p2), 0.0   ;;  %v412_v9 = vld [vmem:[%s500_s3 + $0x8] sm:$0xff] (!%p187_p2)   ;;  %vm424_vm1 = vmmov (!%p187_p2), 0  }
   0x6   : > { %190 = sbr.rel (%p187_p2) target bundleno = 547 (0x223), region = 40  ;;  %393 = vmatprep.subr.bf16.mxu0 (!%p187_p2), %v423_v8  ;;  %397 = vmatprep.mubr.msk.bf16.mxu0 (!%p187_p2), %vm424_vm1, %v423_v8  ;;  %v382_v14 = vld [vmem:[%s498_s1] ss:$0 sm:$0xff] (!%p187_p2)  ;;  %vm277_vm2 = vcmask (!%p187_p2), 261120  }
   0x7   : > { %394 = vmatpush3.bf16.msra.mxu0 (!%p187_p2), %v411_v7  ;;  %v383_v16 = vld [vmem:[%s499_s2] ss:$0 sm:$0xff] (!%p187_p2) }
   0x8   : > { %395 = vmatprep.subr.bf16.mxu0 (!%p187_p2), %v423_v8  ;;  %v384_v20 = vld [vmem:[%s501_s4] ss:$0 sm:$0xff] (!%p187_p2) }
   0xb   : > { %396 = vmatpush3.bf16.msra.mxu0 (!%p187_p2), %v412_v9 }
   0xd   : > { %s504_s19 = smov (!%p212_p3, %s375_s19), 1 }
   0xe   : > { %s380_s20 = sshll.u32 %s504_s19, 3 }
   0xf   : > { %s215_s23 = scalar_lea.vmem %s497_s0, %s380_s20  ;;  %s219_s11 = scalar_lea.vmem %s502_s5, %s380_s20 }
  0x10   : > { %v221_v0 = vld [vmem:[%s215_s23] sm:$0x1f] }
  0x11   : > { %v223_v1 = vsel %vm222_vm0, %v221_v0, 0.0 }
  0x12   : > { %224 = vadd.xlane.f32.xlu0 %v223_v1 }
  0x9f   : > { %v225_v2 = vpop.xlane.xlu0 %224 }
  0xa0   : > { %v227_v3 = vmul.f32 0.03125, %v225_v2 }
  0xa2   : > { %v228_v4 = vsub.f32 %v221_v0, %v227_v3 }
  0xa4   : > { %v229_v5 = vmul.f32 %v228_v4, %v228_v4 }
  0xa6   : > { %v230_v6 = vsel %vm222_vm0, %v229_v5, 0.0 }
  0xa7   : > { %231 = vadd.xlane.f32.xlu0 %v230_v6 }
 0x134   : > { %v232_v10 = vpop.xlane.xlu0 %231 }
 0x135   : > { %v233_v11 = vmul.f32 0.03125, %v232_v10 }
 0x137   : > { %v234_v12 = vadd.f32 1e-05, %v233_v11 }
 0x139   : > { %413 = vrsqrt.f32 %v234_v12 }
 0x143   : > { %v414_v13 = vpop.eup %413 }
 0x144   : > { %v236_v15 = vmul.f32 %v414_v13, %v228_v4 }
 0x146   : > { %v244_v17 = vmul.f32 %v382_v14, %v236_v15 }
 0x148   : > { %v252_v18 = vadd.f32 %v383_v16, %v244_v17 }
 0x14a   : > { %v253_v19 = vpack.c.bf16 %v252_v18, %v252_v18 }
 0x14c   : > { %398 = vmatmul.mubr.msk.bf16.vlgmr.msra.gmra.mrb[0].mxu0 %vm277_vm2, %v253_v19 }
 0x21f   : > { %v315_v21 = vpop.f32.mrb[0].mxu0 }
 0x220   : > { %v316_v22 = vadd.f32 %v384_v20, %v315_v21  ;;  %v399_v23 = vpop.f32.mrb[1].mxu0 }
 0x221   : > { %v318_v24 = vpop.f32.mrb[2].mxu0 }
 0x222   : > { %321 = vst.msk [vmem:[%s219_s11] sm:$0x1f] %vm222_vm0, %v316_v22  ;;  %v400_v25 = vpop.f32.mrb[3].mxu0 }
 0x223 PF: > { %s15_s18 = sadd.s32 1, %s421_s18  }
 0x224   : > { %p12_p4 = scmp.ge.s32.totalorder %s15_s18, 4  }
 0x226   :  { %14 = sbr.rel (!%p12_p4) target bundleno = 1 (0x1), region = 70 }

// kernel: _lambda_.13
= control target key start
LH: loop header
LB: loop body
LE: loop exit
PB: predicated region body
PF: predicated region fallthrough
CT: control target
= control target key end

     0   :  { %s569_s21 = smov 0   ;;  %s614_s0 = inlined_call_operand.vmem [shape: f32[2,16,32], index: 0, kind: input, shape index: {}]   ;;  %s615_s1 = inlined_call_operand.vmem [shape: f32[1,32], index: 1, kind: input, shape index: {}]   ;;  %s616_s2 = inlined_call_operand.vmem [shape: f32[1,32], index: 2, kind: input, shape index: {}]   ;;  %s617_s3 = inlined_call_operand.vmem [shape: bf16[32,64], index: 3, kind: input, shape index: {}]   ;;  %s618_s4 = inlined_call_operand.vmem [shape: f32[1,64], index: 4, kind: input, shape index: {}]   ;;  %s619_s5 = inlined_call_operand.vmem [shape: f32[2,16,64], index: 5, kind: input, shape index: {}]   ;;  %s620_s6 = inlined_call_operand.vmem [shape: f32[2,16,1], index: 6, kind: output, shape index: {}]  }
   0x1 LB: > { %s475_s22 = sadd.s32 4294967295, %s530_s21   ;;  %p479_p0 = scmp.ge.s32.totalorder %s530_s21, 1  ;;  %s530_s21 = sphi %s569_s21, %s16_s21  }
   0x2   : > { %p222_p1 = scmp.lt.s32.totalorder %s530_s21, 3 }
   0x4   : > { %p223_p2 = pnand %p479_p0, %p222_p1 }
   0x5   : > { %p257_p3 = scmp.lt.s32.totalorder (!%p223_p2), %s475_s22, 1  ;;  %vm275_vm0 = vcmask (!%p223_p2), 261120   ;;  %v518_v14 = vld [vmem:[%s617_s3] sm:$0xff] (!%p223_p2)   ;;  %v532_v15 = vmov (!%p223_p2), 0.0   ;;  %v519_v16 = vld [vmem:[%s617_s3 + $0x8] sm:$0xff] (!%p223_p2)   ;;  %vm533_vm1 = vmmov (!%p223_p2), 0  }
   0x6   : > { %226 = sbr.rel (%p223_p2) target bundleno = 702 (0x2be), region = 44  ;;  %500 = vmatprep.subr.bf16.mxu0 (!%p223_p2), %v532_v15  ;;  %504 = vmatprep.mubr.msk.bf16.mxu0 (!%p223_p2), %vm533_vm1, %v532_v15  ;;  %v486_v25 = vld [vmem:[%s615_s1] ss:$0 sm:$0xff] (!%p223_p2)  ;;  %vm395_vm2 = vcmask (!%p223_p2), 523264   ;;  %vm405_vm3 = vcmask (!%p223_p2), 7168  }
   0x7   : > { %501 = vmatpush3.bf16.msra.mxu0 (!%p223_p2), %v518_v14  ;;  %v487_v29 = vld [vmem:[%s616_s2] ss:$0 sm:$0xff] (!%p223_p2) }
   0x8   : > { %502 = vmatprep.subr.bf16.mxu0 (!%p223_p2), %v532_v15  ;;  %v488_v34 = vld [vmem:[%s618_s4] ss:$0 sm:$0xff] (!%p223_p2) }
   0xb   : > { %503 = vmatpush3.bf16.msra.mxu0 (!%p223_p2), %v519_v16 }
   0xd   : > { %s622_s22 = smov (!%p257_p3, %s475_s22), 1 }
   0xe   : > { %s577_s23 = sshll.u32 %s622_s22, 4 }
   0xf   : > { %s261_s26 = scalar_lea.vmem %s614_s0, %s577_s23  ;;  %s266_s13 = scalar_lea.vmem %s619_s5, %s577_s23 }
  0x10   : > { %v273_v0 = vld [vmem:[%s261_s26] sm:$0xff]  ;;  %v274_v1 = vld [vmem:[%s261_s26 + $0x8] sm:$0xff]  ;;  %s271_s18 = scalar_lea.vmem %s620_s6, %s577_s23 }
  0x11   : > { %v276_v2 = vsel %vm275_vm0, %v273_v0, 0.0  ;;  %v279_v3 = vsel %vm275_vm0, %v274_v1, 0.0  ;;  %v389_v36 = vld [vmem:[%s266_s13] sm:$0xff]  ;;  %v390_v40 = vld [vmem:[%s266_s13 + $0x8] sm:$0xff] }
  0x12   : > { %277 = vadd.xlane.f32.xlu0 %v276_v2 }
  0x16   : > { %280 = vadd.xlane.f32.xlu0 %v279_v3 }
  0x9f   : > { %v278_v4 = vpop.xlane.xlu0 %277 }
  0xa0   : > { %v283_v5 = vmul.f32 0.03125, %v278_v4 }
  0xa2   : > { %v285_v6 = vsub.f32 %v273_v0, %v283_v5 }
  0xa3   : > { %v281_v7 = vpop.xlane.xlu0 %280 }
  0xa4   : > { %v284_v8 = vmul.f32 0.03125, %v281_v7  ;;  %v287_v9 = vmul.f32 %v285_v6, %v285_v6 }
  0xa6   : > { %v286_v10 = vsub.f32 %v274_v1, %v284_v8  ;;  %v289_v11 = vsel %vm275_vm0, %v287_v9, 0.0 }
  0xa7   : > { %290 = vadd.xlane.f32.xlu1 %v289_v11 }
  0xa8   : > { %v288_v12 = vmul.f32 %v286_v10, %v286_v10 }
  0xaa   : > { %v292_v13 = vsel %vm275_vm0, %v288_v12, 0.0 }
  0xab   : > { %293 = vadd.xlane.f32.xlu1 %v292_v13 }
 0x134   : > { %v291_v17 = vpop.xlane.xlu1 %290 }
 0x135   : > { %v295_v18 = vmul.f32 0.03125, %v291_v17 }
 0x137   : > { %v297_v19 = vadd.f32 1e-05, %v295_v18 }
 0x138   : > { %v294_v20 = vpop.xlane.xlu1 %293 }
 0x139   : > { %520 = vrsqrt.f32 %v297_v19  ;;  %v296_v21 = vmul.f32 0.03125, %v294_v20 }
 0x13b   : > { %v298_v22 = vadd.f32 1e-05, %v296_v21 }
 0x13d   : > { %522 = vrsqrt.f32 %v298_v22 }
 0x143   : > { %v521_v23 = vpop.eup %520 }
 0x144   : > { %v301_v24 = vmul.f32 %v521_v23, %v285_v6 }
 0x146   : > { %v310_v28 = vmul.f32 %v486_v25, %v301_v24 }
 0x147   : > { %v523_v26 = vpop.eup %522 }
 0x148   : > { %v302_v27 = vmul.f32 %v523_v26, %v286_v10  ;;  %v319_v31 = vadd.f32 %v487_v29, %v310_v28 }
 0x14a   : > { %v311_v30 = vmul.f32 %v486_v25, %v302_v27 }
 0x14c   : > { %v320_v32 = vadd.f32 %v487_v29, %v311_v30 }
 0x14e   : > { %v321_v33 = vpack.c.bf16 %v320_v32, %v319_v31 }
 0x150   : > { %505 = vmatmul.mubr.msk.bf16.vlgmr.msra.gmra.mrb[0].mxu0 %vm275_vm0, %v321_v33 }
 0x223   : > { %v382_v35 = vpop.f32.mrb[0].mxu0 }
 0x224   : > { %v383_v37 = vadd.f32 %v488_v34, %v382_v35  ;;  %v506_v38 = vpop.f32.mrb[1].mxu0 }
 0x225   : > { %v385_v39 = vpop.f32.mrb[2].mxu0 }
 0x226   : > { %v391_v41 = vsub.f32 %v383_v37, %v389_v36  ;;  %v386_v42 = vadd.f32 %v488_v34, %v385_v39  ;;  %v507_v43 = vpop.f32.mrb[3].mxu0 }
 0x228   : > { %v392_v44 = vsub.f32 %v386_v42, %v390_v40  ;;  %v393_v45 = vmul.f32 %v391_v41, %v391_v41 }
 0x22a   : > { %v396_v46 = vsel %vm395_vm2, %v393_v45, 0.0  ;;  %v394_v47 = vmul.f32 %v392_v44, %v392_v44 }
 0x22b   : > { %397 = vadd.xlane.f32.xlu0 %v396_v46 }
 0x22c   : > { %v399_v48 = vsel %vm395_vm2, %v394_v47, 0.0 }
 0x22d   : > { %400 = vadd.xlane.f32.xlu1 %v399_v48 }
 0x2b8   : > { %v398_v49 = vpop.xlane.xlu0 %397 }
 0x2b9   : > { %v403_v50 = vmul.f32 0.015625, %v398_v49 }
 0x2ba   : > { %v401_v51 = vpop.xlane.xlu1 %400 }
 0x2bb   : > { %406 = vst.msk [vmem:[%s271_s18] sm:$0xff] %vm405_vm3, %v403_v50  ;;  %v404_v52 = vmul.f32 0.015625, %v401_v51 }
 0x2bd   : > { %407 = vst.msk [vmem:[%s271_s18 + $0x8] sm:$0xff] %vm405_vm3, %v404_v52 }
 0x2be PF: > { %s16_s21 = sadd.s32 1, %s530_s21  }
 0x2bf   : > { %p13_p4 = scmp.ge.s32.totalorder %s16_s21, 4  }
 0x2c1   :  { %15 = sbr.rel (!%p13_p4) target bundleno = 1 (0x1), region = 77 }

// kernel: _lambda_.8
= control target key start
LH: loop header
LB: loop body
LE: loop exit
PB: predicated region body
PF: predicated region fallthrough
CT: control target
= control target key end

     0   :  { %s2014_s25 = smov 0   ;;  %s2224_s0 = inlined_call_operand.vmem [shape: f32[2,5,32], index: 0, kind: input, shape index: {}]   ;;  %s2225_s1 = inlined_call_operand.vmem [shape: f32[1,32], index: 1, kind: input, shape index: {}]   ;;  %s2226_s2 = inlined_call_operand.vmem [shape: f32[1,32], index: 2, kind: input, shape index: {}]   ;;  %s2227_s3 = inlined_call_operand.vmem [shape: bf16[32,96], index: 3, kind: input, shape index: {}]   ;;  %s2228_s4 = inlined_call_operand.vmem [shape: f32[1,96], index: 4, kind: input, shape index: {}]   ;;  %s2229_s5 = inlined_call_operand.vmem [shape: bf16[32,32], index: 5, kind: input, shape index: {}]   ;;  %s2230_s6 = inlined_call_operand.vmem [shape: f32[1,32], index: 6, kind: input, shape index: {}]   ;;  %s2231_s7 = inlined_call_operand.vmem [shape: f32[1,32], index: 7, kind: input, shape index: {}]   ;;  %s2232_s8 = inlined_call_operand.vmem [shape: f32[1,32], index: 8, kind: input, shape index: {}]   ;;  %s2233_s9 = inlined_call_operand.vmem [shape: bf16[32,128], index: 9, kind: input, shape index: {}]   ;;  %s2234_s10 = inlined_call_operand.vmem [shape: f32[1,128], index: 10, kind: input, shape index: {}]   ;;  %s2235_s11 = inlined_call_operand.vmem [shape: bf16[128,32], index: 11, kind: input, shape index: {}]   ;;  %s2236_s12 = inlined_call_operand.vmem [shape: f32[1,32], index: 12, kind: input, shape index: {}]   ;;  %s2237_s13 = inlined_call_operand.vmem [shape: f32[2,5,32], index: 13, kind: output, shape index: {}]  }
   0x1 LB: > { %s1678_s26 = sadd.s32 4294967295, %s1929_s25   ;;  %p1682_p0 = scmp.ge.s32.totalorder %s1929_s25, 1  ;;  %s1929_s25 = sphi %s2014_s25, %s23_s25  }
   0x2   : > { %p386_p1 = scmp.lt.s32.totalorder %s1929_s25, 3 }
   0x4   : > { %p387_p2 = pnand %p1682_p0, %p386_p1 }
   0x5   : > { %p428_p3 = scmp.lt.s32.totalorder (!%p387_p2), %s1678_s26, 1  ;;  %vm438_vm0 = vcmask (!%p387_p2), 258048   ;;  %v1889_v7 = vld [vmem:[%s2227_s3] sm:$0xff] (!%p387_p2)   ;;  %v1931_v8 = vmov (!%p387_p2), 0.0   ;;  %vm1932_vm1 = vmmov (!%p387_p2), 0   ;;  %v1890_v9 = vld [vmem:[%s2227_s3 + $0x8] sm:$0xff] (!%p387_p2)  }
   0x6   : > { %390 = sbr.rel (%p387_p2) target bundleno = 3677 (0xe5d), region = 72  ;;  %1768 = vmatprep.subr.bf16.mxu0 (!%p387_p2), %v1931_v8  ;;  %1772 = vmatprep.mubr.msk.bf16.mxu0 (!%p387_p2), %vm1932_vm1, %v1931_v8  ;;  %v1685_v14 = vld [vmem:[%s2225_s1] ss:$0 sm:$0xff] (!%p387_p2)  ;;  %vm493_vm2 = vcmask (!%p387_p2), 261120   ;;  %s1933_s24 = smov (!%p387_p2), 64   ;;  %vm541_vm3 = vcmask (!%p387_p2), 64512  }
   0x7   : > { %1769 = vmatpush3.bf16.msra.mxu0 (!%p387_p2), %v1889_v7  ;;  %1781 = vmatprep.subr.mxu1 (!%p387_p2), %v1931_v8  ;;  %v1686_v16 = vld [vmem:[%s2226_s2] ss:$0 sm:$0xff] (!%p387_p2)  ;;  %s1934_s28 = smov (!%p387_p2), 96   ;;  %s1935_s29 = smov (!%p387_p2), 88   ;;  %vm635_vm4 = vcmask (!%p387_p2), 1044480   ;;  %vm617_vm5 = vcmask (!%p387_p2), 36864  }
   0x8   : > { %1770 = vmatprep.subr.bf16.mxu0 (!%p387_p2), %v1931_v8  ;;  %1783 = vmatprep.mubr.msk.f32.mxu1 (!%p387_p2), %vm1932_vm1, %v1931_v8  ;;  %v1687_v20 = vld [vmem:[%s2228_s4] ss:$0 sm:$0xff] (!%p387_p2)  ;;  %s1937_s14 = smov (!%p387_p2), 120   ;;  %s1938_s15 = smov (!%p387_p2), 112   ;;  %vm631_vm6 = vcmask (!%p387_p2), 39936   ;;  %vm881_vm7 = vcmask (!%p387_p2), 1043456  }
   0x9   : > { %s1939_s16 = smov (!%p387_p2), 56   ;;  %s1940_s17 = smov (!%p387_p2), 48  }
   0xa   : > { %s1941_s18 = smov (!%p387_p2), 104   ;;  %s1942_s19 = smov (!%p387_p2), 72  }
   0xb   : > { %1771 = vmatpush3.bf16.msra.mxu0 (!%p387_p2), %v1890_v9 }
   0xc   : > { %1776 = vmatprep.subr.mxu0 (!%p387_p2), %v1931_v8 }
   0xd   : > { %s2239_s26 = smov (!%p428_p3, %s1678_s26), 1 }
   0xe   : > { %s1683_s27 = sshll.u32 %s2239_s26, 3 }
   0xf   : > { %s431_s30 = scalar_lea.vmem %s2224_s0, %s1683_s27 }
  0x10   : > { %v2030_v0 = vld [vmem:[%s431_s30] sm:$0x1f]  ;;  %s1936_s30 = smov 80  }
  0x11   : > { %v439_v1 = vsel %vm438_vm0, %v2030_v0, 0.0 }
  0x12   : > { %440 = vadd.xlane.f32.xlu0 %v439_v1 }
  0x9f   : > { %v441_v2 = vpop.xlane.xlu0 %440 }
  0xa0   : > { %v443_v3 = vmul.f32 0.03125, %v441_v2 }
  0xa2   : > { %v444_v4 = vsub.f32 %v2030_v0, %v443_v3  ;;  %v877_v3 = vld [vmem:[%s2229_s5 + $0x4] sm:$0xf] }
  0xa4   : > { %v445_v5 = vmul.f32 %v444_v4, %v444_v4 }
  0xa6   : > { %v446_v6 = vsel %vm438_vm0, %v445_v5, 0.0  ;;  %v709_v5 = vld [vmem:[%s2229_s5] sm:$0xf] }
  0xa7   : > { %447 = vadd.xlane.f32.xlu0 %v446_v6 }
 0x134   : > { %v448_v10 = vpop.xlane.xlu0 %447 }
 0x135   : > { %v449_v11 = vmul.f32 0.03125, %v448_v10 }
 0x137   : > { %v450_v12 = vadd.f32 1e-05, %v449_v11  ;;  %v929_v11 = vsel %vm881_vm7, %v709_v5, 0  ;;  %v1891_v5 = vld [vmem:[%s2233_s9] sm:$0xff]  }
 0x139   : > { %1901 = vrsqrt.f32 %v450_v12 }
 0x143   : > { %v1902_v13 = vpop.eup %1901 }
 0x144   : > { %v452_v15 = vmul.f32 %v1902_v13, %v444_v4  ;;  %v883_v4 = vsel %vm881_vm7, %v877_v3, 0 }
 0x146   : > { %v460_v17 = vmul.f32 %v1685_v14, %v452_v15 }
 0x148   : > { %v468_v18 = vadd.f32 %v1686_v16, %v460_v17 }
 0x14a   : > { %v469_v19 = vpack.c.bf16 %v468_v18, %v468_v18  ;;  %v1138_v18 = vld [vmem:[%s2229_s5 + $0x8] sm:$0xf] }
 0x14c   : > { %1773 = vmatmul.mubr.msk.bf16.vlgmr.msra.gmra.mrb[0].mxu0 %vm493_vm2, %v469_v19  ;;  %v1143_v19 = vsel %vm881_vm7, %v1138_v18, 0 }
 0x14d   : > { %1778 = vmatprep.mubr.msk.f32.mxu0 %vm1932_vm1, %v1931_v8 }
 0x21f   : > { %v531_v21 = vpop.f32.mrb[0].mxu0 }
 0x220   : > { %v2062_v22 = vadd.f32 %v1687_v20, %v531_v21  ;;  %v1774_v23 = vpop.f32.mrb[1].mxu0 }
 0x221   : > { %v534_v24 = vpop.f32.mrb[2].mxu0 }
 0x222   : > { %629 = vrot.lane.b32.xlu0 %v2062_v22, %s1933_s24  ;;  %539 = vrot.lane.b32.xlu1 %v2062_v22, %s1934_s28  ;;  %v1775_v25 = vpop.f32.mrb[3].mxu0  ;;  %v537_v28 = vmul.f32 0.35355338, %v2062_v22 }
 0x226   : > { %712 = vrot.lane.b32.xlu0 %v2062_v22, %s1935_s29  ;;  %s1943_s29 = smov 40  }
 0x294   : > { %v630_v26 = vpop.permute.xlu0 %629  ;;  %v540_v27 = vpop.permute.xlu1 %539 }
 0x295   : > { %1777 = vmatpush3.xpose.msk.msra.mxu0 %vm541_vm3, %v540_v27  ;;  %1782 = vmatpush3.msk.msra.mxu1 %vm635_vm4, %v630_v26 }
 0x296   : > { %1786 = vmatprep.subr.mxu1 %v1931_v8  ;;  %1791 = vmatprep.subr.mxu0 %v1931_v8 }
 0x298   : > { %1779 = vmatmul.mubr.msk.f32.vlgmr.msra.gmra.mrb[4].mxu0 %vm541_vm3, %v537_v28  ;;  %v713_v37 = vpop.permute.xlu0 %712 }
 0x299   : > { %1793 = vmatprep.mubr.msk.f32.mxu0 %vm1932_vm1, %v1931_v8 }
 0x36b   : > { %v613_v29 = vpop.f32.mrb[4].mxu0 }
 0x36c   : > { %v1780_v30 = vpop.f32.mrb[5].mxu0  ;;  %v618_v31 = vsel %vm617_vm5, %v613_v29, -inf }
 0x36d   : > { %619 = vmax.xlane.f32.xlu1 %v618_v31 }
 0x37e   : > { %973 = vrot.lane.b32.xlu1 %v2062_v22, %s1936_s30 }
 0x3fa   : > { %v620_v32 = vpop.xlane.xlu1 %619 }
 0x3fb   : > { %v621_v33 = vsub.f32 %v613_v29, %v620_v32 }
 0x3fd   : > { %v622_v34 = vmul.f32 1.442695, %v621_v33 }
 0x3fe   : > { %v974_v42 = vpop.permute.xlu1 %973 }
 0x3ff   : > { %1903 = vpow2.f32 %v622_v34 }
 0x409   : > { %v1904_v35 = vpop.eup %1903 }
 0x40a   : > { %v624_v36 = vsel %vm617_vm5, %v1904_v35, 0.0 }
 0x40b   : > { %625 = vadd.xlane.f32.xlu0 %v624_v36 }
 0x421   : > { %710 = vrot.lane.b32.xlu0 %v537_v28, %s1937_s14 }
 0x425   : > { %971 = vrot.lane.b32.xlu0 %v537_v28, %s1938_s15 }
 0x498   : > { %v626_v38 = vpop.xlane.xlu0 %625 }
 0x499   : > { %1905 = vrcp.f32 %v626_v38 }
 0x49c   : > { %v711_v41 = vpop.permute.xlu0 %710 }
 0x4a0   : > { %v972_v43 = vpop.permute.xlu0 %971 }
 0x4a3   : > { %v1906_v39 = vpop.eup %1905 }
 0x4a4   : > { %v628_v40 = vmul.f32 %v1906_v39, %v1904_v35 }
 0x4a6   : > { %1784 = vmatmul.mubr.msk.f32.vlgmr.msra.gmra.mrb[0].mxu1 %vm631_vm6, %v628_v40 }
 0x4a7   : > { %1787 = vmatpush3.xpose.msk.msra.mxu1 %vm541_vm3, %v713_v37  ;;  %1788 = vmatprep.mubr.msk.f32.mxu1 %vm1932_vm1, %v1931_v8 }
 0x4a8   : > { %1808 = vmatprep.subr.mxu1 %v1931_v8 }
 0x4aa   : > { %1789 = vmatmul.mubr.msk.f32.vlgmr.msra.gmra.mrb[2].mxu1 %vm541_vm3, %v711_v41 }
 0x4ab   : > { %1809 = vmatpush3.xpose.msk.msra.mxu1 %vm541_vm3, %v974_v42  ;;  %1810 = vmatprep.mubr.msk.f32.mxu1 %vm1932_vm1, %v1931_v8 }
 0x4ac   : > { %1818 = vmatprep.subr.bf16.mxu1 %v1931_v8 }
 0x4ae   : > { %1811 = vmatmul.mubr.msk.f32.vlgmr.msra.gmra.mrb[4].mxu1 %vm541_vm3, %v972_v43 }
 0x4af   : > { %1820 = vmatprep.mubr.msk.bf16.mxu1 %vm1932_vm1, %v1931_v8  ;;  %1819 = vmatpush3.bf16.msra.mxu1 %v1143_v19 }
 0x4b0   : > { %1834 = vmatprep.subr.bf16.mxu1 %v1931_v8 }
 0x579   : > { %v704_v44 = vpop.f32.mrb[0].mxu1 }
 0x57a   : > { %v1785_v45 = vpop.f32.mrb[1].mxu1  ;;  %v708_v12 = vpack.c.bf16 %v704_v44, %v704_v44 }
 0x57d   : > { %v784_v46 = vpop.f32.mrb[2].mxu1 }
 0x57e   : > { %v1790_v47 = vpop.f32.mrb[3].mxu1  ;;  %v788_v48 = vsel %vm617_vm5, %v784_v46, -inf }
 0x57f   : > { %789 = vmax.xlane.f32.xlu0 %v788_v48 }
 0x581   : > { %v1045_v49 = vpop.f32.mrb[4].mxu1 }
 0x582   : > { %v1812_v50 = vpop.f32.mrb[5].mxu1  ;;  %v1049_v57 = vsel %vm617_vm5, %v1045_v49, -inf }
 0x595   : > { %799 = vrot.lane.b32.xlu0 %v2062_v22, %s1939_s16 }
 0x599   : > { %1060 = vrot.lane.b32.xlu0 %v2062_v22, %s1940_s17 }
 0x59d   : > { %1186 = vrot.lane.b32.xlu0 %v537_v28, %s1941_s18 }
 0x60c   : > { %v790_v51 = vpop.xlane.xlu0 %789 }
 0x60d   : > { %v791_v52 = vsub.f32 %v784_v46, %v790_v51 }
 0x60f   : > { %v792_v53 = vmul.f32 1.442695, %v791_v52 }
 0x610   : > { %v800_v54 = vpop.permute.xlu0 %799 }
 0x611   : > { %1907 = vpow2.f32 %v792_v53  ;;  %1792 = vmatpush3.msk.msra.mxu0 %vm635_vm4, %v800_v54 }
 0x612   : > { %1796 = vmatprep.subr.bf16.mxu0 %v1931_v8 }
 0x614   : > { %v1061_v13 = vpop.permute.xlu0 %1060 }
 0x618   : > { %v1187_v17 = vpop.permute.xlu0 %1186 }
 0x61b   : > { %v1908_v55 = vpop.eup %1907 }
 0x61c   : > { %v794_v56 = vsel %vm617_vm5, %v1908_v55, 0.0 }
 0x61d   : > { %795 = vadd.xlane.f32.xlu1 %v794_v56 }
 0x621   : > { %1050 = vmax.xlane.f32.xlu1 %v1049_v57  ;;  %v1711_v57 = vld [vmem:[%s2230_s6] ss:$0 sm:$0xff] }
 0x6aa   : > { %v796_v58 = vpop.xlane.xlu1 %795 }
 0x6ab   : > { %1909 = vrcp.f32 %v796_v58 }
 0x6ae   : > { %v1051_v59 = vpop.xlane.xlu1 %1050 }
 0x6af   : > { %v1052_v60 = vsub.f32 %v1045_v49, %v1051_v59  ;;  %v1353_v49 = vld [vmem:[%s2229_s5 + $0xc] sm:$0xf] }
 0x6b0   : > { %v1358_v50 = vsel %vm881_vm7, %v1353_v49, 0 }
 0x6b1   : > { %v1053_v61 = vmul.f32 1.442695, %v1052_v60 }
 0x6b3   : > { %1911 = vpow2.f32 %v1053_v61 }
 0x6b5   : > { %v1910_v62 = vpop.eup %1909 }
 0x6b6   : > { %v798_v63 = vmul.f32 %v1910_v62, %v1908_v55 }
 0x6b8   : > { %1794 = vmatmul.mubr.msk.f32.vlgmr.msra.gmra.mrb[6].mxu0 %vm631_vm6, %v798_v63 }
 0x6b9   : > { %1798 = vmatprep.mubr.msk.bf16.mxu0 %vm1932_vm1, %v1931_v8  ;;  %1797 = vmatpush3.bf16.msra.mxu0 %v883_v4 }
 0x6ba   : > { %1802 = vmatprep.subr.bf16.mxu0 %v1931_v8 }
 0x6bd   : > { %v1912_v1 = vpop.eup %1911 }
 0x6be   : > { %v1055_v2 = vsel %vm617_vm5, %v1912_v1, 0.0 }
 0x6bf   : > { %1056 = vadd.xlane.f32.xlu1 %v1055_v2 }
 0x6d0   : > { %1188 = vrot.lane.b32.xlu1 %v2062_v22, %s1942_s19  ;;  %s435_s19 = scalar_lea.vmem %s2237_s13, %s1683_s27 }
 0x74c   : > { %v1057_v7 = vpop.xlane.xlu1 %1056 }
 0x74d   : > { %1913 = vrcp.f32 %v1057_v7  ;;  %v1894_v7 = vld [vmem:[%s2235_s11 + $0x8] sm:$0xff]  }
 0x750   : > { %v1189_v16 = vpop.permute.xlu1 %1188 }
 0x757   : > { %v1914_v14 = vpop.eup %1913 }
 0x758   : > { %v1059_v15 = vmul.f32 %v1914_v14, %v1912_v1  ;;  %v1712_v14 = vld [vmem:[%s2231_s7] ss:$0 sm:$0xff] }
 0x78b   : > { %v872_v6 = vpop.f32.mrb[6].mxu0 }
 0x78c   : > { %v876_v9 = vpack.c.bf16 %v872_v6, %v872_v6  ;;  %v1795_v10 = vpop.f32.mrb[7].mxu0  ;;  %v1893_v6 = vld [vmem:[%s2235_s11] sm:$0xff]  }
 0x78e   : > { %1799 = vmatmul.mubr.msk.bf16.vlgmr.msra.gmra.mrb[8].mxu0 %vm541_vm3, %v876_v9  ;;  %v1895_v9 = vld [vmem:[%s2235_s11 + $0x10] sm:$0xff]  }
 0x78f   : > { %1803 = vmatpush3.bf16.msra.mxu0 %v929_v11  ;;  %1804 = vmatprep.mubr.msk.bf16.mxu0 %vm1932_vm1, %v1931_v8 }
 0x790   : > { %1813 = vmatprep.subr.mxu0 %v1931_v8 }
 0x796   : > { %1805 = vmatmul.mubr.msk.bf16.vlgmr.msra.gmra.mrb[12].mxu0 %vm541_vm3, %v708_v12 }
 0x797   : > { %1814 = vmatpush3.msk.msra.mxu0 %vm635_vm4, %v1061_v13  ;;  %1815 = vmatprep.mubr.msk.f32.mxu0 %vm1932_vm1, %v1931_v8 }
 0x798   : > { %1824 = vmatprep.subr.mxu0 %v1931_v8 }
 0x79e   : > { %1816 = vmatmul.mubr.msk.f32.vlgmr.msra.gmra.mrb[16].mxu0 %vm631_vm6, %v1059_v15 }
 0x79f   : > { %1825 = vmatpush3.xpose.msk.msra.mxu0 %vm541_vm3, %v1189_v16  ;;  %1826 = vmatprep.mubr.msk.f32.mxu0 %vm1932_vm1, %v1931_v8  ;;  %v1713_v16 = vld [vmem:[%s2232_s8] ss:$0 sm:$0xff] }
 0x7a0   : > { %1829 = vmatprep.subr.mxu0 %v1931_v8 }
 0x7a2   : > { %1827 = vmatmul.mubr.msk.f32.vlgmr.msra.gmra.mrb[18].mxu0 %vm541_vm3, %v1187_v17 }
 0x7a3   : > { %1831 = vmatprep.mubr.msk.f32.mxu0 %vm1932_vm1, %v1931_v8 }
 0x861   : > { %v919_v20 = vpop.f32.mrb[8].mxu0 }
 0x862   : > { %v1800_v21 = vpop.f32.mrb[9].mxu0 }
 0x863   : > { %v922_v23 = vpop.f32.mrb[10].mxu0  ;;  %v1897_v21 = vld [vmem:[%s2235_s11 + $0x20] sm:$0xff]  }
 0x864   : > { %v1801_v24 = vpop.f32.mrb[11].mxu0  ;;  %v1898_v23 = vld [vmem:[%s2235_s11 + $0x28] sm:$0xff]  }
 0x865   : > { %v1899_v24 = vld [vmem:[%s2235_s11 + $0x30] sm:$0xff]  }
 0x869   : > { %v965_v25 = vpop.f32.mrb[12].mxu0 }
 0x86a   : > { %v966_v26 = vadd.f32 %v965_v25, %v919_v20  ;;  %v1806_v27 = vpop.f32.mrb[13].mxu0  ;;  %v1896_v20 = vld [vmem:[%s2235_s11 + $0x18] sm:$0xff]  }
 0x86b   : > { %v968_v28 = vpop.f32.mrb[14].mxu0  ;;  %v1900_v25 = vld [vmem:[%s2235_s11 + $0x38] sm:$0xff]  }
 0x86c   : > { %v1807_v29 = vpop.f32.mrb[15].mxu0 }
 0x871   : > { %v1133_v30 = vpop.f32.mrb[16].mxu0 }
 0x872   : > { %v1137_v31 = vpack.c.bf16 %v1133_v30, %v1133_v30  ;;  %v1817_v32 = vpop.f32.mrb[17].mxu0 }
 0x874   : > { %1821 = vmatmul.mubr.msk.bf16.vlgmr.msra.gmra.mrb[8].mxu1 %vm541_vm3, %v1137_v31 }
 0x875   : > { %v1260_v33 = vpop.f32.mrb[18].mxu0  ;;  %1836 = vmatprep.mubr.msk.bf16.mxu1 %vm1932_vm1, %v1931_v8  ;;  %1835 = vmatpush3.bf16.msra.mxu1 %v1358_v50 }
 0x876   : > { %v1828_v34 = vpop.f32.mrb[19].mxu0  ;;  %v1264_v35 = vsel %vm617_vm5, %v1260_v33, -inf  ;;  %1848 = vmatprep.subr.bf16.mxu1 %v1931_v8 }
 0x877   : > { %1265 = vmax.xlane.f32.xlu0 %v1264_v35 }
 0x88d   : > { %1275 = vrot.lane.b32.xlu0 %v2062_v22, %s1943_s29 }
 0x904   : > { %v1266_v36 = vpop.xlane.xlu0 %1265 }
 0x905   : > { %v1267_v37 = vsub.f32 %v1260_v33, %v1266_v36 }
 0x907   : > { %v1268_v38 = vmul.f32 1.442695, %v1267_v37  ;;  %v1718_v37 = vld [vmem:[%s2236_s12] ss:$0 sm:$0xff] }
 0x908   : > { %v1276_v39 = vpop.permute.xlu0 %1275 }
 0x909   : > { %1915 = vpow2.f32 %v1268_v38  ;;  %1830 = vmatpush3.msk.msra.mxu0 %vm635_vm4, %v1276_v39 }
 0x90a   : > { %1840 = vmatprep.subr.bf16.mxu0 %v1931_v8 }
 0x913   : > { %v1916_v40 = vpop.eup %1915 }
 0x914   : > { %v1270_v41 = vsel %vm617_vm5, %v1916_v40, 0.0 }
 0x915   : > { %1271 = vadd.xlane.f32.xlu1 %v1270_v41 }
 0x947   : > { %v1179_v42 = vpop.f32.mrb[8].mxu1 }
 0x948   : > { %v1185_v43 = vadd.f32 %v1179_v42, %v966_v26  ;;  %v1822_v44 = vpop.f32.mrb[9].mxu1  ;;  %v1714_v26 = vld [vmem:[%s2234_s10] ss:$0 sm:$0xff] }
 0x949   : > { %v1182_v45 = vpop.f32.mrb[10].mxu1 }
 0x94a   : > { %v1823_v46 = vpop.f32.mrb[11].mxu1 }
 0x9a2   : > { %v1272_v47 = vpop.xlane.xlu1 %1271 }
 0x9a3   : > { %1917 = vrcp.f32 %v1272_v47 }
 0x9ad   : > { %v1918_v22 = vpop.eup %1917 }
 0x9ae   : > { %v1274_v48 = vmul.f32 %v1918_v22, %v1916_v40 }
 0x9b0   : > { %1832 = vmatmul.mubr.msk.f32.vlgmr.msra.gmra.mrb[20].mxu0 %vm631_vm6, %v1274_v48 }
 0x9b1   : > { %1844 = vmatprep.mubr.msk.bf16.mxu0 %vm1932_vm1, %v1931_v8  ;;  %1841 = vmatpush3.bf16.msra.mxu0 %v1891_v5 }
 0x9b2   : > { %1842 = vmatprep.subr.bf16.mxu0 %v1931_v8 }
 0xa83   : > { %v1348_v51 = vpop.f32.mrb[20].mxu0 }
 0xa84   : > { %v1352_v52 = vpack.c.bf16 %v1348_v51, %v1348_v51  ;;  %v1833_v53 = vpop.f32.mrb[21].mxu0 }
 0xa86   : > { %1837 = vmatmul.mubr.msk.bf16.vlgmr.msra.gmra.mrb[12].mxu1 %vm541_vm3, %v1352_v52 }
 0xa87   : > { %1864 = vmatprep.mubr.msk.bf16.mxu1 %vm1932_vm1, %v1931_v8  ;;  %1849 = vmatpush3.bf16.msra.mxu1 %v1893_v6 }
 0xa88   : > { %1850 = vmatprep.subr.bf16.mxu1 %v1931_v8 }
 0xa8b   : > { %1851 = vmatpush3.bf16.msra.mxu1 %v1894_v7 }
 0xa8c   : > { %1852 = vmatprep.subr.bf16.mxu1 %v1931_v8 }
 0xa8f   : > { %1853 = vmatpush3.bf16.msra.mxu1 %v1895_v9 }
 0xa90   : > { %1854 = vmatprep.subr.bf16.mxu1 %v1931_v8 }
 0xa93   : > { %1855 = vmatpush3.bf16.msra.mxu1 %v1896_v20 }
 0xa94   : > { %1856 = vmatprep.subr.bf16.mxu1 %v1931_v8 }
 0xa97   : > { %1857 = vmatpush3.bf16.msra.mxu1 %v1897_v21 }
 0xa98   : > { %1858 = vmatprep.subr.bf16.mxu1 %v1931_v8 }
 0xa9b   : > { %1859 = vmatpush3.bf16.msra.mxu1 %v1898_v23 }
 0xa9c   : > { %1860 = vmatprep.subr.bf16.mxu1 %v1931_v8 }
 0xa9f   : > { %1861 = vmatpush3.bf16.msra.mxu1 %v1899_v24 }
 0xaa0   : > { %1862 = vmatprep.subr.bf16.mxu1 %v1931_v8 }
 0xaa3   : > { %1863 = vmatpush3.bf16.msra.mxu1 %v1900_v25 }
 0xb59   : > { %v1394_v54 = vpop.f32.mrb[12].mxu1 }
 0xb5a   : > { %v1400_v55 = vadd.f32 %v1394_v54, %v1185_v43  ;;  %v1838_v56 = vpop.f32.mrb[13].mxu1 }
 0xb5b   : > { %v1397_v58 = vpop.f32.mrb[14].mxu1 }
 0xb5c   : > { %v1401_v59 = vadd.f32 %v1400_v55, %v2030_v0  ;;  %v1839_v60 = vpop.f32.mrb[15].mxu1  ;;  %v1892_v0 = vld [vmem:[%s2233_s9 + $0x8] sm:$0xff]  }
 0xb5d   : > { %1843 = vmatpush3.bf16.msra.mxu0 %v1892_v0 }
 0xb5e   : > { %v2157_v61 = vadd.f32 %v1711_v57, %v1401_v59 }
 0xb60   : > { %v1410_v62 = vsel %vm438_vm0, %v2157_v61, 0.0 }
 0xb61   : > { %1411 = vadd.xlane.f32.xlu1 %v1410_v62 }
 0xbee   : > { %v1412_v63 = vpop.xlane.xlu1 %1411 }
 0xbef   : > { %v1413_v1 = vmul.f32 0.03125, %v1412_v63 }
 0xbf1   : > { %v1414_v2 = vsub.f32 %v2157_v61, %v1413_v1 }
 0xbf3   : > { %v1415_v3 = vmul.f32 %v1414_v2, %v1414_v2 }
 0xbf5   : > { %v1416_v4 = vsel %vm438_vm0, %v1415_v3, 0.0 }
 0xbf6   : > { %1417 = vadd.xlane.f32.xlu1 %v1416_v4 }
 0xc83   : > { %v1418_v10 = vpop.xlane.xlu1 %1417 }
 0xc84   : > { %v1419_v11 = vmul.f32 0.03125, %v1418_v10 }
 0xc86   : > { %v1420_v12 = vadd.f32 1e-05, %v1419_v11 }
 0xc88   : > { %1919 = vrsqrt.f32 %v1420_v12 }
 0xc92   : > { %v1920_v13 = vpop.eup %1919 }
 0xc93   : > { %v1422_v15 = vmul.f32 %v1920_v13, %v1414_v2 }
 0xc95   : > { %v1430_v17 = vmul.f32 %v1712_v14, %v1422_v15 }
 0xc97   : > { %v1438_v18 = vadd.f32 %v1713_v16, %v1430_v17 }
 0xc99   : > { %v1439_v19 = vpack.c.bf16 %v1438_v18, %v1438_v18 }
 0xc9b   : > { %1845 = vmatmul.mubr.msk.bf16.vlgmr.msra.gmra.mrb[24].mxu0 %vm493_vm2, %v1439_v19 }
 0xd6e   : > { %v1500_v27 = vpop.f32.mrb[24].mxu0 }
 0xd6f   : > { %v1501_v28 = vadd.f32 %v1714_v26, %v1500_v27  ;;  %v1846_v29 = vpop.f32.mrb[25].mxu0 }
 0xd70   : > { %v1503_v30 = vpop.f32.mrb[26].mxu0 }
 0xd71   : > { %v1507_v31 = vmul.f32 0.70710677, %v1501_v28  ;;  %v1847_v32 = vpop.f32.mrb[27].mxu0  ;;  %v1506_v34 = vmul.f32 0.5, %v1501_v28 }
 0xd73   : > { %1921 = verf.f32 %v1507_v31 }
 0xd7d   : > { %v1922_v33 = vpop.eup %1921 }
 0xd7e   : > { %v1509_v8 = vadd.f32 1.0, %v1922_v33 }
 0xd80   : > { %v1510_v35 = vmul.f32 %v1509_v8, %v1506_v34 }
 0xd82   : > { %v1511_v36 = vpack.c.bf16 %v1510_v35, %v1510_v35 }
 0xd84   : > { %1865 = vmatmul.mubr.bf16.vlgmr.msra.gmra.mrb[16].mxu1 %v1511_v36 }
 0xe57   : > { %v1617_v38 = vpop.f32.mrb[16].mxu1 }
 0xe58   : > { %v1618_v39 = vadd.f32 %v1718_v37, %v1617_v38  ;;  %v1866_v40 = vpop.f32.mrb[17].mxu1 }
 0xe59   : > { %v1620_v41 = vpop.f32.mrb[18].mxu1 }
 0xe5a   : > { %v1623_v42 = vadd.f32 %v1618_v39, %v2157_v61  ;;  %v1867_v43 = vpop.f32.mrb[19].mxu1 }
 0xe5c   : > { %1624 = vst.msk [vmem:[%s435_s19] sm:$0x1f] %vm438_vm0, %v1623_v42 }
 0xe5d PF: > { %s23_s25 = sadd.s32 1, %s1929_s25  }
 0xe5e   : > { %p20_p4 = scmp.ge.s32.totalorder %s23_s25, 4  }
 0xe60   :  { %22 = sbr.rel (!%p20_p4) target bundleno = 1 (0x1), region = 102 }

// kernel: _lambda_.11
= control target key start
LH: loop header
LB: loop body
LE: loop exit
PB: predicated region body
PF: predicated region fallthrough
CT: control target
= control target key end

     0   :  { %s2739_s25 = smov 0   ;;  %s3100_s0 = inlined_call_operand.vmem [shape: f32[2,17,32], index: 0, kind: input, shape index: {}]   ;;  %s3101_s1 = inlined_call_operand.vmem [shape: f32[1,32], index: 1, kind: input, shape index: {}]   ;;  %s3102_s2 = inlined_call_operand.vmem [shape: f32[1,32], index: 2, kind: input, shape index: {}]   ;;  %s3103_s3 = inlined_call_operand.vmem [shape: bf16[32,96], index: 3, kind: input, shape index: {}]   ;;  %s3104_s4 = inlined_call_operand.vmem [shape: f32[1,96], index: 4, kind: input, shape index: {}]   ;;  %s3105_s5 = inlined_call_operand.vmem [shape: bf16[32,32], index: 5, kind: input, shape index: {}]   ;;  %s3106_s6 = inlined_call_operand.vmem [shape: f32[1,32], index: 6, kind: input, shape index: {}]   ;;  %s3107_s7 = inlined_call_operand.vmem [shape: f32[1,32], index: 7, kind: input, shape index: {}]   ;;  %s3108_s8 = inlined_call_operand.vmem [shape: f32[1,32], index: 8, kind: input, shape index: {}]   ;;  %s3109_s9 = inlined_call_operand.vmem [shape: bf16[32,128], index: 9, kind: input, shape index: {}]   ;;  %s3110_s10 = inlined_call_operand.vmem [shape: f32[1,128], index: 10, kind: input, shape index: {}]   ;;  %s3111_s11 = inlined_call_operand.vmem [shape: bf16[128,32], index: 11, kind: input, shape index: {}]   ;;  %s3112_s12 = inlined_call_operand.vmem [shape: f32[1,32], index: 12, kind: input, shape index: {}]   ;;  %s3113_s13 = inlined_call_operand.vmem [shape: f32[2,17,32], index: 13, kind: output, shape index: {}]  }
   0x1 LB: > { %s2132_s26 = sadd.s32 4294967295, %s2653_s25   ;;  %p2136_p0 = scmp.ge.s32.totalorder %s2653_s25, 1  ;;  %s2653_s25 = sphi %s2739_s25, %s23_s25  }
   0x2   : > { %p387_p1 = scmp.lt.s32.totalorder %s2653_s25, 3 }
   0x4   : > { %p388_p2 = pnand %p2136_p0, %p387_p1 }
   0x5   : > { %p431_p3 = scmp.lt.s32.totalorder (!%p388_p2), %s2132_s26, 1  ;;  %vm445_vm0 = vcmask (!%p388_p2), 261120   ;;  %vm452_vm1 = vcmask (!%p388_p2), 253952   ;;  %v2566_v21 = vld [vmem:[%s3103_s3] sm:$0xff] (!%p388_p2)   ;;  %v2567_v22 = vld [vmem:[%s3103_s3 + $0x8] sm:$0xff] (!%p388_p2)   ;;  %v2655_v49 = vmov (!%p388_p2), 0.0|0.0  }
   0x6   : > { %391 = sbr.rel (%p388_p2) target bundleno = 4020 (0xfb4), region = 72  ;;  %2291 = vmatprep.subr.bf16.mxu0 (!%p388_p2), %v2566_v21  ;;  %v2139_v34 = vld [vmem:[%s3101_s1] ss:$0 sm:$0xff] (!%p388_p2)  ;;  %2471 = vmatprep.subr.bf16.mxu1 (!%p388_p2), %v2655_v49  ;;  %s2656_s24 = smov (!%p388_p2), 96   ;;  %vm2657_vm2 = vmmov (!%p388_p2), 0   ;;  %v2658_v58 = vmov (!%p388_p2), 0.0  }
   0x7   : > { %2292 = vmatpush3.bf16.msra.mxu0 (!%p388_p2), %v2566_v21  ;;  %v2140_v40 = vld [vmem:[%s3102_s2] ss:$0 sm:$0xff] (!%p388_p2)  ;;  %2305 = vmatprep.mubr.msk.f32.mxu1 (!%p388_p2), %vm2657_vm2, %v2658_v58  ;;  %vm598_vm3 = vcmask (!%p388_p2), 64512   ;;  %vm694_vm5 = vcmask (!%p388_p2), 138240   ;;  %vm701_vm6 = vcmask (!%p388_p2), 131072   ;;  %s2659_s28 = smov (!%p388_p2), 64  }
   0x8   : > { %2293 = vmatprep.subr.bf16.mxu0 (!%p388_p2), %v2567_v22  ;;  %v2141_v48 = vld [vmem:[%s3104_s4] ss:$0 sm:$0xff] (!%p388_p2)  ;;  %vm2797_vm4 = vmpackc.low (!%p388_p2), %vm598_vm3, %vm598_vm3  ;;  %s2660_s29 = smov (!%p388_p2), 88   ;;  %s2661_s14 = smov (!%p388_p2), 120   ;;  %vm746_vm7 = vcmask (!%p388_p2), 1040384   ;;  %vm1077_vm8 = vcmask (!%p388_p2), 1043456  }
   0x9   : > { %s2662_s15 = smov (!%p388_p2), 56   ;;  %s2663_s16 = smov (!%p388_p2), 80  }
   0xa   : > { %s2664_s17 = smov (!%p388_p2), 112   ;;  %s2665_s18 = smov (!%p388_p2), 72  }
   0xb   : > { %2294 = vmatpush3.bf16.msra.mxu0 (!%p388_p2), %v2567_v22  ;;  %s2666_s19 = smov (!%p388_p2), 104  }
   0xc   : > { %2475 = vmatprep.subr.bf16.mxu0 (!%p388_p2), %v2655_v49 }
   0xd   : > { %s3117_s26 = smov (!%p431_p3, %s2132_s26), 1 }
   0xe   : > { %s2503_s27 = smul.u32 24, %s3117_s26 }
  0x10   : > { %s2755_s30 = scalar_lea.vmem %s3100_s0, %s2503_s27  ;;  %s440_s20 = scalar_lea.vmem %s3113_s13, %s2503_s27 }
  0x11   : > { %v442_v0 = vld [vmem:[%s2755_s30] sm:$0xff]  ;;  %v444_v1 = vld [vmem:[%s2755_s30 + $0x10] sm:$0x1]  ;;  %v443_v2 = vld [vmem:[%s2755_s30 + $0x8] sm:$0xff] }
  0x12   : > { %v446_v3 = vsel %vm445_vm0, %v442_v0, 0.0  ;;  %v453_v4 = vsel %vm452_vm1, %v444_v1, 0.0  ;;  %v449_v5 = vsel %vm445_vm0, %v443_v2, 0.0 }
  0x13   : > { %447 = vadd.xlane.f32.xlu0 %v446_v3  ;;  %454 = vadd.xlane.f32.xlu1 %v453_v4 }
  0x17   : > { %450 = vadd.xlane.f32.xlu0 %v449_v5 }
  0xa0   : > { %v448_v6 = vpop.xlane.xlu0 %447  ;;  %v455_v7 = vpop.xlane.xlu1 %454 }
  0xa1   : > { %v457_v8 = vmul.f32 0.03125, %v448_v6  ;;  %v459_v9 = vmul.f32 0.03125, %v455_v7 }
  0xa3   : > { %v460_v10 = vsub.f32 %v442_v0, %v457_v8  ;;  %v462_v11 = vsub.f32 %v444_v1, %v459_v9 }
  0xa4   : > { %v451_v12 = vpop.xlane.xlu0 %450 }
  0xa5   : > { %v458_v13 = vmul.f32 0.03125, %v451_v12  ;;  %v463_v14 = vmul.f32 %v460_v10, %v460_v10  ;;  %v465_v15 = vmul.f32 %v462_v11, %v462_v11 }
  0xa7   : > { %v461_v16 = vsub.f32 %v443_v2, %v458_v13  ;;  %v466_v17 = vsel %vm445_vm0, %v463_v14, 0.0  ;;  %v472_v18 = vsel %vm452_vm1, %v465_v15, 0.0 }
  0xa8   : > { %467 = vadd.xlane.f32.xlu1 %v466_v17 }
  0xa9   : > { %v464_v19 = vmul.f32 %v461_v16, %v461_v16 }
  0xab   : > { %v469_v20 = vsel %vm445_vm0, %v464_v19, 0.0 }
  0xac   : > { %473 = vadd.xlane.f32.xlu1 %v472_v18  ;;  %470 = vadd.xlane.f32.xlu0 %v469_v20 }
 0x135   : > { %v468_v23 = vpop.xlane.xlu1 %467 }
 0x136   : > { %v475_v24 = vmul.f32 0.03125, %v468_v23 }
 0x138   : > { %v478_v25 = vadd.f32 1e-05, %v475_v24 }
 0x139   : > { %v474_v26 = vpop.xlane.xlu1 %473  ;;  %v471_v27 = vpop.xlane.xlu0 %470 }
 0x13a   : > { %2578 = vrsqrt.f32 %v478_v25  ;;  %v477_v28 = vmul.f32 0.03125, %v474_v26  ;;  %v476_v29 = vmul.f32 0.03125, %v471_v27 }
 0x13c   : > { %v480_v30 = vadd.f32 1e-05, %v477_v28  ;;  %v479_v31 = vadd.f32 1e-05, %v476_v29 }
 0x13e   : > { %2580 = vrsqrt.f32 %v480_v30 }
 0x13f   : > { %2582 = vrsqrt.f32 %v479_v31 }
 0x144   : > { %v2579_v32 = vpop.eup %2578 }
 0x145   : > { %v484_v33 = vmul.f32 %v2579_v32, %v460_v10 }
 0x147   : > { %v494_v39 = vmul.f32 %v2139_v34, %v484_v33 }
 0x148   : > { %v2581_v35 = vpop.eup %2580 }
 0x149   : > { %v2583_v36 = vpop.eup %2582  ;;  %v486_v37 = vmul.f32 %v2581_v35, %v462_v11  ;;  %v504_v44 = vadd.f32 %v2140_v40, %v494_v39 }
 0x14a   : > { %v485_v38 = vmul.f32 %v2583_v36, %v461_v16 }
 0x14b   : > { %v496_v41 = vmul.f32 %v2139_v34, %v486_v37 }
 0x14c   : > { %v495_v42 = vmul.f32 %v2139_v34, %v485_v38 }
 0x14d   : > { %v506_v43 = vadd.f32 %v2140_v40, %v496_v41 }
 0x14e   : > { %v505_v45 = vadd.f32 %v2140_v40, %v495_v42 }
 0x14f   : > { %v508_v46 = vpack.c.bf16 %v506_v43, %v506_v43 }
 0x150   : > { %v507_v47 = vpack.c.bf16 %v505_v45, %v504_v44 }
 0x152   : > { %2295 = vmatprep.mubr.msk.bf16.mxu0 %vm445_vm0, %v507_v47 }
 0x153   : > { %2296 = vmatmul.mubr.msk.bf16.vlgmr.msra.gmra.mrb[0].mxu0 %vm445_vm0, %v508_v46 }
 0x154   : > { %2320 = vmatprep.mubr.msk.f32.mxu0 %vm2657_vm2, %v2658_v58 }
 0x226   : > { %v2297_v50 = vpop.f32.mrb[0].mxu0 }
 0x227   : > { %v2785_v51 = vadd.f32 %v2297_v50, %v2141_v48  ;;  %v572_v52 = vpop.f32.mrb[1].mxu0 }
 0x228   : > { %v2298_v53 = vpop.f32.mrb[2].mxu0  ;;  %v573_v55 = vadd.f32 %v2141_v48, %v572_v52 }
 0x229   : > { %596 = vrot.lane.b32.xlu1 %v2785_v51, %s2656_s24  ;;  %v575_v54 = vpop.f32.mrb[3].mxu0  ;;  %v2818_v3 = vmul.f32 0.35355338, %v2785_v51 }
 0x22a   : > { %v576_v56 = vadd.f32 %v2141_v48, %v575_v54  ;;  %v2805_v1 = vmul.f32 0.35355338, %v573_v55 }
 0x22c   : > { %v2788_v57 = vpack.i.bf16 %v576_v56, %v573_v55  ;;  %v2811_v2 = vmul.f32 0.35355338, %v576_v56 }
 0x22e   : > { %2527 = vrot.lane.b32.xlu0 %v2788_v57, %s2656_s24  ;;  %s2667_s24 = smov 48  }
 0x29b   : > { %v597_v0 = vpop.permute.xlu1 %596 }
 0x2a0   : > { %v2528_v59 = vpop.permute.xlu0 %2527 }
 0x2a1   : > { %v2530_v60 = vunpack.i.h.bf16 %v2528_v59  ;;  %v2529_v61 = vunpack.i.l.bf16 %v2528_v59 }
 0x2a3   : > { %v2472_v63 = vpack.c.bf16 %v2530_v60, %v2529_v61 }
 0x2a5   : > { %2474 = vmatpush3.bf16.xpose.msk.msra.mxu1 %vm2797_vm4, %v2472_v63 }
 0x2a6   : > { %2303 = vmatprep.subr.mxu1 %v2658_v58 }
 0x2ad   : > { %2304 = vmatpush3.xpose.msk.msra.mxu1 %vm598_vm3, %v597_v0 }
 0x2b0   : > { %2306 = vmatmul.mubr.msk.f32.vlgmr.msra.gmra.mrb[0].mxu1 %vm598_vm3, %v2805_v1 }
 0x2b1   : > { %2308 = vmatprep.mubr.msk.f32.mxu1 %vm2657_vm2, %v2658_v58 }
 0x2b4   : > { %2309 = vmatmul.mubr.msk.f32.gmra.mrb[2].mxu1 %vm598_vm3, %v2811_v2 }
 0x2b5   : > { %2311 = vmatprep.mubr.msk.f32.mxu1 %vm2657_vm2, %v2658_v58 }
 0x2b8   : > { %2312 = vmatmul.mubr.msk.f32.gmra.mrb[4].mxu1 %vm598_vm3, %v2818_v3 }
 0x383   : > { %v680_v4 = vpop.f32.mrb[0].mxu1 }
 0x384   : > { %v2307_v5 = vpop.f32.mrb[1].mxu1  ;;  %v695_v6 = vsel %vm694_vm5, %v680_v4, -inf }
 0x385   : > { %696 = vmax.xlane.f32.xlu1 %v695_v6 }
 0x387   : > { %v685_v7 = vpop.f32.mrb[2].mxu1 }
 0x388   : > { %v2310_v8 = vpop.f32.mrb[3].mxu1  ;;  %v698_v9 = vsel %vm694_vm5, %v685_v7, -inf }
 0x389   : > { %699 = vmax.xlane.f32.xlu0 %v698_v9 }
 0x38b   : > { %v690_v10 = vpop.f32.mrb[4].mxu1 }
 0x38c   : > { %v2313_v11 = vpop.f32.mrb[5].mxu1  ;;  %v702_v12 = vsel %vm701_vm6, %v690_v10, -inf }
 0x38d   : > { %703 = vmax.xlane.f32.xlu0 %v702_v12 }
 0x412   : > { %v697_v13 = vpop.xlane.xlu1 %696 }
 0x413   : > { %v705_v14 = vsub.f32 %v680_v4, %v697_v13 }
 0x415   : > { %v708_v15 = vmul.f32 1.442695, %v705_v14 }
 0x416   : > { %v700_v16 = vpop.xlane.xlu0 %699 }
 0x417   : > { %2584 = vpow2.f32 %v708_v15  ;;  %v706_v17 = vsub.f32 %v685_v7, %v700_v16 }
 0x419   : > { %v710_v18 = vmul.f32 1.442695, %v706_v17 }
 0x41a   : > { %v704_v23 = vpop.xlane.xlu0 %703 }
 0x41b   : > { %2586 = vpow2.f32 %v710_v18  ;;  %v707_v24 = vsub.f32 %v690_v10, %v704_v23 }
 0x41d   : > { %v712_v25 = vmul.f32 1.442695, %v707_v24 }
 0x41f   : > { %2588 = vpow2.f32 %v712_v25 }
 0x421   : > { %v2585_v19 = vpop.eup %2584 }
 0x422   : > { %v714_v20 = vsel %vm694_vm5, %v2585_v19, 0.0 }
 0x423   : > { %715 = vadd.xlane.f32.xlu1 %v714_v20 }
 0x425   : > { %v2587_v21 = vpop.eup %2586 }
 0x426   : > { %v717_v22 = vsel %vm694_vm5, %v2587_v21, 0.0 }
 0x427   : > { %718 = vadd.xlane.f32.xlu0 %v717_v22 }
 0x429   : > { %v2589_v26 = vpop.eup %2588 }
 0x42a   : > { %v720_v27 = vsel %vm701_vm6, %v2589_v26, 0.0 }
 0x434   : > { %733 = vrot.lane.b32.xlu1 %v2785_v51, %s2659_s28 }
 0x438   : > { %2537 = vrot.lane.b32.xlu1 %v2788_v57, %s2660_s29 }
 0x43c   : > { %842 = vrot.lane.b32.xlu1 %v2785_v51, %s2660_s29 }
 0x43d   : > { %2532 = vrot.lane.b32.xlu0 %v2788_v57, %s2659_s28  ;;  %s2668_s28 = smov 40  }
 0x441   : > { %832 = vrot.lane.b32.xlu0 %v2805_v1, %s2661_s14 }
 0x445   : > { %836 = vrot.lane.b32.xlu0 %v2818_v3, %s2661_s14 }
 0x460   : > { %721 = vadd.xlane.f32.xlu1 %v720_v27 }
 0x471   : > { %834 = vrot.lane.b32.xlu1 %v2811_v2, %s2661_s14 }
 0x4b0   : > { %v716_v28 = vpop.xlane.xlu1 %715 }
 0x4b1   : > { %2590 = vrcp.f32 %v716_v28 }
 0x4b4   : > { %v719_v29 = vpop.xlane.xlu0 %718  ;;  %v734_v31 = vpop.permute.xlu1 %733 }
 0x4b5   : > { %2592 = vrcp.f32 %v719_v29 }
 0x4b8   : > { %v2533_v30 = vpop.permute.xlu0 %2532  ;;  %v2538_v36 = vpop.permute.xlu1 %2537 }
 0x4b9   : > { %v2535_v32 = vunpack.i.h.bf16 %v2533_v30  ;;  %v2534_v33 = vunpack.i.l.bf16 %v2533_v30  ;;  %v2540_v39 = vunpack.i.h.bf16 %v2538_v36  ;;  %v2539_v40 = vunpack.i.l.bf16 %v2538_v36 }
 0x4bb   : > { %v2476_v34 = vpack.c.bf16 %v2535_v32, %v2534_v33  ;;  %v2591_v35 = vpop.eup %2590  ;;  %v2479_v42 = vpack.c.bf16 %v2540_v39, %v2539_v40  ;;  %v1070_v39 = vld [vmem:[%s3105_s5 + $0x4] sm:$0xf] }
 0x4bc   : > { %v726_v37 = vmul.f32 %v2591_v35, %v2585_v19  ;;  %v843_v43 = vpop.permute.xlu1 %842  ;;  %v833_v47 = vpop.permute.xlu0 %832  ;;  %2499 = vmatprep.subr.msk.bf16.mxu1 %vm1077_vm8, %v1070_v39  ;;  %v1079_v40 = vsel %vm1077_vm8, %v1070_v39, 0 }
 0x4bd   : > { %2477 = vmatpush3.bf16.msra.mxu0 %v2476_v34  ;;  %2360 = vmatpush3.bf16.msra.mxu1 %v1079_v40 }
 0x4be   : > { %2318 = vmatprep.subr.mxu0 %v2658_v58  ;;  %2485 = vmatprep.subr.bf16.mxu1 %v2655_v49 }
 0x4bf   : > { %v2593_v38 = vpop.eup %2592 }
 0x4c0   : > { %v727_v41 = vmul.f32 %v2593_v38, %v2587_v21  ;;  %v837_v50 = vpop.permute.xlu0 %836 }
 0x4c1   : > { %2319 = vmatpush3.msk.msra.mxu0 %vm746_vm7, %v734_v31 }
 0x4c2   : > { %2321 = vmatmul.mubr.msk.f32.vlgmr.msra.gmra.mrb[4].mxu0 %vm694_vm5, %v726_v37  ;;  %2478 = vmatprep.subr.bf16.mxu0 %v2655_v49 }
 0x4c3   : > { %2323 = vmatprep.mubr.msk.f32.mxu0 %vm2657_vm2, %v2658_v58 }
 0x4c6   : > { %2324 = vmatmul.mubr.msk.f32.gmra.mrb[6].mxu0 %vm694_vm5, %v727_v41 }
 0x4c7   : > { %2326 = vmatprep.mubr.msk.f32.mxu0 %vm2657_vm2, %v2658_v58 }
 0x4c8   : > { %2481 = vmatpush3.bf16.xpose.msk.msra.mxu0 %vm2797_vm4, %v2479_v42 }
 0x4c9   : > { %2333 = vmatprep.subr.mxu0 %v2658_v58 }
 0x4d0   : > { %2334 = vmatpush3.xpose.msk.msra.mxu0 %vm598_vm3, %v843_v43 }
 0x4d1   : > { %2482 = vmatprep.subr.bf16.mxu0 %v2655_v49 }
 0x4ed   : > { %v722_v44 = vpop.xlane.xlu1 %721 }
 0x4ee   : > { %2594 = vrcp.f32 %v722_v44 }
 0x4f1   : > { %v835_v48 = vpop.permute.xlu1 %834 }
 0x4f8   : > { %v2595_v45 = vpop.eup %2594 }
 0x4f9   : > { %v728_v46 = vmul.f32 %v2595_v45, %v2589_v26 }
 0x4fb   : > { %2327 = vmatmul.mubr.msk.f32.gmra.mrb[8].mxu0 %vm694_vm5, %v728_v46 }
 0x4fc   : > { %2335 = vmatprep.mubr.msk.f32.mxu0 %vm2657_vm2, %v2658_v58 }
 0x4ff   : > { %2336 = vmatmul.mubr.msk.f32.vlgmr.msra.gmra.mrb[10].mxu0 %vm598_vm3, %v833_v47 }
 0x500   : > { %2338 = vmatprep.mubr.msk.f32.mxu0 %vm2657_vm2, %v2658_v58 }
 0x503   : > { %2339 = vmatmul.mubr.msk.f32.gmra.mrb[12].mxu0 %vm598_vm3, %v835_v48 }
 0x504   : > { %2341 = vmatprep.mubr.msk.f32.mxu0 %vm2657_vm2, %v2658_v58 }
 0x507   : > { %2342 = vmatmul.mubr.msk.f32.gmra.mrb[14].mxu0 %vm598_vm3, %v837_v50 }
 0x508   : > { %2350 = vmatprep.mubr.msk.f32.mxu0 %vm2657_vm2, %v2658_v58 }
 0x595   : > { %v2861_v52 = vpop.f32.mrb[4].mxu0 }
 0x596   : > { %v2322_v53 = vpop.f32.mrb[5].mxu0 }
 0x599   : > { %v2863_v54 = vpop.f32.mrb[6].mxu0 }
 0x59a   : > { %v829_v55 = vpack.c.bf16 %v2863_v54, %v2861_v52  ;;  %v2325_v56 = vpop.f32.mrb[7].mxu0 }
 0x5ce   : > { %v2867_v59 = vpop.f32.mrb[8].mxu0 }
 0x5cf   : > { %v2328_v60 = vpop.f32.mrb[9].mxu0  ;;  %v830_v38 = vpack.c.bf16 %v2867_v59, %v2867_v59 }
 0x5d2   : > { %v922_v61 = vpop.f32.mrb[10].mxu0 }
 0x5d3   : > { %v2337_v63 = vpop.f32.mrb[11].mxu0  ;;  %v936_v0 = vsel %vm694_vm5, %v922_v61, -inf }
 0x5d4   : > { %937 = vmax.xlane.f32.xlu1 %v936_v0 }
 0x5d6   : > { %v927_v4 = vpop.f32.mrb[12].mxu0 }
 0x5d7   : > { %v2340_v5 = vpop.f32.mrb[13].mxu0  ;;  %v939_v6 = vsel %vm694_vm5, %v927_v4, -inf }
 0x5d8   : > { %940 = vmax.xlane.f32.xlu0 %v939_v6 }
 0x5da   : > { %v932_v7 = vpop.f32.mrb[14].mxu0 }
 0x5db   : > { %v2343_v8 = vpop.f32.mrb[15].mxu0  ;;  %v942_v9 = vsel %vm701_vm6, %v932_v7, -inf }
 0x5dc   : > { %943 = vmax.xlane.f32.xlu0 %v942_v9 }
 0x661   : > { %v938_v10 = vpop.xlane.xlu1 %937 }
 0x662   : > { %v945_v11 = vsub.f32 %v922_v61, %v938_v10 }
 0x664   : > { %v948_v12 = vmul.f32 1.442695, %v945_v11 }
 0x665   : > { %v941_v13 = vpop.xlane.xlu0 %940 }
 0x666   : > { %2596 = vpow2.f32 %v948_v12  ;;  %v946_v14 = vsub.f32 %v927_v4, %v941_v13 }
 0x668   : > { %v950_v15 = vmul.f32 1.442695, %v946_v14 }
 0x669   : > { %v944_v16 = vpop.xlane.xlu0 %943 }
 0x66a   : > { %2598 = vpow2.f32 %v950_v15  ;;  %v947_v17 = vsub.f32 %v932_v7, %v944_v16 }
 0x66c   : > { %v952_v18 = vmul.f32 1.442695, %v947_v17 }
 0x66e   : > { %2600 = vpow2.f32 %v952_v18 }
 0x670   : > { %v2597_v19 = vpop.eup %2596 }
 0x671   : > { %v954_v20 = vsel %vm694_vm5, %v2597_v19, 0.0 }
 0x672   : > { %955 = vadd.xlane.f32.xlu0 %v954_v20 }
 0x674   : > { %v2599_v21 = vpop.eup %2598 }
 0x675   : > { %v957_v22 = vsel %vm694_vm5, %v2599_v21, 0.0 }
 0x676   : > { %958 = vadd.xlane.f32.xlu1 %v957_v22 }
 0x678   : > { %v2601_v23 = vpop.eup %2600 }
 0x679   : > { %v960_v24 = vsel %vm701_vm6, %v2601_v23, 0.0 }
 0x67a   : > { %961 = vadd.xlane.f32.xlu0 %v960_v24 }
 0x687   : > { %2542 = vrot.lane.b32.xlu1 %v2788_v57, %s2662_s15 }
 0x68b   : > { %2547 = vrot.lane.b32.xlu1 %v2788_v57, %s2663_s16 }
 0x68f   : > { %1196 = vrot.lane.b32.xlu1 %v2785_v51, %s2663_s16 }
 0x690   : > { %973 = vrot.lane.b32.xlu0 %v2785_v51, %s2662_s15 }
 0x693   : > { %1186 = vrot.lane.b32.xlu1 %v2805_v1, %s2664_s17 }
 0x694   : > { %1188 = vrot.lane.b32.xlu0 %v2811_v2, %s2664_s17 }
 0x697   : > { %1190 = vrot.lane.b32.xlu1 %v2818_v3, %s2664_s17 }
 0x698   : > { %2552 = vrot.lane.b32.xlu0 %v2788_v57, %s2665_s18 }
 0x69b   : > { %1495 = vrot.lane.b32.xlu1 %v2785_v51, %s2665_s18 }
 0x69c   : > { %1485 = vrot.lane.b32.xlu0 %v2805_v1, %s2666_s19  ;;  %v831_v1 = vld [vmem:[%s3105_s5] sm:$0xf] }
 0x69d   : > { %v1136_v33 = vsel %vm1077_vm8, %v831_v1, 0 }
 0x69f   : > { %1487 = vrot.lane.b32.xlu1 %v2811_v2, %s2666_s19 }
 0x6a0   : > { %1489 = vrot.lane.b32.xlu0 %v2818_v3, %s2666_s19 }
 0x6ff   : > { %v956_v25 = vpop.xlane.xlu0 %955 }
 0x700   : > { %2602 = vrcp.f32 %v956_v25 }
 0x703   : > { %v959_v26 = vpop.xlane.xlu1 %958 }
 0x704   : > { %2604 = vrcp.f32 %v959_v26 }
 0x707   : > { %v2543_v27 = vpop.permute.xlu1 %2542  ;;  %v962_v28 = vpop.xlane.xlu0 %961 }
 0x708   : > { %v2545_v29 = vunpack.i.h.bf16 %v2543_v27  ;;  %v2544_v30 = vunpack.i.l.bf16 %v2543_v27  ;;  %2606 = vrcp.f32 %v962_v28 }
 0x70a   : > { %v2483_v31 = vpack.c.bf16 %v2545_v29, %v2544_v30  ;;  %v2603_v32 = vpop.eup %2602 }
 0x70b   : > { %v966_v2 = vmul.f32 %v2603_v32, %v2597_v19  ;;  %v974_v3 = vpop.permute.xlu0 %973  ;;  %v2548_v43 = vpop.permute.xlu1 %2547 }
 0x70c   : > { %2484 = vmatpush3.bf16.msra.mxu0 %v2483_v31  ;;  %v2550_v47 = vunpack.i.h.bf16 %v2548_v43  ;;  %v2549_v48 = vunpack.i.l.bf16 %v2548_v43 }
 0x70d   : > { %2348 = vmatprep.subr.mxu0 %v2658_v58 }
 0x70e   : > { %v2605_v34 = vpop.eup %2604 }
 0x70f   : > { %v967_v35 = vmul.f32 %v2605_v34, %v2599_v21  ;;  %v1189_v52 = vpop.permute.xlu0 %1188  ;;  %v1197_v59 = vpop.permute.xlu1 %1196 }
 0x710   : > { %2349 = vmatpush3.msk.msra.mxu0 %vm746_vm7, %v974_v3 }
 0x711   : > { %2351 = vmatmul.mubr.msk.f32.vlgmr.msra.gmra.mrb[16].mxu0 %vm694_vm5, %v966_v2  ;;  %2500 = vmatprep.subr.msk.bf16.mxu0 %vm1077_vm8, %v831_v1 }
 0x712   : > { %2353 = vmatprep.mubr.msk.f32.mxu0 %vm2657_vm2, %v2658_v58  ;;  %2366 = vmatpush3.bf16.msra.mxu0 %v1136_v33  ;;  %v2607_v36 = vpop.eup %2606 }
 0x713   : > { %2489 = vmatprep.subr.bf16.mxu0 %v2655_v49  ;;  %v968_v37 = vmul.f32 %v2607_v36, %v2601_v23  ;;  %v2553_v63 = vpop.permute.xlu0 %2552  ;;  %v1187_v6 = vpop.permute.xlu1 %1186 }
 0x714   : > { %v2555_v4 = vunpack.i.h.bf16 %v2553_v63  ;;  %v2554_v5 = vunpack.i.l.bf16 %v2553_v63 }
 0x715   : > { %2354 = vmatmul.mubr.msk.f32.gmra.mrb[18].mxu0 %vm694_vm5, %v967_v35 }
 0x716   : > { %2356 = vmatprep.mubr.msk.f32.mxu0 %vm2657_vm2, %v2658_v58  ;;  %v2493_v7 = vpack.c.bf16 %v2555_v4, %v2554_v5 }
 0x717   : > { %v1191_v8 = vpop.permute.xlu1 %1190  ;;  %v1486_v62 = vpop.permute.xlu0 %1485 }
 0x719   : > { %2357 = vmatmul.mubr.msk.f32.gmra.mrb[20].mxu0 %vm694_vm5, %v968_v37 }
 0x71a   : > { %2367 = vmatprep.mubr.msk.bf16.mxu0 %vm598_vm3, %v829_v55  ;;  %v2486_v55 = vpack.c.bf16 %v2550_v47, %v2549_v48 }
 0x71b   : > { %v1496_v9 = vpop.permute.xlu1 %1495  ;;  %v1490_v11 = vpop.permute.xlu0 %1489 }
 0x71d   : > { %2368 = vmatmul.mubr.msk.bf16.vlgmr.msra.gmra.mrb[24].mxu0 %vm598_vm3, %v830_v38 }
 0x71e   : > { %2392 = vmatprep.mubr.msk.f32.mxu0 %vm2657_vm2, %v2658_v58 }
 0x71f   : > { %v1488_v10 = vpop.permute.xlu1 %1487 }
 0x7e4   : > { %v1054_v41 = vpop.f32.mrb[16].mxu0 }
 0x7e5   : > { %v2352_v42 = vpop.f32.mrb[17].mxu0 }
 0x7e8   : > { %v1059_v44 = vpop.f32.mrb[18].mxu0 }
 0x7e9   : > { %v1068_v45 = vpack.c.bf16 %v1059_v44, %v1054_v41  ;;  %v2355_v46 = vpop.f32.mrb[19].mxu0 }
 0x7eb   : > { %2361 = vmatprep.mubr.msk.bf16.mxu1 %vm598_vm3, %v1068_v45 }
 0x7ec   : > { %v1064_v50 = vpop.f32.mrb[20].mxu0 }
 0x7ed   : > { %v1069_v53 = vpack.c.bf16 %v1064_v50, %v1064_v50  ;;  %v2358_v54 = vpop.f32.mrb[21].mxu0 }
 0x7ef   : > { %2362 = vmatmul.mubr.msk.bf16.vlgmr.msra.gmra.mrb[8].mxu1 %vm598_vm3, %v1069_v53 }
 0x7f0   : > { %2488 = vmatpush3.bf16.xpose.msk.msra.mxu1 %vm2797_vm4, %v2486_v55  ;;  %v2369_v56 = vpop.f32.mrb[24].mxu0  ;;  %2377 = vmatprep.mubr.msk.f32.mxu1 %vm2657_vm2, %v2658_v58 }
 0x7f1   : > { %v1172_v60 = vpop.f32.mrb[25].mxu0  ;;  %2375 = vmatprep.subr.mxu1 %v2658_v58 }
 0x7f2   : > { %v2370_v61 = vpop.f32.mrb[26].mxu0 }
 0x7f3   : > { %v1175_v0 = vpop.f32.mrb[27].mxu0 }
 0x7f8   : > { %2376 = vmatpush3.xpose.msk.msra.mxu1 %vm598_vm3, %v1197_v59 }
 0x7f9   : > { %2492 = vmatprep.subr.bf16.mxu1 %v2655_v49 }
 0x7fb   : > { %2378 = vmatmul.mubr.msk.f32.vlgmr.msra.gmra.mrb[6].mxu1 %vm598_vm3, %v1187_v6 }
 0x7fc   : > { %2495 = vmatpush3.bf16.xpose.msk.msra.mxu1 %vm2797_vm4, %v2493_v7  ;;  %2380 = vmatprep.mubr.msk.f32.mxu1 %vm2657_vm2, %v2658_v58 }
 0x7fd   : > { %2411 = vmatprep.subr.mxu1 %v2658_v58 }
 0x7ff   : > { %2381 = vmatmul.mubr.msk.f32.gmra.mrb[12].mxu1 %vm598_vm3, %v1189_v52 }
 0x800   : > { %2383 = vmatprep.mubr.msk.f32.mxu1 %vm2657_vm2, %v2658_v58 }
 0x803   : > { %2384 = vmatmul.mubr.msk.f32.gmra.mrb[14].mxu1 %vm598_vm3, %v1191_v8 }
 0x804   : > { %2412 = vmatpush3.xpose.msk.msra.mxu1 %vm598_vm3, %v1496_v9  ;;  %2413 = vmatprep.mubr.msk.f32.mxu1 %vm2657_vm2, %v2658_v58 }
 0x807   : > { %2414 = vmatmul.mubr.msk.f32.vlgmr.msra.gmra.mrb[16].mxu1 %vm598_vm3, %v1486_v62 }
 0x808   : > { %2416 = vmatprep.mubr.msk.f32.mxu1 %vm2657_vm2, %v2658_v58 }
 0x80b   : > { %2417 = vmatmul.mubr.msk.f32.gmra.mrb[18].mxu1 %vm598_vm3, %v1488_v10 }
 0x80c   : > { %2419 = vmatprep.mubr.msk.f32.mxu1 %vm2657_vm2, %v2658_v58 }
 0x80f   : > { %2420 = vmatmul.mubr.msk.f32.gmra.mrb[20].mxu1 %vm598_vm3, %v1490_v11 }
 0x8c2   : > { %v2363_v12 = vpop.f32.mrb[8].mxu1 }
 0x8c3   : > { %v2946_v13 = vadd.f32 %v2369_v56, %v2363_v12  ;;  %v1115_v14 = vpop.f32.mrb[9].mxu1 }
 0x8c4   : > { %v2948_v15 = vadd.f32 %v1172_v60, %v1115_v14  ;;  %v2364_v16 = vpop.f32.mrb[10].mxu1 }
 0x8c5   : > { %v1118_v17 = vpop.f32.mrb[11].mxu1 }
 0x8c6   : > { %v2950_v18 = vadd.f32 %v1175_v0, %v1118_v17 }
 0x8ce   : > { %v1276_v19 = vpop.f32.mrb[6].mxu1 }
 0x8cf   : > { %v2379_v20 = vpop.f32.mrb[7].mxu1  ;;  %v1290_v21 = vsel %vm694_vm5, %v1276_v19, -inf }
 0x8d0   : > { %1291 = vmax.xlane.f32.xlu1 %v1290_v21 }
 0x8d2   : > { %v1281_v22 = vpop.f32.mrb[12].mxu1 }
 0x8d3   : > { %v2382_v23 = vpop.f32.mrb[13].mxu1  ;;  %v1293_v24 = vsel %vm694_vm5, %v1281_v22, -inf }
 0x8d4   : > { %1294 = vmax.xlane.f32.xlu0 %v1293_v24  ;;  %v1424_v24 = vld [vmem:[%s3105_s5 + $0x8] sm:$0xf] }
 0x8d6   : > { %v1286_v25 = vpop.f32.mrb[14].mxu1 }
 0x8d7   : > { %v2385_v26 = vpop.f32.mrb[15].mxu1  ;;  %v1296_v27 = vsel %vm701_vm6, %v1286_v25, -inf }
 0x8d8   : > { %1297 = vmax.xlane.f32.xlu0 %v1296_v27 }
 0x8da   : > { %v2955_v28 = vpop.f32.mrb[16].mxu1 }
 0x8db   : > { %v2415_v29 = vpop.f32.mrb[17].mxu1  ;;  %v1589_v46 = vsel %vm694_vm5, %v2955_v28, -inf }
 0x8de   : > { %v2957_v30 = vpop.f32.mrb[18].mxu1 }
 0x8df   : > { %v2418_v31 = vpop.f32.mrb[19].mxu1  ;;  %v1592_v47 = vsel %vm694_vm5, %v2957_v30, -inf }
 0x8e2   : > { %v2959_v32 = vpop.f32.mrb[20].mxu1 }
 0x8e3   : > { %v2421_v1 = vpop.f32.mrb[21].mxu1  ;;  %v1595_v48 = vsel %vm701_vm6, %v2959_v32, -inf }
 0x95d   : > { %v1292_v2 = vpop.xlane.xlu1 %1291 }
 0x95e   : > { %v1299_v3 = vsub.f32 %v1276_v19, %v1292_v2 }
 0x960   : > { %v1302_v33 = vmul.f32 1.442695, %v1299_v3 }
 0x961   : > { %v1295_v34 = vpop.xlane.xlu0 %1294 }
 0x962   : > { %2608 = vpow2.f32 %v1302_v33  ;;  %v1300_v35 = vsub.f32 %v1281_v22, %v1295_v34 }
 0x964   : > { %v1304_v36 = vmul.f32 1.442695, %v1300_v35 }
 0x965   : > { %v1298_v37 = vpop.xlane.xlu0 %1297 }
 0x966   : > { %2610 = vpow2.f32 %v1304_v36  ;;  %v1301_v38 = vsub.f32 %v1286_v25, %v1298_v37  ;;  %v1432_v25 = vsel %vm1077_vm8, %v1424_v24, 0 }
 0x968   : > { %v1306_v39 = vmul.f32 1.442695, %v1301_v38 }
 0x96a   : > { %2612 = vpow2.f32 %v1306_v39 }
 0x96c   : > { %v2609_v40 = vpop.eup %2608 }
 0x96d   : > { %v1308_v41 = vsel %vm694_vm5, %v2609_v40, 0.0 }
 0x96e   : > { %1309 = vadd.xlane.f32.xlu0 %v1308_v41 }
 0x970   : > { %v2611_v42 = vpop.eup %2610 }
 0x971   : > { %v1311_v43 = vsel %vm694_vm5, %v2611_v42, 0.0 }
 0x972   : > { %1312 = vadd.xlane.f32.xlu1 %v1311_v43 }
 0x974   : > { %v2613_v44 = vpop.eup %2612 }
 0x975   : > { %v1314_v45 = vsel %vm701_vm6, %v2613_v44, 0.0 }
 0x976   : > { %1315 = vadd.xlane.f32.xlu0 %v1314_v45 }
 0x983   : > { %2557 = vrot.lane.b32.xlu1 %v2788_v57, %s2667_s24 }
 0x98c   : > { %1327 = vrot.lane.b32.xlu0 %v2785_v51, %s2667_s24 }
 0x9a7   : > { %1590 = vmax.xlane.f32.xlu1 %v1589_v46 }
 0x9ab   : > { %1593 = vmax.xlane.f32.xlu0 %v1592_v47  ;;  %1596 = vmax.xlane.f32.xlu1 %v1595_v48 }
 0x9fb   : > { %v1310_v50 = vpop.xlane.xlu0 %1309 }
 0x9fc   : > { %2614 = vrcp.f32 %v1310_v50 }
 0x9ff   : > { %v1313_v52 = vpop.xlane.xlu1 %1312 }
 0xa00   : > { %2616 = vrcp.f32 %v1313_v52 }
 0xa03   : > { %v2558_v53 = vpop.permute.xlu1 %2557  ;;  %v1316_v54 = vpop.xlane.xlu0 %1315 }
 0xa04   : > { %v2560_v55 = vunpack.i.h.bf16 %v2558_v53  ;;  %v2559_v56 = vunpack.i.l.bf16 %v2558_v53  ;;  %2618 = vrcp.f32 %v1316_v54 }
 0xa06   : > { %v2490_v59 = vpack.c.bf16 %v2560_v55, %v2559_v56  ;;  %v2615_v60 = vpop.eup %2614 }
 0xa07   : > { %v1320_v61 = vmul.f32 %v2615_v60, %v2609_v40  ;;  %v1328_v63 = vpop.permute.xlu0 %1327 }
 0xa08   : > { %2491 = vmatpush3.bf16.msra.mxu0 %v2490_v59 }
 0xa09   : > { %2390 = vmatprep.subr.mxu0 %v2658_v58 }
 0xa0a   : > { %v2617_v0 = vpop.eup %2616 }
 0xa0b   : > { %v1321_v4 = vmul.f32 %v2617_v0, %v2611_v42  ;;  %v1723_v42 = vld [vmem:[%s3105_s5 + $0xc] sm:$0xf] }
 0xa0c   : > { %2391 = vmatpush3.msk.msra.mxu0 %vm746_vm7, %v1328_v63  ;;  %2502 = vmatprep.subr.msk.bf16.mxu1 %vm1077_vm8, %v1723_v42  ;;  %v1731_v43 = vsel %vm1077_vm8, %v1723_v42, 0 }
 0xa0d   : > { %2393 = vmatmul.mubr.msk.f32.vlgmr.msra.gmra.mrb[22].mxu0 %vm694_vm5, %v1320_v61  ;;  %2501 = vmatprep.subr.msk.bf16.mxu0 %vm1077_vm8, %v1424_v24 }
 0xa0e   : > { %2395 = vmatprep.mubr.msk.f32.mxu0 %vm2657_vm2, %v2658_v58  ;;  %v2619_v5 = vpop.eup %2618  ;;  %2402 = vmatpush3.bf16.msra.mxu0 %v1432_v25 }
 0xa0f   : > { %v1322_v6 = vmul.f32 %v2619_v5, %v2613_v44  ;;  %2496 = vmatprep.subr.bf16.mxu0 %v2655_v49  ;;  %2438 = vmatpush3.bf16.msra.mxu1 %v1731_v43 }
 0xa11   : > { %2396 = vmatmul.mubr.msk.f32.gmra.mrb[28].mxu0 %vm694_vm5, %v1321_v4  ;;  %v2194_v4 = vld [vmem:[%s3106_s6] ss:$0 sm:$0xff] }
 0xa12   : > { %2398 = vmatprep.mubr.msk.f32.mxu0 %vm2657_vm2, %v2658_v58 }
 0xa15   : > { %2399 = vmatmul.mubr.msk.f32.gmra.mrb[30].mxu0 %vm694_vm5, %v1322_v6  ;;  %v2644_v6 = vld [vmem:[%s2755_s30 + $0x10] sm:$0x1] }
 0xa34   : > { %v1591_v7 = vpop.xlane.xlu1 %1590 }
 0xa35   : > { %v1598_v8 = vsub.f32 %v2955_v28, %v1591_v7 }
 0xa37   : > { %v1601_v9 = vmul.f32 1.442695, %v1598_v8  ;;  %v2645_v8 = vld [vmem:[%s2755_s30] sm:$0xff] }
 0xa38   : > { %v1594_v62 = vpop.xlane.xlu0 %1593  ;;  %v1597_v10 = vpop.xlane.xlu1 %1596 }
 0xa39   : > { %2620 = vpow2.f32 %v1601_v9  ;;  %v1599_v11 = vsub.f32 %v2957_v30, %v1594_v62  ;;  %v1600_v12 = vsub.f32 %v2959_v32, %v1597_v10 }
 0xa3b   : > { %v1603_v14 = vmul.f32 1.442695, %v1599_v11  ;;  %v1605_v16 = vmul.f32 1.442695, %v1600_v12  ;;  %v2646_v11 = vld [vmem:[%s2755_s30 + $0x8] sm:$0xff] }
 0xa3d   : > { %2622 = vpow2.f32 %v1603_v14 }
 0xa3e   : > { %2624 = vpow2.f32 %v1605_v16 }
 0xa43   : > { %v2621_v17 = vpop.eup %2620 }
 0xa44   : > { %v1607_v19 = vsel %vm694_vm5, %v2621_v17, 0.0 }
 0xa45   : > { %1608 = vadd.xlane.f32.xlu0 %v1607_v19 }
 0xa47   : > { %v2623_v20 = vpop.eup %2622 }
 0xa48   : > { %v2625_v21 = vpop.eup %2624  ;;  %v1610_v22 = vsel %vm694_vm5, %v2623_v20, 0.0 }
 0xa49   : > { %1611 = vadd.xlane.f32.xlu1 %v1610_v22  ;;  %v1613_v23 = vsel %vm701_vm6, %v2625_v21, 0.0 }
 0xa4a   : > { %1614 = vadd.xlane.f32.xlu0 %v1613_v23 }
 0xa5a   : > { %2562 = vrot.lane.b32.xlu1 %v2788_v57, %s2668_s28 }
 0xa60   : > { %1626 = vrot.lane.b32.xlu0 %v2785_v51, %s2668_s28 }
 0xad2   : > { %v1609_v28 = vpop.xlane.xlu0 %1608 }
 0xad3   : > { %2626 = vrcp.f32 %v1609_v28 }
 0xad6   : > { %v1612_v26 = vpop.xlane.xlu1 %1611 }
 0xad7   : > { %2628 = vrcp.f32 %v1612_v26  ;;  %v1615_v3 = vpop.xlane.xlu0 %1614 }
 0xad8   : > { %2630 = vrcp.f32 %v1615_v3  ;;  %v2569_v3 = vld [vmem:[%s3109_s9 + $0x8] sm:$0xff]  }
 0xada   : > { %v2563_v30 = vpop.permute.xlu1 %2562 }
 0xadb   : > { %v2565_v32 = vunpack.i.h.bf16 %v2563_v30  ;;  %v2564_v1 = vunpack.i.l.bf16 %v2563_v30  ;;  %v1627_v36 = vpop.permute.xlu0 %1626 }
 0xadd   : > { %v2497_v35 = vpack.c.bf16 %v2565_v32, %v2564_v1  ;;  %v2627_v49 = vpop.eup %2626 }
 0xade   : > { %v1619_v37 = vmul.f32 %v2627_v49, %v2621_v17 }
 0xae0   : > { %v1408_v27 = vpop.f32.mrb[22].mxu0 }
 0xae1   : > { %v2394_v29 = vpop.f32.mrb[23].mxu0  ;;  %v2629_v38 = vpop.eup %2628 }
 0xae2   : > { %v1620_v39 = vmul.f32 %v2629_v38, %v2623_v20  ;;  %v2631_v40 = vpop.eup %2630 }
 0xae3   : > { %v1621_v41 = vmul.f32 %v2631_v40, %v2625_v21 }
 0xae4   : > { %v1413_v57 = vpop.f32.mrb[28].mxu0 }
 0xae5   : > { %v1422_v31 = vpack.c.bf16 %v1413_v57, %v1408_v27  ;;  %v2397_v51 = vpop.f32.mrb[29].mxu0 }
 0xae7   : > { %2403 = vmatprep.mubr.msk.bf16.mxu0 %vm598_vm3, %v1422_v31 }
 0xae8   : > { %v1418_v2 = vpop.f32.mrb[30].mxu0 }
 0xae9   : > { %v1423_v33 = vpack.c.bf16 %v1418_v2, %v1418_v2  ;;  %v2400_v34 = vpop.f32.mrb[31].mxu0  ;;  %v2568_v2 = vld [vmem:[%s3109_s9] sm:$0xff]  }
 0xaea   : > { %v2571_v34 = vld [vmem:[%s3111_s11 + $0x8] sm:$0xff]  }
 0xaeb   : > { %2404 = vmatmul.mubr.msk.bf16.vlgmr.msra.gmra.mrb[32].mxu0 %vm598_vm3, %v1423_v33  ;;  %v2570_v33 = vld [vmem:[%s3111_s11] sm:$0xff]  }
 0xaec   : > { %2498 = vmatpush3.bf16.msra.mxu0 %v2497_v35  ;;  %2428 = vmatprep.mubr.msk.f32.mxu0 %vm2657_vm2, %v2658_v58 }
 0xaed   : > { %2426 = vmatprep.subr.mxu0 %v2658_v58  ;;  %2451 = vmatprep.subr.bf16.mxu1 %v2570_v33 }
 0xaf0   : > { %2427 = vmatpush3.msk.msra.mxu0 %vm746_vm7, %v1627_v36 }
 0xaf1   : > { %2443 = vmatprep.subr.bf16.mxu0 %v2568_v2 }
 0xaf3   : > { %2429 = vmatmul.mubr.msk.f32.vlgmr.msra.gmra.mrb[36].mxu0 %vm694_vm5, %v1619_v37 }
 0xaf4   : > { %2431 = vmatprep.mubr.msk.f32.mxu0 %vm2657_vm2, %v2658_v58  ;;  %2444 = vmatpush3.bf16.msra.mxu0 %v2568_v2 }
 0xaf5   : > { %2445 = vmatprep.subr.bf16.mxu0 %v2569_v3 }
 0xaf7   : > { %2432 = vmatmul.mubr.msk.f32.gmra.mrb[38].mxu0 %vm694_vm5, %v1620_v39 }
 0xaf8   : > { %2434 = vmatprep.mubr.msk.f32.mxu0 %vm2657_vm2, %v2658_v58  ;;  %2446 = vmatpush3.bf16.msra.mxu0 %v2569_v3 }
 0xafb   : > { %2435 = vmatmul.mubr.msk.f32.gmra.mrb[40].mxu0 %vm694_vm5, %v1621_v41 }
 0xbbe   : > { %v2405_v44 = vpop.f32.mrb[32].mxu0 }
 0xbbf   : > { %v1484_v45 = vadd.f32 %v2405_v44, %v2946_v13  ;;  %v1468_v46 = vpop.f32.mrb[33].mxu0  ;;  %v2195_v44 = vld [vmem:[%s3107_s7] ss:$0 sm:$0xff] }
 0xbc0   : > { %v1482_v47 = vadd.f32 %v1468_v46, %v2948_v15  ;;  %v2406_v48 = vpop.f32.mrb[34].mxu0 }
 0xbc1   : > { %v1471_v58 = vpop.f32.mrb[35].mxu0 }
 0xbc2   : > { %v1483_v50 = vadd.f32 %v1471_v58, %v2950_v18 }
 0xbc6   : > { %v1707_v52 = vpop.f32.mrb[36].mxu0 }
 0xbc7   : > { %v2430_v53 = vpop.f32.mrb[37].mxu0 }
 0xbca   : > { %v1712_v54 = vpop.f32.mrb[38].mxu0 }
 0xbcb   : > { %v1721_v55 = vpack.c.bf16 %v1712_v54, %v1707_v52  ;;  %v2433_v56 = vpop.f32.mrb[39].mxu0 }
 0xbcd   : > { %2439 = vmatprep.mubr.msk.bf16.mxu1 %vm598_vm3, %v1721_v55 }
 0xbce   : > { %v1717_v59 = vpop.f32.mrb[40].mxu0 }
 0xbcf   : > { %v1722_v60 = vpack.c.bf16 %v1717_v59, %v1717_v59  ;;  %v2436_v13 = vpop.f32.mrb[41].mxu0 }
 0xbd1   : > { %2440 = vmatmul.mubr.msk.bf16.vlgmr.msra.gmra.mrb[24].mxu1 %vm598_vm3, %v1722_v60 }
 0xbd2   : > { %2452 = vmatpush3.bf16.msra.mxu1 %v2570_v33 }
 0xbd3   : > { %2453 = vmatprep.subr.bf16.mxu1 %v2571_v34 }
 0xbd6   : > { %2454 = vmatpush3.bf16.msra.mxu1 %v2571_v34 }
 0xca4   : > { %v2441_v15 = vpop.f32.mrb[24].mxu1 }
 0xca5   : > { %v1783_v61 = vadd.f32 %v2441_v15, %v1484_v45  ;;  %v1767_v63 = vpop.f32.mrb[25].mxu1  ;;  %v2572_v15 = vld [vmem:[%s3111_s11 + $0x10] sm:$0xff]  }
 0xca6   : > { %v1781_v0 = vadd.f32 %v1767_v63, %v1482_v47  ;;  %v2442_v18 = vpop.f32.mrb[26].mxu1  ;;  %2455 = vmatprep.subr.bf16.mxu1 %v2572_v15  ;;  %v2574_v63 = vld [vmem:[%s3111_s11 + $0x20] sm:$0xff]  }
 0xca7   : > { %v1770_v5 = vpop.f32.mrb[27].mxu1  ;;  %v1786_v7 = vadd.f32 %v2644_v6, %v1783_v61  ;;  %2456 = vmatpush3.bf16.msra.mxu1 %v2572_v15  ;;  %v2573_v61 = vld [vmem:[%s3111_s11 + $0x18] sm:$0xff]   ;;  %v2576_v18 = vld [vmem:[%s3111_s11 + $0x30] sm:$0xff]  }
 0xca8   : > { %v1784_v9 = vadd.f32 %v2645_v8, %v1781_v0  ;;  %v1782_v62 = vadd.f32 %v1770_v5, %v1483_v50  ;;  %v2196_v50 = vld [vmem:[%s3108_s8] ss:$0 sm:$0xff]  ;;  %2457 = vmatprep.subr.bf16.mxu1 %v2573_v61  ;;  %v2575_v0 = vld [vmem:[%s3111_s11 + $0x28] sm:$0xff]  }
 0xca9   : > { %v3026_v14 = vadd.f32 %v2194_v4, %v1786_v7  ;;  %v2197_v5 = vld [vmem:[%s3110_s10] ss:$0 sm:$0xff] }
 0xcaa   : > { %v3023_v10 = vadd.f32 %v2194_v4, %v1784_v9  ;;  %v1785_v12 = vadd.f32 %v2646_v11, %v1782_v62 }
 0xcab   : > { %v1803_v20 = vsel %vm452_vm1, %v3026_v14, 0.0  ;;  %2458 = vmatpush3.bf16.msra.mxu1 %v2573_v61 }
 0xcac   : > { %v3028_v16 = vadd.f32 %v2194_v4, %v1785_v12  ;;  %v1797_v17 = vsel %vm445_vm0, %v3023_v10, 0.0  ;;  %2459 = vmatprep.subr.bf16.mxu1 %v2574_v63  ;;  %v2577_v4 = vld [vmem:[%s3111_s11 + $0x38] sm:$0xff]  }
 0xcad   : > { %1798 = vadd.xlane.f32.xlu1 %v1797_v17 }
 0xcae   : > { %v1800_v19 = vsel %vm445_vm0, %v3028_v16, 0.0 }
 0xcaf   : > { %1801 = vadd.xlane.f32.xlu0 %v1800_v19  ;;  %2460 = vmatpush3.bf16.msra.mxu1 %v2574_v63 }
 0xcb0   : > { %2461 = vmatprep.subr.bf16.mxu1 %v2575_v0 }
 0xcb1   : > { %1804 = vadd.xlane.f32.xlu1 %v1803_v20 }
 0xcb3   : > { %2462 = vmatpush3.bf16.msra.mxu1 %v2575_v0 }
 0xcb4   : > { %2463 = vmatprep.subr.bf16.mxu1 %v2576_v18 }
 0xcb7   : > { %2464 = vmatpush3.bf16.msra.mxu1 %v2576_v18 }
 0xcb8   : > { %2465 = vmatprep.subr.bf16.mxu1 %v2577_v4 }
 0xcbb   : > { %2466 = vmatpush3.bf16.msra.mxu1 %v2577_v4 }
 0xd3a   : > { %v1799_v21 = vpop.xlane.xlu1 %1798 }
 0xd3b   : > { %v1806_v22 = vmul.f32 0.03125, %v1799_v21 }
 0xd3c   : > { %v1802_v23 = vpop.xlane.xlu0 %1801 }
 0xd3d   : > { %v1809_v24 = vsub.f32 %v3023_v10, %v1806_v22  ;;  %v1807_v25 = vmul.f32 0.03125, %v1802_v23 }
 0xd3e   : > { %v1805_v26 = vpop.xlane.xlu1 %1804 }
 0xd3f   : > { %v1810_v27 = vsub.f32 %v3028_v16, %v1807_v25  ;;  %v1808_v28 = vmul.f32 0.03125, %v1805_v26  ;;  %v1812_v29 = vmul.f32 %v1809_v24, %v1809_v24 }
 0xd41   : > { %v1811_v30 = vsub.f32 %v3026_v14, %v1808_v28  ;;  %v1815_v57 = vsel %vm445_vm0, %v1812_v29, 0.0  ;;  %v1813_v31 = vmul.f32 %v1810_v27, %v1810_v27 }
 0xd42   : > { %1816 = vadd.xlane.f32.xlu0 %v1815_v57 }
 0xd43   : > { %v1818_v51 = vsel %vm445_vm0, %v1813_v31, 0.0  ;;  %v1814_v32 = vmul.f32 %v1811_v30, %v1811_v30 }
 0xd44   : > { %1819 = vadd.xlane.f32.xlu1 %v1818_v51 }
 0xd45   : > { %v1821_v1 = vsel %vm452_vm1, %v1814_v32, 0.0 }
 0xd46   : > { %1822 = vadd.xlane.f32.xlu0 %v1821_v1  ;;  %v2202_v1 = vld [vmem:[%s3112_s12] ss:$0 sm:$0xff] }
 0xdcf   : > { %v1817_v35 = vpop.xlane.xlu0 %1816 }
 0xdd0   : > { %v1824_v49 = vmul.f32 0.03125, %v1817_v35 }
 0xdd1   : > { %v1820_v36 = vpop.xlane.xlu1 %1819 }
 0xdd2   : > { %v1827_v37 = vadd.f32 1e-05, %v1824_v49  ;;  %v1825_v38 = vmul.f32 0.03125, %v1820_v36 }
 0xdd3   : > { %v1823_v39 = vpop.xlane.xlu0 %1822 }
 0xdd4   : > { %2632 = vrsqrt.f32 %v1827_v37  ;;  %v1828_v40 = vadd.f32 1e-05, %v1825_v38  ;;  %v1826_v41 = vmul.f32 0.03125, %v1823_v39 }
 0xdd6   : > { %2634 = vrsqrt.f32 %v1828_v40  ;;  %v1829_v42 = vadd.f32 1e-05, %v1826_v41 }
 0xdd8   : > { %2636 = vrsqrt.f32 %v1829_v42 }
 0xdde   : > { %v2633_v43 = vpop.eup %2632 }
 0xddf   : > { %v1833_v45 = vmul.f32 %v2633_v43, %v1809_v24 }
 0xde0   : > { %v2635_v46 = vpop.eup %2634 }
 0xde1   : > { %v1834_v47 = vmul.f32 %v2635_v46, %v1810_v27  ;;  %v1843_v48 = vmul.f32 %v2195_v44, %v1833_v45 }
 0xde2   : > { %v2637_v58 = vpop.eup %2636 }
 0xde3   : > { %v1835_v52 = vmul.f32 %v2637_v58, %v1811_v30  ;;  %v1844_v53 = vmul.f32 %v2195_v44, %v1834_v47  ;;  %v1853_v55 = vadd.f32 %v2196_v50, %v1843_v48 }
 0xde5   : > { %v1845_v54 = vmul.f32 %v2195_v44, %v1835_v52  ;;  %v1854_v56 = vadd.f32 %v2196_v50, %v1844_v53 }
 0xde7   : > { %v1855_v59 = vadd.f32 %v2196_v50, %v1845_v54  ;;  %v1856_v60 = vpack.c.bf16 %v1854_v56, %v1853_v55 }
 0xde9   : > { %v1857_v13 = vpack.c.bf16 %v1855_v59, %v1855_v59  ;;  %2447 = vmatprep.mubr.msk.bf16.mxu0 %vm445_vm0, %v1856_v60 }
 0xdeb   : > { %2448 = vmatmul.mubr.msk.bf16.vlgmr.msra.gmra.mrb[44].mxu0 %vm445_vm0, %v1857_v13 }
 0xebe   : > { %v2449_v6 = vpop.f32.mrb[44].mxu0 }
 0xebf   : > { %v1930_v7 = vadd.f32 %v2449_v6, %v2197_v5  ;;  %v1921_v8 = vpop.f32.mrb[45].mxu0 }
 0xec0   : > { %v1922_v9 = vadd.f32 %v2197_v5, %v1921_v8  ;;  %v2450_v62 = vpop.f32.mrb[46].mxu0 }
 0xec1   : > { %v1940_v11 = vmul.f32 0.70710677, %v1930_v7  ;;  %v1924_v12 = vpop.f32.mrb[47].mxu0  ;;  %v1937_v26 = vmul.f32 0.5, %v1930_v7 }
 0xec2   : > { %v1938_v17 = vmul.f32 0.70710677, %v1922_v9  ;;  %v1925_v19 = vadd.f32 %v2197_v5, %v1924_v12  ;;  %v1935_v27 = vmul.f32 0.5, %v1922_v9 }
 0xec3   : > { %2638 = verf.f32 %v1940_v11 }
 0xec4   : > { %2640 = verf.f32 %v1938_v17  ;;  %v1939_v20 = vmul.f32 0.70710677, %v1925_v19  ;;  %v1936_v28 = vmul.f32 0.5, %v1925_v19 }
 0xec6   : > { %2642 = verf.f32 %v1939_v20 }
 0xecd   : > { %v2639_v21 = vpop.eup %2638 }
 0xece   : > { %v2641_v22 = vpop.eup %2640  ;;  %v1946_v23 = vadd.f32 1.0, %v2639_v21 }
 0xecf   : > { %v1944_v24 = vadd.f32 1.0, %v2641_v22 }
 0xed0   : > { %v2643_v25 = vpop.eup %2642  ;;  %v1949_v30 = vmul.f32 %v1946_v23, %v1937_v26 }
 0xed1   : > { %v1945_v29 = vadd.f32 1.0, %v2643_v25  ;;  %v1947_v57 = vmul.f32 %v1944_v24, %v1935_v27 }
 0xed2   : > { %v1951_v32 = vpack.c.bf16 %v1949_v30, %v1949_v30 }
 0xed3   : > { %v1948_v31 = vmul.f32 %v1945_v29, %v1936_v28 }
 0xed5   : > { %v1950_v51 = vpack.c.bf16 %v1948_v31, %v1947_v57 }
 0xed7   : > { %2467 = vmatprep.mubr.bf16.mxu1 %v1950_v51 }
 0xed8   : > { %2468 = vmatmul.mubr.bf16.vlgmr.msra.gmra.mrb[28].mxu1 %v1951_v32 }
 0xfab   : > { %v2469_v2 = vpop.f32.mrb[28].mxu1 }
 0xfac   : > { %v2066_v3 = vadd.f32 %v2469_v2, %v2202_v1  ;;  %v2057_v33 = vpop.f32.mrb[29].mxu1 }
 0xfad   : > { %v2058_v34 = vadd.f32 %v2202_v1, %v2057_v33  ;;  %v2470_v35 = vpop.f32.mrb[30].mxu1 }
 0xfae   : > { %v2073_v49 = vadd.f32 %v2066_v3, %v3026_v14  ;;  %v2060_v36 = vpop.f32.mrb[31].mxu1 }
 0xfaf   : > { %v2071_v37 = vadd.f32 %v2058_v34, %v3023_v10  ;;  %v2061_v38 = vadd.f32 %v2202_v1, %v2060_v36 }
 0xfb0   : > { %2076 = vst.msk [vmem:[%s440_s20 + $0x10] sm:$0x1] %vm452_vm1, %v2073_v49 }
 0xfb1   : > { %2074 = vst.msk [vmem:[%s440_s20] sm:$0xff] %vm445_vm0, %v2071_v37  ;;  %v2072_v39 = vadd.f32 %v2061_v38, %v3028_v16 }
 0xfb3   : > { %2075 = vst.msk [vmem:[%s440_s20 + $0x8] sm:$0xff] %vm445_vm0, %v2072_v39 }
 0xfb4 PF: > { %s23_s25 = sadd.s32 1, %s2653_s25  }
 0xfb5   : > { %p20_p4 = scmp.ge.s32.totalorder %s23_s25, 4  }
 0xfb7   :  { %22 = sbr.rel (!%p20_p4) target bundleno = 1 (0x1), region = 102 }

</bundles_post_ra>
